<compile_context>
chip_gen: v7x
topology: tpu7x:2x2x1
jax: 0.10.0
libtpu: 0.0.40
codegen_flags: <defaults>
</compile_context>

<pallas_src>
import jax
import jax.numpy as jnp
from jax import lax
from jax.experimental import pallas as pl
from jax.experimental.pallas import tpu as pltpu

SCALE_POSITIONS = 10.0
QUANTIZE_IDX_MASK = 1
_EPS_NORM = 1e-12    # F.normalize eps
_EPS_GS = 1e-8       # gram-schmidt norm eps
_TILE = 512          # residue (lane) tile: ~0.5 MB/block -> fits v7x 64 MiB VMEM with 2x buffering


def _const_spec(shape):
    nd = len(shape)
    return pl.BlockSpec(shape, lambda *_, _nd=nd: (0,) * _nd)   # resident weight block


# --------------------------------------------------------------------------- #
# Fused per-tile kernel: gram-schmidt -> node proj -> normalize/linear_in ->   #
# VQ -> per-tile masked partial stats -> logits (residue-major store).         #
# --------------------------------------------------------------------------- #
def _fused_encoder_kernel(slab_ref, wn_ref, win_ref, bin_ref, e_ref, et_ref,
                          etn2_ref, e2sq_ref,
                          rt_ref, emb_ref, qx_ref, logits_ref, idx_ref,
                          cl_ref, prob_ref):
    # slab rows: 0-2 N(xyz), 3-5 CA(xyz), 6-8 C(xyz), 9 mask, 10-15 zero.
    def row(i):
        return slab_ref[i:i + 1, :]                     # (1, T)

    m = row(9)                                          # mask (1, T)
    n_rows = [row(i) for i in range(3)]
    ca_rows = [row(3 + i) for i in range(3)]
    c_rows = [row(6 + i) for i in range(3)]

    # ---- Gram-Schmidt frame (component-major rows, rsqrt on the EUP) ---- #
    v1 = [ca_rows[i] - n_rows[i] for i in range(3)]     # ca - n
    v2 = [c_rows[i] - ca_rows[i] for i in range(3)]     # c - ca
    inv_n1 = lax.rsqrt(v1[0] * v1[0] + v1[1] * v1[1] + v1[2] * v1[2] + _EPS_GS)
    e1 = [v * inv_n1 for v in v1]
    d12 = e1[0] * v2[0] + e1[1] * v2[1] + e1[2] * v2[2]
    u2 = [v2[i] - d12 * e1[i] for i in range(3)]
    inv_n2 = lax.rsqrt(u2[0] * u2[0] + u2[1] * u2[1] + u2[2] * u2[2] + _EPS_GS)
    e2 = [u * inv_n2 for u in u2]
    e3 = [e1[1] * e2[2] - e1[2] * e2[1],
          e1[2] * e2[0] - e1[0] * e2[2],
          e1[0] * e2[1] - e1[1] * e2[0]]

    # rot/trans rows written straight into the output slab (no 16-way concat);
    # masked residues get the identity frame.
    ident = (1.0, 0.0, 0.0, 0.0, 1.0, 0.0, 0.0, 0.0, 1.0)
    for r, (er, iv) in enumerate(zip(e1 + e2 + e3, ident)):
        rt_ref[r:r + 1, :] = jnp.where(m > 0.0, er, iv)
    for r in range(3):
        rt_ref[9 + r:10 + r, :] = n_rows[r] * (1.0 / SCALE_POSITIONS)
    rt_ref[12:16, :] = jnp.zeros((4, rt_ref.shape[1]), jnp.float32)

    rt = rt_ref[...]                                    # (16, T), feed matmul from buffer

    # ---- surrogate node trunk: s = W_node^T @ [rot; trans]  (d, T) ---- #
    # TODO(synk): stands in for NodeTypeEmbedding / EdgeEmb / Equiformer layers.
    s = jnp.dot(wn_ref[...], rt, preferred_element_type=jnp.float32)
    s_sq = jnp.sum(s * s, axis=0, keepdims=True)                          # (1, T)
    s_n = s * lax.rsqrt(jnp.maximum(s_sq, _EPS_NORM * _EPS_NORM))
    emb = (jnp.dot(win_ref[...], s_n, preferred_element_type=jnp.float32)
           + bin_ref[...])                                                # (qdim, T)
    emb_ref[...] = emb

    # ---- vector quantization ---- #
    # dist = -2 e^T x + |e|^2   (per-residue |x|^2 dropped: constant over codes).
    # Note: default MXU f32 matmul precision accepted for the argmin (matches v1).
    dist = (jnp.dot(etn2_ref[...], emb, preferred_element_type=jnp.float32)
            + e2sq_ref[...])                                              # (K, T)
    k = dist.shape[0]
    code_rows = lax.broadcasted_iota(jnp.int32, dist.shape, 0)            # int32 (K, T)
    mn = jnp.min(dist, axis=0, keepdims=True)                             # (1, T)
    # first index attaining the minimum (matches torch argmin tie-breaking)
    idx = jnp.min(jnp.where(dist <= mn, code_rows, k), axis=0, keepdims=True)
    # masked one-hot in a single select: onehot[k,t] = m[t] if k == idx[t] else 0
    onehot = jnp.where(code_rows == idx, m, 0.0)                          # (K, T)

    qx_m = jnp.dot(e_ref[...], onehot, preferred_element_type=jnp.float32)  # (qdim, T), masked
    qx_ref[...] = qx_m
    idx_ref[...] = jnp.where(m > 0.0, idx, -QUANTIZE_IDX_MASK)            # (1, T) int32

    # ---- per-tile partial stats (reduced in the wrapper; keeps grid axis parallel) ----
    diff = qx_m - emb
    cl_ref[...] = jnp.sum(diff * diff, axis=0, keepdims=True) * m         # (1, T)
    prob_ref[...] = jnp.sum(onehot, axis=1, keepdims=True)[None]          # (1, K, 1)

    # ---- logits = normalize(qx_) @ embed, emitted residue-major (lane-dense) ----
    q_sq = jnp.sum(qx_m * qx_m, axis=0, keepdims=True)
    qx_n = qx_m * lax.rsqrt(jnp.maximum(q_sq, _EPS_NORM * _EPS_NORM))
    logits_cm = jnp.dot(et_ref[...], qx_n, preferred_element_type=jnp.float32)  # (K, T)
    logits_ref[...] = jnp.transpose(logits_cm, (1, 0))                    # (T, K) store


def fused_encoder_pallas(slab, w_node_t, w_in_t, b_in, embed, embed_t,
                         embed_t_n2, e2sq, tile):
    np_ = slab.shape[1]
    qdim, k = embed.shape
    n_tiles = np_ // tile
    out_shape = (
        jax.ShapeDtypeStruct((16, np_), jnp.float32),     # rot(9)+trans(3)+pad slab
        jax.ShapeDtypeStruct((qdim, np_), jnp.float32),   # emb     (component-major)
        jax.ShapeDtypeStruct((qdim, np_), jnp.float32),   # qx_     (component-major, masked)
        jax.ShapeDtypeStruct((np_, k), jnp.float32),      # logits  (residue-major)
        jax.ShapeDtypeStruct((1, np_), jnp.int32),        # idx
        jax.ShapeDtypeStruct((1, np_), jnp.float32),      # per-residue commitment contrib
        jax.ShapeDtypeStruct((n_tiles, k, 1), jnp.float32),  # per-tile onehot counts
    )
    in_specs = [
        pl.BlockSpec((16, tile), lambda i: (0, i)),       # slab (tiled over residues)
        _const_spec(w_node_t.shape),                      # weights: DMA'd once
        _const_spec(w_in_t.shape),
        _const_spec(b_in.shape),
        _const_spec(embed.shape),
        _const_spec(embed_t.shape),
        _const_spec(embed_t_n2.shape),
        _const_spec(e2sq.shape),
    ]
    out_specs = (
        pl.BlockSpec((16, tile), lambda i: (0, i)),
        pl.BlockSpec((qdim, tile), lambda i: (0, i)),
        pl.BlockSpec((qdim, tile), lambda i: (0, i)),
        pl.BlockSpec((tile, k), lambda i: (i, 0)),
        pl.BlockSpec((1, tile), lambda i: (0, i)),
        pl.BlockSpec((1, tile), lambda i: (0, i)),
        pl.BlockSpec((1, k, 1), lambda i: (i, 0, 0)),
    )
    return pl.pallas_call(
        _fused_encoder_kernel,
        out_shape=out_shape,
        grid=(n_tiles,),
        in_specs=in_specs,
        out_specs=out_specs,
        compiler_params=pltpu.CompilerParams(
            dimension_semantics=("parallel",)),           # megacore-shardable on v7x
    )(slab, w_node_t, w_in_t, b_in, embed, embed_t, embed_t_n2, e2sq)


# --------------------------------------------------------------------------- #
# Parameters + forward                                                         #
# --------------------------------------------------------------------------- #
def init_params(key, d, qdim, n_embed):
    ks = jax.random.split(key, 4)

    def sc(fan_in):
        return 1.0 / jnp.sqrt(jnp.float32(fan_in))

    return {
        # surrogate node-feature projection (stand-in for the Equiformer trunk),
        # stored pre-transposed as (d, 16); columns 12-15 hit zero feat rows.
        "w_node_t": jax.random.normal(ks[0], (d, 16), jnp.float32) * sc(12.0),
        # linear_in: Linear(eqnet.d -> quantize.dim), pre-transposed (qdim, d)
        "w_in_t": jax.random.normal(ks[1], (qdim, d), jnp.float32) * sc(d),
        "b_in": jax.random.normal(ks[2], (qdim, 1), jnp.float32) * 0.01,
        # quantize.embed: (dim, n_embed)
        "embed": jax.random.normal(ks[3], (qdim, n_embed), jnp.float32),
    }


def equiformer_encoder_forward(params, atom_positions, attention_mask, residue_index):
    del residue_index  # only used by EdgeEmb (see TODO at top)
    n_res = atom_positions.shape[0]
    tile = _TILE
    np_ = ((n_res + tile - 1) // tile) * tile            # pad to FULL lane tiles
    mask_f = attention_mask.astype(jnp.float32)

    # pack N/CA/C coords + mask into ONE (16, Np) component-major slab (single DMA)
    coords = jnp.transpose(atom_positions[:, :3, :], (1, 2, 0)).reshape(9, n_res)
    slab = jnp.concatenate(
        [coords, mask_f[None, :], jnp.zeros((6, n_res), jnp.float32)], axis=0)
    slab = jnp.pad(slab, ((0, 0), (0, np_ - n_res)))

    embed = params["embed"]                              # (qdim, K)
    embed_t = jnp.transpose(embed)                       # (K, qdim) for logits matmul
    embed_t_n2 = -2.0 * embed_t                          # pre-scaled for the distance matmul
    e2sq = jnp.sum(embed * embed, axis=0)[:, None]       # (K, 1) hoisted |e|^2

    (rt, emb_cm, qx_cm, logits_rm, idx_row, cl_row, prob_part) = fused_encoder_pallas(
        slab, params["w_node_t"], params["w_in_t"], params["b_in"],
        embed, embed_t, embed_t_n2, e2sq, tile)

    # output-interface transforms only (small; the big logits array is already residue-major)
    rotmat = jnp.transpose(rt[:9, :n_res].reshape(3, 3, n_res), (2, 1, 0))  # (N,3,3)
    trans = jnp.transpose(rt[9:12, :n_res])                                 # (N,3)
    emb = jnp.transpose(emb_cm[:, :n_res])                                  # (N,qdim)
    raw_qx = jnp.transpose(qx_cm[:, :n_res])                                # (N,qdim)
    logits = logits_rm[:n_res, :]                                           # (N,K) slice only
    idx = idx_row[0, :n_res]

    # global masked reductions from per-tile partials (tiny)
    qdim = embed.shape[0]
    num = jnp.maximum(jnp.sum(mask_f), 1.0)
    commitment_loss = jnp.sum(cl_row) / (num * qdim)
    prob = jnp.sum(prob_part, axis=0)[:, 0] / num
    ppl = jnp.exp(-jnp.sum(prob * jnp.log(prob + 1e-7)))

    # TODO(synk): Quantize.dead_codes relies on EMA usage state not present in forward.
    return {
        "emb": emb,
        "raw_qx": raw_qx,
        "commitment_loss": commitment_loss,
        "logits": logits,
        "idx": idx,
        "prob": prob,
        "ppl": ppl,
        "dead_codes": jnp.array(0, dtype=jnp.int32),
        "rotmat": rotmat,
        "trans": trans,
    }


if __name__ == "__main__":
    key = jax.random.PRNGKey(0)
    k_pos, k_par = jax.random.split(key)

    n_res, n_atom = 8, 4
    d, qdim, n_embed = 32, 16, 128

    atom_positions = jax.random.normal(k_pos, (n_res, n_atom, 3), jnp.float32) * 5.0
    attention_mask = jnp.array([1, 1, 1, 1, 1, 1, 0, 0], dtype=jnp.int32)
    residue_index = jnp.arange(n_res, dtype=jnp.int32)

    params = init_params(k_par, d=d, qdim=qdim, n_embed=n_embed)

    out = jax.jit(equiformer_encoder_forward)(params, atom_positions,
                                              attention_mask, residue_index)
    out = jax.tree_util.tree_map(jax.block_until_ready, out)
    print("KERNEL_OK")
</pallas_src>

<mosaic_0001>
module attributes {stable_mosaic.version = 11 : i64} {
  func.func @_fused_encoder_kernel(%arg0: i32, %arg1: memref<16x512xf32, #tpu.memory_space<vmem>>, %arg2: memref<32x16xf32, #tpu.memory_space<vmem>>, %arg3: memref<16x32xf32, #tpu.memory_space<vmem>>, %arg4: memref<16x1xf32, #tpu.memory_space<vmem>>, %arg5: memref<16x128xf32, #tpu.memory_space<vmem>>, %arg6: memref<128x16xf32, #tpu.memory_space<vmem>>, %arg7: memref<128x16xf32, #tpu.memory_space<vmem>>, %arg8: memref<128x1xf32, #tpu.memory_space<vmem>>, %arg9: memref<16x512xf32, #tpu.memory_space<vmem>>, %arg10: memref<16x512xf32, #tpu.memory_space<vmem>>, %arg11: memref<16x512xf32, #tpu.memory_space<vmem>>, %arg12: memref<512x128xf32, #tpu.memory_space<vmem>>, %arg13: memref<1x512xi32, #tpu.memory_space<vmem>>, %arg14: memref<1x512xf32, #tpu.memory_space<vmem>>, %arg15: memref<1x128x1xf32, #tpu.memory_space<vmem>>) attributes {dimension_semantics = [#tpu.dimension_semantics<parallel>], iteration_bounds = array<i64: 1>, scalar_prefetch = 0 : i64, scratch_operands = 0 : i64, tpu.core_type = #tpu.core_type<tc>, window_params = [{transform_indices = @transform_0, window_bounds = array<i64: 16, 512>}, {pipeline_mode = #tpu.pipeline_mode<synchronous>, transform_indices = @transform_1, window_bounds = array<i64: 32, 16>}, {pipeline_mode = #tpu.pipeline_mode<synchronous>, transform_indices = @transform_2, window_bounds = array<i64: 16, 32>}, {pipeline_mode = #tpu.pipeline_mode<synchronous>, transform_indices = @transform_3, window_bounds = array<i64: 16, 1>}, {pipeline_mode = #tpu.pipeline_mode<synchronous>, transform_indices = @transform_4, window_bounds = array<i64: 16, 128>}, {pipeline_mode = #tpu.pipeline_mode<synchronous>, transform_indices = @transform_5, window_bounds = array<i64: 128, 16>}, {pipeline_mode = #tpu.pipeline_mode<synchronous>, transform_indices = @transform_6, window_bounds = array<i64: 128, 16>}, {pipeline_mode = #tpu.pipeline_mode<synchronous>, transform_indices = @transform_7, window_bounds = array<i64: 128, 1>}, {transform_indices = @transform_8, window_bounds = array<i64: 16, 512>}, {transform_indices = @transform_9, window_bounds = array<i64: 16, 512>}, {transform_indices = @transform_10, window_bounds = array<i64: 16, 512>}, {transform_indices = @transform_11, window_bounds = array<i64: 512, 128>}, {transform_indices = @transform_12, window_bounds = array<i64: 1, 512>}, {transform_indices = @transform_13, window_bounds = array<i64: 1, 512>}, {transform_indices = @transform_14, window_bounds = array<i64: 1, 128, 1>}]} {
    %c9 = arith.constant 9 : index
    %c0 = arith.constant 0 : index
    %0 = vector.load %arg1[%c9, %c0] : memref<16x512xf32, #tpu.memory_space<vmem>>, vector<1x512xf32>
    %c0_0 = arith.constant 0 : index
    %c0_1 = arith.constant 0 : index
    %1 = vector.load %arg1[%c0_0, %c0_1] : memref<16x512xf32, #tpu.memory_space<vmem>>, vector<1x512xf32>
    %c1 = arith.constant 1 : index
    %c0_2 = arith.constant 0 : index
    %2 = vector.load %arg1[%c1, %c0_2] : memref<16x512xf32, #tpu.memory_space<vmem>>, vector<1x512xf32>
    %c2 = arith.constant 2 : index
    %c0_3 = arith.constant 0 : index
    %3 = vector.load %arg1[%c2, %c0_3] : memref<16x512xf32, #tpu.memory_space<vmem>>, vector<1x512xf32>
    %c3 = arith.constant 3 : index
    %c0_4 = arith.constant 0 : index
    %4 = vector.load %arg1[%c3, %c0_4] : memref<16x512xf32, #tpu.memory_space<vmem>>, vector<1x512xf32>
    %c4 = arith.constant 4 : index
    %c0_5 = arith.constant 0 : index
    %5 = vector.load %arg1[%c4, %c0_5] : memref<16x512xf32, #tpu.memory_space<vmem>>, vector<1x512xf32>
    %c5 = arith.constant 5 : index
    %c0_6 = arith.constant 0 : index
    %6 = vector.load %arg1[%c5, %c0_6] : memref<16x512xf32, #tpu.memory_space<vmem>>, vector<1x512xf32>
    %c6 = arith.constant 6 : index
    %c0_7 = arith.constant 0 : index
    %7 = vector.load %arg1[%c6, %c0_7] : memref<16x512xf32, #tpu.memory_space<vmem>>, vector<1x512xf32>
    %c7 = arith.constant 7 : index
    %c0_8 = arith.constant 0 : index
    %8 = vector.load %arg1[%c7, %c0_8] : memref<16x512xf32, #tpu.memory_space<vmem>>, vector<1x512xf32>
    %c8 = arith.constant 8 : index
    %c0_9 = arith.constant 0 : index
    %9 = vector.load %arg1[%c8, %c0_9] : memref<16x512xf32, #tpu.memory_space<vmem>>, vector<1x512xf32>
    %10 = arith.subf %4, %1 : vector<1x512xf32>
    %11 = arith.subf %5, %2 : vector<1x512xf32>
    %12 = arith.subf %6, %3 : vector<1x512xf32>
    %13 = arith.subf %7, %4 : vector<1x512xf32>
    %14 = arith.subf %8, %5 : vector<1x512xf32>
    %15 = arith.subf %9, %6 : vector<1x512xf32>
    %16 = arith.mulf %10, %10 : vector<1x512xf32>
    %17 = arith.mulf %11, %11 : vector<1x512xf32>
    %18 = arith.addf %16, %17 : vector<1x512xf32>
    %19 = arith.mulf %12, %12 : vector<1x512xf32>
    %20 = arith.addf %18, %19 : vector<1x512xf32>
    %cst = arith.constant 9.99999993E-9 : f32
    %21 = vector.broadcast %cst : f32 to vector<1x512xf32>
    %22 = arith.addf %20, %21 : vector<1x512xf32>
    %23 = math.rsqrt %22 : vector<1x512xf32>
    %24 = arith.mulf %10, %23 : vector<1x512xf32>
    %25 = arith.mulf %11, %23 : vector<1x512xf32>
    %26 = arith.mulf %12, %23 : vector<1x512xf32>
    %27 = arith.mulf %24, %13 : vector<1x512xf32>
    %28 = arith.mulf %25, %14 : vector<1x512xf32>
    %29 = arith.addf %27, %28 : vector<1x512xf32>
    %30 = arith.mulf %26, %15 : vector<1x512xf32>
    %31 = arith.addf %29, %30 : vector<1x512xf32>
    %32 = arith.mulf %31, %24 : vector<1x512xf32>
    %33 = arith.subf %13, %32 : vector<1x512xf32>
    %34 = arith.mulf %31, %25 : vector<1x512xf32>
    %35 = arith.subf %14, %34 : vector<1x512xf32>
    %36 = arith.mulf %31, %26 : vector<1x512xf32>
    %37 = arith.subf %15, %36 : vector<1x512xf32>
    %38 = arith.mulf %33, %33 : vector<1x512xf32>
    %39 = arith.mulf %35, %35 : vector<1x512xf32>
    %40 = arith.addf %38, %39 : vector<1x512xf32>
    %41 = arith.mulf %37, %37 : vector<1x512xf32>
    %42 = arith.addf %40, %41 : vector<1x512xf32>
    %cst_10 = arith.constant 9.99999993E-9 : f32
    %43 = vector.broadcast %cst_10 : f32 to vector<1x512xf32>
    %44 = arith.addf %42, %43 : vector<1x512xf32>
    %45 = math.rsqrt %44 : vector<1x512xf32>
    %46 = arith.mulf %33, %45 : vector<1x512xf32>
    %47 = arith.mulf %35, %45 : vector<1x512xf32>
    %48 = arith.mulf %37, %45 : vector<1x512xf32>
    %49 = arith.mulf %25, %48 : vector<1x512xf32>
    %50 = arith.mulf %26, %47 : vector<1x512xf32>
    %51 = arith.subf %49, %50 : vector<1x512xf32>
    %52 = arith.mulf %26, %46 : vector<1x512xf32>
    %53 = arith.mulf %24, %48 : vector<1x512xf32>
    %54 = arith.subf %52, %53 : vector<1x512xf32>
    %55 = arith.mulf %24, %47 : vector<1x512xf32>
    %56 = arith.mulf %25, %46 : vector<1x512xf32>
    %57 = arith.subf %55, %56 : vector<1x512xf32>
    %cst_11 = arith.constant 0.000000e+00 : f32
    %58 = vector.broadcast %cst_11 : f32 to vector<1x512xf32>
    %59 = arith.cmpf ogt, %0, %58 : vector<1x512xf32>
    %cst_12 = arith.constant 1.000000e+00 : f32
    %60 = vector.broadcast %cst_12 : f32 to vector<1x512xf32>
    %61 = arith.select %59, %24, %60 : vector<1x512xi1>, vector<1x512xf32>
    %c0_13 = arith.constant 0 : index
    %c0_14 = arith.constant 0 : index
    %62 = vector.load %arg9[%c0_13, %c0_14] : memref<16x512xf32, #tpu.memory_space<vmem>>, vector<1x512xf32>
    tpu.vector_store %arg9[%c0_13, %c0_14], %61 {strides = array<i32>} : memref<16x512xf32, #tpu.memory_space<vmem>>, vector<1x512xf32>,
    %cst_15 = arith.constant 0.000000e+00 : f32
    %63 = vector.broadcast %cst_15 : f32 to vector<1x512xf32>
    %64 = arith.cmpf ogt, %0, %63 : vector<1x512xf32>
    %cst_16 = arith.constant 0.000000e+00 : f32
    %65 = vector.broadcast %cst_16 : f32 to vector<1x512xf32>
    %66 = arith.select %64, %25, %65 : vector<1x512xi1>, vector<1x512xf32>
    %c1_17 = arith.constant 1 : index
    %c0_18 = arith.constant 0 : index
    %67 = vector.load %arg9[%c1_17, %c0_18] : memref<16x512xf32, #tpu.memory_space<vmem>>, vector<1x512xf32>
    tpu.vector_store %arg9[%c1_17, %c0_18], %66 {strides = array<i32>} : memref<16x512xf32, #tpu.memory_space<vmem>>, vector<1x512xf32>,
    %cst_19 = arith.constant 0.000000e+00 : f32
    %68 = vector.broadcast %cst_19 : f32 to vector<1x512xf32>
    %69 = arith.cmpf ogt, %0, %68 : vector<1x512xf32>
    %cst_20 = arith.constant 0.000000e+00 : f32
    %70 = vector.broadcast %cst_20 : f32 to vector<1x512xf32>
    %71 = arith.select %69, %26, %70 : vector<1x512xi1>, vector<1x512xf32>
    %c2_21 = arith.constant 2 : index
    %c0_22 = arith.constant 0 : index
    %72 = vector.load %arg9[%c2_21, %c0_22] : memref<16x512xf32, #tpu.memory_space<vmem>>, vector<1x512xf32>
    tpu.vector_store %arg9[%c2_21, %c0_22], %71 {strides = array<i32>} : memref<16x512xf32, #tpu.memory_space<vmem>>, vector<1x512xf32>,
    %cst_23 = arith.constant 0.000000e+00 : f32
    %73 = vector.broadcast %cst_23 : f32 to vector<1x512xf32>
    %74 = arith.cmpf ogt, %0, %73 : vector<1x512xf32>
    %cst_24 = arith.constant 0.000000e+00 : f32
    %75 = vector.broadcast %cst_24 : f32 to vector<1x512xf32>
    %76 = arith.select %74, %46, %75 : vector<1x512xi1>, vector<1x512xf32>
    %c3_25 = arith.constant 3 : index
    %c0_26 = arith.constant 0 : index
    %77 = vector.load %arg9[%c3_25, %c0_26] : memref<16x512xf32, #tpu.memory_space<vmem>>, vector<1x512xf32>
    tpu.vector_store %arg9[%c3_25, %c0_26], %76 {strides = array<i32>} : memref<16x512xf32, #tpu.memory_space<vmem>>, vector<1x512xf32>,
    %cst_27 = arith.constant 0.000000e+00 : f32
    %78 = vector.broadcast %cst_27 : f32 to vector<1x512xf32>
    %79 = arith.cmpf ogt, %0, %78 : vector<1x512xf32>
    %cst_28 = arith.constant 1.000000e+00 : f32
    %80 = vector.broadcast %cst_28 : f32 to vector<1x512xf32>
    %81 = arith.select %79, %47, %80 : vector<1x512xi1>, vector<1x512xf32>
    %c4_29 = arith.constant 4 : index
    %c0_30 = arith.constant 0 : index
    %82 = vector.load %arg9[%c4_29, %c0_30] : memref<16x512xf32, #tpu.memory_space<vmem>>, vector<1x512xf32>
    tpu.vector_store %arg9[%c4_29, %c0_30], %81 {strides = array<i32>} : memref<16x512xf32, #tpu.memory_space<vmem>>, vector<1x512xf32>,
    %cst_31 = arith.constant 0.000000e+00 : f32
    %83 = vector.broadcast %cst_31 : f32 to vector<1x512xf32>
    %84 = arith.cmpf ogt, %0, %83 : vector<1x512xf32>
    %cst_32 = arith.constant 0.000000e+00 : f32
    %85 = vector.broadcast %cst_32 : f32 to vector<1x512xf32>
    %86 = arith.select %84, %48, %85 : vector<1x512xi1>, vector<1x512xf32>
    %c5_33 = arith.constant 5 : index
    %c0_34 = arith.constant 0 : index
    %87 = vector.load %arg9[%c5_33, %c0_34] : memref<16x512xf32, #tpu.memory_space<vmem>>, vector<1x512xf32>
    tpu.vector_store %arg9[%c5_33, %c0_34], %86 {strides = array<i32>} : memref<16x512xf32, #tpu.memory_space<vmem>>, vector<1x512xf32>,
    %cst_35 = arith.constant 0.000000e+00 : f32
    %88 = vector.broadcast %cst_35 : f32 to vector<1x512xf32>
    %89 = arith.cmpf ogt, %0, %88 : vector<1x512xf32>
    %cst_36 = arith.constant 0.000000e+00 : f32
    %90 = vector.broadcast %cst_36 : f32 to vector<1x512xf32>
    %91 = arith.select %89, %51, %90 : vector<1x512xi1>, vector<1x512xf32>
    %c6_37 = arith.constant 6 : index
    %c0_38 = arith.constant 0 : index
    %92 = vector.load %arg9[%c6_37, %c0_38] : memref<16x512xf32, #tpu.memory_space<vmem>>, vector<1x512xf32>
    tpu.vector_store %arg9[%c6_37, %c0_38], %91 {strides = array<i32>} : memref<16x512xf32, #tpu.memory_space<vmem>>, vector<1x512xf32>,
    %cst_39 = arith.constant 0.000000e+00 : f32
    %93 = vector.broadcast %cst_39 : f32 to vector<1x512xf32>
    %94 = arith.cmpf ogt, %0, %93 : vector<1x512xf32>
    %cst_40 = arith.constant 0.000000e+00 : f32
    %95 = vector.broadcast %cst_40 : f32 to vector<1x512xf32>
    %96 = arith.select %94, %54, %95 : vector<1x512xi1>, vector<1x512xf32>
    %c7_41 = arith.constant 7 : index
    %c0_42 = arith.constant 0 : index
    %97 = vector.load %arg9[%c7_41, %c0_42] : memref<16x512xf32, #tpu.memory_space<vmem>>, vector<1x512xf32>
    tpu.vector_store %arg9[%c7_41, %c0_42], %96 {strides = array<i32>} : memref<16x512xf32, #tpu.memory_space<vmem>>, vector<1x512xf32>,
    %cst_43 = arith.constant 0.000000e+00 : f32
    %98 = vector.broadcast %cst_43 : f32 to vector<1x512xf32>
    %99 = arith.cmpf ogt, %0, %98 : vector<1x512xf32>
    %cst_44 = arith.constant 1.000000e+00 : f32
    %100 = vector.broadcast %cst_44 : f32 to vector<1x512xf32>
    %101 = arith.select %99, %57, %100 : vector<1x512xi1>, vector<1x512xf32>
    %c8_45 = arith.constant 8 : index
    %c0_46 = arith.constant 0 : index
    %102 = vector.load %arg9[%c8_45, %c0_46] : memref<16x512xf32, #tpu.memory_space<vmem>>, vector<1x512xf32>
    tpu.vector_store %arg9[%c8_45, %c0_46], %101 {strides = array<i32>} : memref<16x512xf32, #tpu.memory_space<vmem>>, vector<1x512xf32>,
    %cst_47 = arith.constant 1.000000e-01 : f32
    %103 = vector.broadcast %cst_47 : f32 to vector<1x512xf32>
    %104 = arith.mulf %1, %103 : vector<1x512xf32>
    %c9_48 = arith.constant 9 : index
    %c0_49 = arith.constant 0 : index
    %105 = vector.load %arg9[%c9_48, %c0_49] : memref<16x512xf32, #tpu.memory_space<vmem>>, vector<1x512xf32>
    tpu.vector_store %arg9[%c9_48, %c0_49], %104 {strides = array<i32>} : memref<16x512xf32, #tpu.memory_space<vmem>>, vector<1x512xf32>,
    %cst_50 = arith.constant 1.000000e-01 : f32
    %106 = vector.broadcast %cst_50 : f32 to vector<1x512xf32>
    %107 = arith.mulf %2, %106 : vector<1x512xf32>
    %c10 = arith.constant 10 : index
    %c0_51 = arith.constant 0 : index
    %108 = vector.load %arg9[%c10, %c0_51] : memref<16x512xf32, #tpu.memory_space<vmem>>, vector<1x512xf32>
    tpu.vector_store %arg9[%c10, %c0_51], %107 {strides = array<i32>} : memref<16x512xf32, #tpu.memory_space<vmem>>, vector<1x512xf32>,
    %cst_52 = arith.constant 1.000000e-01 : f32
    %109 = vector.broadcast %cst_52 : f32 to vector<1x512xf32>
    %110 = arith.mulf %3, %109 : vector<1x512xf32>
    %c11 = arith.constant 11 : index
    %c0_53 = arith.constant 0 : index
    %111 = vector.load %arg9[%c11, %c0_53] : memref<16x512xf32, #tpu.memory_space<vmem>>, vector<1x512xf32>
    tpu.vector_store %arg9[%c11, %c0_53], %110 {strides = array<i32>} : memref<16x512xf32, #tpu.memory_space<vmem>>, vector<1x512xf32>,
    %cst_54 = arith.constant 0.000000e+00 : f32
    %112 = vector.broadcast %cst_54 : f32 to vector<4x512xf32>
    %c12 = arith.constant 12 : index
    %c0_55 = arith.constant 0 : index
    %113 = vector.load %arg9[%c12, %c0_55] : memref<16x512xf32, #tpu.memory_space<vmem>>, vector<4x512xf32>
    tpu.vector_store %arg9[%c12, %c0_55], %112 {strides = array<i32>} : memref<16x512xf32, #tpu.memory_space<vmem>>, vector<4x512xf32>,
    %c0_56 = arith.constant 0 : index
    %c0_57 = arith.constant 0 : index
    %114 = vector.load %arg9[%c0_56, %c0_57] : memref<16x512xf32, #tpu.memory_space<vmem>>, vector<16x512xf32>
    %c0_58 = arith.constant 0 : index
    %c0_59 = arith.constant 0 : index
    %115 = vector.load %arg2[%c0_58, %c0_59] : memref<32x16xf32, #tpu.memory_space<vmem>>, vector<32x16xf32>
    %cst_60 = arith.constant dense<0.000000e+00> : vector<32x512xf32>
    %116 = tpu.matmul %115, %114, %cst_60 {dimension_numbers = #tpu.dot_dimension_numbers<[1], [0], [0], [1], [0, 0, 1, 1], [], []>} : vector<32x16xf32>, vector<16x512xf32>, vector<32x512xf32> -> vector<32x512xf32>
    %117 = arith.mulf %116, %116 : vector<32x512xf32>
    %cst_61 = arith.constant dense<0.000000e+00> : vector<512xf32>
    %118 = vector.multi_reduction <add>, %117, %cst_61 [0] : vector<32x512xf32> to vector<512xf32>
    %119 = vector.shape_cast %118 : vector<512xf32> to vector<1x512xf32>
    %cst_62 = arith.constant 1.000000e-24 : f32
    %120 = vector.broadcast %cst_62 : f32 to vector<1x512xf32>
    %121 = arith.maximumf %119, %120 : vector<1x512xf32>
    %122 = math.rsqrt %121 : vector<1x512xf32>
    %123 = vector.broadcast %122 : vector<1x512xf32> to vector<32x512xf32>
    %124 = arith.mulf %116, %123 : vector<32x512xf32>
    %c0_63 = arith.constant 0 : index
    %c0_64 = arith.constant 0 : index
    %125 = vector.load %arg3[%c0_63, %c0_64] : memref<16x32xf32, #tpu.memory_space<vmem>>, vector<16x32xf32>
    %cst_65 = arith.constant dense<0.000000e+00> : vector<16x512xf32>
    %126 = tpu.matmul %125, %124, %cst_65 {dimension_numbers = #tpu.dot_dimension_numbers<[1], [0], [0], [1], [0, 0, 1, 1], [], []>} : vector<16x32xf32>, vector<32x512xf32>, vector<16x512xf32> -> vector<16x512xf32>
    %c0_66 = arith.constant 0 : index
    %c0_67 = arith.constant 0 : index
    %127 = vector.load %arg4[%c0_66, %c0_67] : memref<16x1xf32, #tpu.memory_space<vmem>>, vector<16x1xf32>
    %128 = vector.broadcast %127 : vector<16x1xf32> to vector<16x512xf32>
    %129 = arith.addf %126, %128 : vector<16x512xf32>
    %c0_68 = arith.constant 0 : index
    %c0_69 = arith.constant 0 : index
    %130 = vector.load %arg10[%c0_68, %c0_69] : memref<16x512xf32, #tpu.memory_space<vmem>>, vector<16x512xf32>
    tpu.vector_store %arg10[%c0_68, %c0_69], %129 {strides = array<i32>} : memref<16x512xf32, #tpu.memory_space<vmem>>, vector<16x512xf32>,
    %c0_70 = arith.constant 0 : index
    %c0_71 = arith.constant 0 : index
    %131 = vector.load %arg7[%c0_70, %c0_71] : memref<128x16xf32, #tpu.memory_space<vmem>>, vector<128x16xf32>
    %cst_72 = arith.constant dense<0.000000e+00> : vector<128x512xf32>
    %132 = tpu.matmul %131, %129, %cst_72 {dimension_numbers = #tpu.dot_dimension_numbers<[1], [0], [0], [1], [0, 0, 1, 1], [], []>} : vector<128x16xf32>, vector<16x512xf32>, vector<128x512xf32> -> vector<128x512xf32>
    %c0_73 = arith.constant 0 : index
    %c0_74 = arith.constant 0 : index
    %133 = vector.load %arg8[%c0_73, %c0_74] : memref<128x1xf32, #tpu.memory_space<vmem>>, vector<128x1xf32>
    %134 = vector.broadcast %133 : vector<128x1xf32> to vector<128x512xf32>
    %135 = arith.addf %132, %134 : vector<128x512xf32>
    %136 = tpu.iota {dimensions = array<i32: 0>} : vector<128x512xi32>
    %cst_75 = arith.constant dense<0x7F800000> : vector<512xf32>
    %137 = vector.multi_reduction <minimumf>, %135, %cst_75 [0] : vector<128x512xf32> to vector<512xf32>
    %138 = vector.shape_cast %137 : vector<512xf32> to vector<1x512xf32>
    %139 = vector.broadcast %138 : vector<1x512xf32> to vector<128x512xf32>
    %140 = arith.cmpf ole, %135, %139 : vector<128x512xf32>
    %c128_i32 = arith.constant 128 : i32
    %141 = vector.broadcast %c128_i32 : i32 to vector<128x512xi32>
    %142 = arith.select %140, %136, %141 : vector<128x512xi1>, vector<128x512xi32>
    %cst_76 = arith.constant dense<2147483647> : vector<512xi32>
    %143 = vector.multi_reduction <minsi>, %142, %cst_76 [0] : vector<128x512xi32> to vector<512xi32>
    %144 = vector.shape_cast %143 : vector<512xi32> to vector<1x512xi32>
    %145 = vector.broadcast %144 : vector<1x512xi32> to vector<128x512xi32>
    %146 = arith.cmpi eq, %136, %145 : vector<128x512xi32>
    %cst_77 = arith.constant 0.000000e+00 : f32
    %147 = vector.shape_cast %0 : vector<1x512xf32> to vector<1x512xf32>
    %148 = vector.broadcast %147 : vector<1x512xf32> to vector<128x512xf32>
    %149 = vector.broadcast %cst_77 : f32 to vector<128x512xf32>
    %150 = arith.select %146, %148, %149 : vector<128x512xi1>, vector<128x512xf32>
    %c0_78 = arith.constant 0 : index
    %c0_79 = arith.constant 0 : index
    %151 = vector.load %arg5[%c0_78, %c0_79] : memref<16x128xf32, #tpu.memory_space<vmem>>, vector<16x128xf32>
    %cst_80 = arith.constant dense<0.000000e+00> : vector<16x512xf32>
    %152 = tpu.matmul %151, %150, %cst_80 {dimension_numbers = #tpu.dot_dimension_numbers<[1], [0], [0], [1], [0, 0, 1, 1], [], []>} : vector<16x128xf32>, vector<128x512xf32>, vector<16x512xf32> -> vector<16x512xf32>
    %c0_81 = arith.constant 0 : index
    %c0_82 = arith.constant 0 : index
    %153 = vector.load %arg11[%c0_81, %c0_82] : memref<16x512xf32, #tpu.memory_space<vmem>>, vector<16x512xf32>
    tpu.vector_store %arg11[%c0_81, %c0_82], %152 {strides = array<i32>} : memref<16x512xf32, #tpu.memory_space<vmem>>, vector<16x512xf32>,
    %cst_83 = arith.constant 0.000000e+00 : f32
    %154 = vector.broadcast %cst_83 : f32 to vector<1x512xf32>
    %155 = arith.cmpf ogt, %0, %154 : vector<1x512xf32>
    %c-1_i32 = arith.constant -1 : i32
    %156 = vector.broadcast %c-1_i32 : i32 to vector<1x512xi32>
    %157 = arith.select %155, %144, %156 : vector<1x512xi1>, vector<1x512xi32>
    %c0_84 = arith.constant 0 : index
    %c0_85 = arith.constant 0 : index
    %158 = vector.load %arg13[%c0_84, %c0_85] : memref<1x512xi32, #tpu.memory_space<vmem>>, vector<1x512xi32>
    tpu.vector_store %arg13[%c0_84, %c0_85], %157 {strides = array<i32>} : memref<1x512xi32, #tpu.memory_space<vmem>>, vector<1x512xi32>,
    %159 = arith.subf %152, %129 : vector<16x512xf32>
    %160 = arith.mulf %159, %159 : vector<16x512xf32>
    %cst_86 = arith.constant dense<0.000000e+00> : vector<512xf32>
    %161 = vector.multi_reduction <add>, %160, %cst_86 [0] : vector<16x512xf32> to vector<512xf32>
    %162 = vector.shape_cast %161 : vector<512xf32> to vector<1x512xf32>
    %163 = arith.mulf %162, %0 : vector<1x512xf32>
    %c0_87 = arith.constant 0 : index
    %c0_88 = arith.constant 0 : index
    %164 = vector.load %arg14[%c0_87, %c0_88] : memref<1x512xf32, #tpu.memory_space<vmem>>, vector<1x512xf32>
    tpu.vector_store %arg14[%c0_87, %c0_88], %163 {strides = array<i32>} : memref<1x512xf32, #tpu.memory_space<vmem>>, vector<1x512xf32>,
    %cst_89 = arith.constant dense<0.000000e+00> : vector<128xf32>
    %165 = vector.multi_reduction <add>, %150, %cst_89 [1] : vector<128x512xf32> to vector<128xf32>
    %166 = vector.shape_cast %165 : vector<128xf32> to vector<128x1xf32>
    %167 = vector.shape_cast %166 : vector<128x1xf32> to vector<1x128x1xf32>
    %c0_90 = arith.constant 0 : index
    %c0_91 = arith.constant 0 : index
    %c0_92 = arith.constant 0 : index
    %168 = vector.load %arg15[%c0_90, %c0_91, %c0_92] : memref<1x128x1xf32, #tpu.memory_space<vmem>>, vector<1x128x1xf32>
    tpu.vector_store %arg15[%c0_90, %c0_91, %c0_92], %167 {strides = array<i32>} : memref<1x128x1xf32, #tpu.memory_space<vmem>>, vector<1x128x1xf32>,
    %169 = arith.mulf %152, %152 : vector<16x512xf32>
    %cst_93 = arith.constant dense<0.000000e+00> : vector<512xf32>
    %170 = vector.multi_reduction <add>, %169, %cst_93 [0] : vector<16x512xf32> to vector<512xf32>
    %171 = vector.shape_cast %170 : vector<512xf32> to vector<1x512xf32>
    %cst_94 = arith.constant 1.000000e-24 : f32
    %172 = vector.broadcast %cst_94 : f32 to vector<1x512xf32>
    %173 = arith.maximumf %171, %172 : vector<1x512xf32>
    %174 = math.rsqrt %173 : vector<1x512xf32>
    %175 = vector.broadcast %174 : vector<1x512xf32> to vector<16x512xf32>
    %176 = arith.mulf %152, %175 : vector<16x512xf32>
    %c0_95 = arith.constant 0 : index
    %c0_96 = arith.constant 0 : index
    %177 = vector.load %arg6[%c0_95, %c0_96] : memref<128x16xf32, #tpu.memory_space<vmem>>, vector<128x16xf32>
    %cst_97 = arith.constant dense<0.000000e+00> : vector<128x512xf32>
    %178 = tpu.matmul %177, %176, %cst_97 {dimension_numbers = #tpu.dot_dimension_numbers<[1], [0], [0], [1], [0, 0, 1, 1], [], []>} : vector<128x16xf32>, vector<16x512xf32>, vector<128x512xf32> -> vector<128x512xf32>
    %179 = tpu.transpose %178, [1, 0] : vector<128x512xf32> -> vector<512x128xf32>
    %c0_98 = arith.constant 0 : index
    %c0_99 = arith.constant 0 : index
    %180 = vector.load %arg12[%c0_98, %c0_99] : memref<512x128xf32, #tpu.memory_space<vmem>>, vector<512x128xf32>
    tpu.vector_store %arg12[%c0_98, %c0_99], %179 {strides = array<i32>} : memref<512x128xf32, #tpu.memory_space<vmem>>, vector<512x128xf32>,
    return
  }
  func.func @transform_0(%arg0: i32) -> (i32, i32) {
    %c0_i32 = arith.constant 0 : i32
    %c0_i32_0 = arith.constant 0 : i32
    return %c0_i32, %arg0 : i32, i32
  }
  func.func @transform_1(%arg0: i32) -> (i32, i32) {
    %c0_i32 = arith.constant 0 : i32
    %c0_i32_0 = arith.constant 0 : i32
    %c0_i32_1 = arith.constant 0 : i32
    return %c0_i32, %c0_i32_0 : i32, i32
  }
  func.func @transform_2(%arg0: i32) -> (i32, i32) {
    %c0_i32 = arith.constant 0 : i32
    %c0_i32_0 = arith.constant 0 : i32
    %c0_i32_1 = arith.constant 0 : i32
    return %c0_i32, %c0_i32_0 : i32, i32
  }
  func.func @transform_3(%arg0: i32) -> (i32, i32) {
    %c0_i32 = arith.constant 0 : i32
    %c0_i32_0 = arith.constant 0 : i32
    %c0_i32_1 = arith.constant 0 : i32
    return %c0_i32, %c0_i32_0 : i32, i32
  }
  func.func @transform_4(%arg0: i32) -> (i32, i32) {
    %c0_i32 = arith.constant 0 : i32
    %c0_i32_0 = arith.constant 0 : i32
    %c0_i32_1 = arith.constant 0 : i32
    return %c0_i32, %c0_i32_0 : i32, i32
  }
  func.func @transform_5(%arg0: i32) -> (i32, i32) {
    %c0_i32 = arith.constant 0 : i32
    %c0_i32_0 = arith.constant 0 : i32
    %c0_i32_1 = arith.constant 0 : i32
    return %c0_i32, %c0_i32_0 : i32, i32
  }
  func.func @transform_6(%arg0: i32) -> (i32, i32) {
    %c0_i32 = arith.constant 0 : i32
    %c0_i32_0 = arith.constant 0 : i32
    %c0_i32_1 = arith.constant 0 : i32
    return %c0_i32, %c0_i32_0 : i32, i32
  }
  func.func @transform_7(%arg0: i32) -> (i32, i32) {
    %c0_i32 = arith.constant 0 : i32
    %c0_i32_0 = arith.constant 0 : i32
    %c0_i32_1 = arith.constant 0 : i32
    return %c0_i32, %c0_i32_0 : i32, i32
  }
  func.func @transform_8(%arg0: i32) -> (i32, i32) {
    %c0_i32 = arith.constant 0 : i32
    %c0_i32_0 = arith.constant 0 : i32
    return %c0_i32, %arg0 : i32, i32
  }
  func.func @transform_9(%arg0: i32) -> (i32, i32) {
    %c0_i32 = arith.constant 0 : i32
    %c0_i32_0 = arith.constant 0 : i32
    return %c0_i32, %arg0 : i32, i32
  }
  func.func @transform_10(%arg0: i32) -> (i32, i32) {
    %c0_i32 = arith.constant 0 : i32
    %c0_i32_0 = arith.constant 0 : i32
    return %c0_i32, %arg0 : i32, i32
  }
  func.func @transform_11(%arg0: i32) -> (i32, i32) {
    %c0_i32 = arith.constant 0 : i32
    %c0_i32_0 = arith.constant 0 : i32
    return %arg0, %c0_i32 : i32, i32
  }
  func.func @transform_12(%arg0: i32) -> (i32, i32) {
    %c0_i32 = arith.constant 0 : i32
    %c0_i32_0 = arith.constant 0 : i32
    return %c0_i32, %arg0 : i32, i32
  }
  func.func @transform_13(%arg0: i32) -> (i32, i32) {
    %c0_i32 = arith.constant 0 : i32
    %c0_i32_0 = arith.constant 0 : i32
    return %c0_i32, %arg0 : i32, i32
  }
  func.func @transform_14(%arg0: i32) -> (i32, i32, i32) {
    %c0_i32 = arith.constant 0 : i32
    %c0_i32_0 = arith.constant 0 : i32
    %c0_i32_1 = arith.constant 0 : i32
    return %arg0, %c0_i32, %c0_i32_0 : i32, i32, i32
  }
}

</mosaic_0001>

<bundles_post_ra>
// kernel: equiformer_encoder_forward.1
= control target key start
LH: loop header
LB: loop body
LE: loop exit
PB: predicated region body
PF: predicated region fallthrough
CT: control target
= control target key end

     0   :  { %v5491_v1 = vmov 0.0   ;;  %v5493_v6 = vlaneseq  ;;  %v5586_v14 = vmov 0  ;;  %vm5559_vm2 = vcmask 130048   ;;  %s5476_s0 = inlined_call_operand.vmem [shape: f32[16,512], index: 0, kind: input, shape index: {}]   ;;  %s5477_s8 = inlined_call_operand.vmem [shape: f32[16,512], index: 8, kind: output, shape index: {0}]   ;;  %s5478_s1 = inlined_call_operand.vmem [shape: f32[32,16], index: 1, kind: input, shape index: {}]   ;;  %s5479_s3 = inlined_call_operand.vmem [shape: f32[16,1], index: 3, kind: input, shape index: {}]   ;;  %s5480_s7 = inlined_call_operand.vmem [shape: f32[128,1], index: 7, kind: input, shape index: {}]   ;;  %s5481_s2 = inlined_call_operand.vmem [shape: f32[16,32], index: 2, kind: input, shape index: {}]   ;;  %s5482_s9 = inlined_call_operand.vmem [shape: f32[16,512], index: 9, kind: output, shape index: {1}]   ;;  %s5483_s6 = inlined_call_operand.vmem [shape: f32[128,16], index: 6, kind: input, shape index: {}]   ;;  %s5484_s4 = inlined_call_operand.vmem [shape: f32[16,128], index: 4, kind: input, shape index: {}]   ;;  %s5485_s12 = inlined_call_operand.vmem [shape: s32[1,512], index: 12, kind: output, shape index: {4}]   ;;  %s5486_s14 = inlined_call_operand.vmem [shape: f32[1,128,1], index: 14, kind: output, shape index: {6}]   ;;  %s5487_s10 = inlined_call_operand.vmem [shape: f32[16,512], index: 10, kind: output, shape index: {2}]   ;;  %s5488_s5 = inlined_call_operand.vmem [shape: f32[128,16], index: 5, kind: input, shape index: {}]   ;;  %s5489_s13 = inlined_call_operand.vmem [shape: f32[1,512], index: 13, kind: output, shape index: {5}]   ;;  %s5490_s11 = inlined_call_operand.vmem [shape: f32[512,128], index: 11, kind: output, shape index: {3}]  }
   0x1   :  { %v38_v0 = vld [vmem:[%s5476_s0] ss:$8 sm:$0xf]  ;;  %154 = vst [vmem:[%s5477_s8 + $0x28] sm:$0xf0] %v5491_v1  ;;  %246 = vmatprep.mubr.f32.mxu0 %v5491_v1  ;;  %335 = vmatprep.mubr.f32.mxu1 %v5491_v1  ;;  %vm450_vm3 = vcmask 261120  }
   0x2   :  { %153 = vst [vmem:[%s5477_s8 + $0x20] sm:$0xf0] %v5491_v1  ;;  %155 = vst [vmem:[%s5477_s8 + $0x30] sm:$0xf0] %v5491_v1  ;;  %vm3103_vm0 = vcmp.lt.s32.totalorder %v5493_v6, 512 }
   0x3   :  { %156 = vst [vmem:[%s5477_s8 + $0x38] sm:$0xf0] %v5491_v1  ;;  %v2659_v2 = vld [vmem:[%s5476_s0 + $0x1] ss:$8 sm:$0xf]  ;;  %v5587_v14 = vsel %vm3103_vm0, 4294967295, %v5586_v14 }
   0x4   :  { %v2660_v3 = vld [vmem:[%s5476_s0 + $0x2] ss:$8 sm:$0xf]  ;;  %v2661_v4 = vld [vmem:[%s5476_s0 + $0x3] ss:$8 sm:$0xf] }
   0x5   :  { %v2662_v5 = vld [vmem:[%s5476_s0 + $0x4] ss:$8 sm:$0xf]  ;;  %v2663_v7 = vld [vmem:[%s5476_s0 + $0x5] ss:$8 sm:$0xf]  ;;  %v55_v8 = vsub.f32 %v2661_v4, %v38_v0 }
   0x6   :  { %v56_v9 = vsub.f32 %v2662_v5, %v2659_v2  ;;  %v57_v10 = vsub.f32 %v2663_v7, %v2660_v3  ;;  %5588 = vst [vmem:[#allocation2_spill] sm:$0xff] %v5587_v14  ;;  %v141_v15 = vmul.f32 0.1, %v38_v0  ;;  %v145_v17 = vmul.f32 0.1, %v2659_v2 }
   0x7   :  { %v61_v11 = vmul.f32 %v55_v8, %v55_v8  ;;  %v149_v18 = vmul.f32 0.1, %v2660_v3  ;;  %v2664_v21 = vld [vmem:[%s5476_s0 + $0x6] ss:$8 sm:$0xf] }
   0x8   :  { %v62_v12 = vmul.f32 %v56_v9, %v56_v9  ;;  %v64_v13 = vmul.f32 %v57_v10, %v57_v10  ;;  %2675 = vst.msk [vmem:[%s5477_s8 + $0x21] ss:$8 sm:$0xf] %vm3103_vm0, %v141_v15  ;;  %2676 = vst.msk [vmem:[%s5477_s8 + $0x22] ss:$8 sm:$0xf] %vm3103_vm0, %v145_v17  ;;  %v58_v25 = vsub.f32 %v2664_v21, %v2661_v4 }
   0x9   :  { %2677 = vst.msk [vmem:[%s5477_s8 + $0x23] ss:$8 sm:$0xf] %vm3103_vm0, %v149_v18  ;;  %v2665_v22 = vld [vmem:[%s5476_s0 + $0x7] ss:$8 sm:$0xf] }
   0xa   :  { %v63_v16 = vadd.f32 %v62_v12, %v61_v11  ;;  %v2666_v23 = vld [vmem:[%s5476_s0 + $0x20] ss:$8 sm:$0xf]  ;;  %v3134_v24 = vld [vmem:[%s5476_s0 + $0x21] ss:$8 sm:$0xf]  ;;  %v59_v26 = vsub.f32 %v2665_v22, %v2662_v5 }
   0xb   :  { %5589 = vst [vmem:[#allocation3_spill] sm:$0xff] %v3134_v24  ;;  %v60_v27 = vsub.f32 %v2666_v23, %v2663_v7  ;;  %vm5560_vm1 = vcmp.gt.f32.partialorder %v3134_v24, 0.0  ;;  %v165_v22 = vld [vmem:[%s5478_s1] sm:$0xff]  ;;  %v166_v23 = vld [vmem:[%s5478_s1 + $0x8] sm:$0xff] }
   0xc   :  { %v65_v19 = vadd.f32 %v64_v13, %v63_v16 }
   0xe   :  { %v66_v20 = vadd.f32 1e-08, %v65_v19 }
  0x10   :  { %2959 = vrsqrt.f32 %v66_v20 }
  0x1a   :  { %v2960_v28 = vpop.eup %2959 }
  0x1b   :  { %v68_v29 = vmul.f32 %v2960_v28, %v55_v8  ;;  %v69_v30 = vmul.f32 %v2960_v28, %v56_v9  ;;  %v70_v31 = vmul.f32 %v2960_v28, %v57_v10  ;;  %v438_v28 = vld [vmem:[%s5479_s3] sm:$0xff] }
  0x1d   :  { %v71_v32 = vmul.f32 %v68_v29, %v58_v25  ;;  %v72_v33 = vmul.f32 %v69_v30, %v59_v26  ;;  %v74_v34 = vmul.f32 %v70_v31, %v60_v27  ;;  %v102_v35 = vsel %vm5560_vm1, %v68_v29, 1.0 }
  0x1e   :  { %107 = vst.msk [vmem:[%s5477_s8] ss:$8 sm:$0xf] %vm3103_vm0, %v102_v35  ;;  %v109_v36 = vsel %vm5560_vm1, %v69_v30, 0.0  ;;  %v113_v37 = vsel %vm5560_vm1, %v70_v31, 0.0  ;;  %v647_v35 = vld [vmem:[%s5480_s7 + $0x60] sm:$0xff] }
  0x1f   :  { %v73_v38 = vadd.f32 %v72_v33, %v71_v32  ;;  %2667 = vst.msk [vmem:[%s5477_s8 + $0x1] ss:$8 sm:$0xf] %vm3103_vm0, %v109_v36  ;;  %2668 = vst.msk [vmem:[%s5477_s8 + $0x2] ss:$8 sm:$0xf] %vm3103_vm0, %v113_v37 }
  0x20   :  { %v641_v32 = vld [vmem:[%s5480_s7 + $0x30] sm:$0xff]  ;;  %v643_v33 = vld [vmem:[%s5480_s7 + $0x40] sm:$0xff] }
  0x21   :  { %v75_v39 = vadd.f32 %v74_v34, %v73_v38  ;;  %v645_v34 = vld [vmem:[%s5480_s7 + $0x50] sm:$0xff] }
  0x22   :  { %v649_v36 = vld [vmem:[%s5480_s7 + $0x70] sm:$0xff] }
  0x23   :  { %v76_v40 = vmul.f32 %v75_v39, %v68_v29  ;;  %v78_v41 = vmul.f32 %v75_v39, %v69_v30  ;;  %v80_v42 = vmul.f32 %v75_v39, %v70_v31 }
  0x25   :  { %v77_v43 = vsub.f32 %v58_v25, %v76_v40  ;;  %v79_v44 = vsub.f32 %v59_v26, %v78_v41  ;;  %v81_v45 = vsub.f32 %v60_v27, %v80_v42  ;;  %v167_v25 = vld [vmem:[%s5478_s1 + $0x10] sm:$0xff]  ;;  %v168_v26 = vld [vmem:[%s5478_s1 + $0x18] sm:$0xff]  ;;  %v2989_v27 = vmov 0  }
  0x26   :  { %2957 = vset.pattern.permute.xlu0 %v2989_v27  ;;  %2958 = vset.pattern.permute.xlu1 %v2989_v27 }
  0x27   :  { %v82_v46 = vmul.f32 %v77_v43, %v77_v43  ;;  %v83_v47 = vmul.f32 %v79_v44, %v79_v44  ;;  %v85_v48 = vmul.f32 %v81_v45, %v81_v45  ;;  %442 = vperm.xlu0 %2957, %v438_v28  }
  0x29   :  { %v84_v49 = vadd.f32 %v83_v47, %v82_v46 }
  0x2b   :  { %v86_v50 = vadd.f32 %v85_v48, %v84_v49 }
  0x2d   :  { %v87_v51 = vadd.f32 1e-08, %v86_v50 }
  0x2f   :  { %2961 = vrsqrt.f32 %v87_v51 }
  0x39   :  { %v2962_v52 = vpop.eup %2961 }
  0x3a   :  { %v89_v53 = vmul.f32 %v2962_v52, %v77_v43  ;;  %v90_v54 = vmul.f32 %v2962_v52, %v79_v44  ;;  %v91_v55 = vmul.f32 %v2962_v52, %v81_v45 }
  0x3c   :  { %v92_v56 = vmul.f32 %v91_v55, %v69_v30  ;;  %v93_v57 = vmul.f32 %v90_v54, %v70_v31  ;;  %v95_v58 = vmul.f32 %v89_v53, %v70_v31  ;;  %v96_v59 = vmul.f32 %v91_v55, %v68_v29  ;;  %v639_v31 = vld [vmem:[%s5480_s7 + $0x20] sm:$0xff] }
  0x3d   :  { %v98_v60 = vmul.f32 %v90_v54, %v68_v29  ;;  %v99_v61 = vmul.f32 %v89_v53, %v69_v30  ;;  %v117_v62 = vsel %vm5560_vm1, %v89_v53, 0.0  ;;  %v121_v63 = vsel %vm5560_vm1, %v90_v54, 1.0  ;;  %v439_v29 = vld [vmem:[%s5479_s3 + $0x8] sm:$0xff]  ;;  %v637_v30 = vld [vmem:[%s5480_s7 + $0x10] sm:$0xff] }
  0x3e   :  { %v94_v0 = vsub.f32 %v92_v56, %v93_v57  ;;  %v97_v2 = vsub.f32 %v95_v58, %v96_v59  ;;  %2669 = vst.msk [vmem:[%s5477_s8 + $0x3] ss:$8 sm:$0xf] %vm3103_vm0, %v117_v62  ;;  %2670 = vst.msk [vmem:[%s5477_s8 + $0x4] ss:$8 sm:$0xf] %vm3103_vm0, %v121_v63  ;;  %447 = vperm.xlu0 %2957, %v439_v29  }
  0x3f   :  { %v125_v3 = vsel %vm5560_vm1, %v91_v55, 0.0  ;;  %v100_v4 = vsub.f32 %v98_v60, %v99_v61 }
  0x40   :  { %2671 = vst.msk [vmem:[%s5477_s8 + $0x5] ss:$8 sm:$0xf] %vm3103_vm0, %v125_v3  ;;  %v129_v5 = vsel %vm5560_vm1, %v94_v0, 0.0  ;;  %v133_v7 = vsel %vm5560_vm1, %v97_v2, 0.0 }
  0x41   :  { %2672 = vst.msk [vmem:[%s5477_s8 + $0x6] ss:$8 sm:$0xf] %vm3103_vm0, %v129_v5  ;;  %2673 = vst.msk [vmem:[%s5477_s8 + $0x7] ss:$8 sm:$0xf] %vm3103_vm0, %v133_v7 }
  0x42   :  { %v137_v8 = vsel %vm5560_vm1, %v100_v4, 1.0  ;;  %663 = vperm.xlu0 %2957, %v637_v30  }
  0x43   :  { %2674 = vst.msk [vmem:[%s5477_s8 + $0x20] ss:$8 sm:$0xf] %vm3103_vm0, %v137_v8 }
  0x46   :  { %673 = vperm.xlu0 %2957, %v639_v31  }
  0x48   :  { %v158_v9 = vld [vmem:[%s5477_s8 + $0x8] sm:$0xff]  ;;  %v160_v10 = vld [vmem:[%s5477_s8 + $0x18] sm:$0xff]  ;;  %v157_v11 = vld [vmem:[%s5477_s8] sm:$0xff] }
  0x49   :  { %v159_v19 = vld [vmem:[%s5477_s8 + $0x10] sm:$0xff] }
  0x4a   :  { %v162_v12 = vld [vmem:[%s5477_s8 + $0x28] sm:$0xff]  ;;  %v164_v13 = vld [vmem:[%s5477_s8 + $0x38] sm:$0xff]  ;;  %v161_v15 = vld [vmem:[%s5477_s8 + $0x20] sm:$0xff]  ;;  %683 = vperm.xlu0 %2957, %v641_v32  }
  0x4b   :  { %v2818_v16 = vpack.c.bf16 %v162_v12, %v158_v9  ;;  %v2822_v17 = vpack.c.bf16 %v164_v13, %v160_v10  ;;  %v2820_v18 = vpack.c.bf16 %v161_v15, %v157_v11  ;;  %v163_v20 = vld [vmem:[%s5477_s8 + $0x30] sm:$0xff] }
  0x4c   :  { %v2824_v21 = vpack.c.bf16 %v163_v20, %v159_v19 }
  0x4d   :  { %2819 = vmatprep.subr.bf16.mxu0 %v2818_v16  ;;  %2823 = vmatprep.subr.bf16.mxu1 %v2822_v17 }
  0x4e   :  { %2821 = vmatpush1.bf16.msra.mxu0 %v2820_v18  ;;  %2825 = vmatpush1.bf16.msra.mxu1 %v2824_v21 }
  0x4f   :  { %693 = vperm.xlu0 %2957, %v643_v33  }
  0x51   :  { %2678 = vmatmul.mubr.msk.f32.vlgmr.msra.gmra.mrb[0].mxu0 %vm5559_vm2, %v165_v22  ;;  %2682 = vmatmul.mubr.msk.f32.vlgmr.msra.gmra.mrb[0].mxu1 %vm5559_vm2, %v165_v22 }
  0x52   :  { %252 = vmatprep.mubr.f32.mxu0 %v5491_v1  ;;  %341 = vmatprep.mubr.f32.mxu1 %v5491_v1 }
  0x53   :  { %703 = vperm.xlu0 %2957, %v645_v34  }
  0x55   :  { %2679 = vmatmul.mubr.msk.f32.gmra.mrb[2].mxu0 %vm5559_vm2, %v166_v23  ;;  %2683 = vmatmul.mubr.msk.f32.gmra.mrb[2].mxu1 %vm5559_vm2, %v166_v23 }
  0x56   :  { %258 = vmatprep.mubr.f32.mxu0 %v5491_v1  ;;  %347 = vmatprep.mubr.f32.mxu1 %v5491_v1 }
  0x57   :  { %713 = vperm.xlu0 %2957, %v647_v35  }
  0x59   :  { %2680 = vmatmul.mubr.msk.f32.gmra.mrb[4].mxu0 %vm5559_vm2, %v167_v25  ;;  %2684 = vmatmul.mubr.msk.f32.gmra.mrb[4].mxu1 %vm5559_vm2, %v167_v25 }
  0x5a   :  { %264 = vmatprep.mubr.f32.mxu0 %v5491_v1  ;;  %353 = vmatprep.mubr.f32.mxu1 %v5491_v1 }
  0x5b   :  { %723 = vperm.xlu0 %2957, %v649_v36  }
  0x5d   :  { %2681 = vmatmul.mubr.msk.f32.gmra.mrb[6].mxu0 %vm5559_vm2, %v168_v26  ;;  %2685 = vmatmul.mubr.msk.f32.gmra.mrb[6].mxu1 %vm5559_vm2, %v168_v26 }
  0x5e   :  { %521 = vmatprep.mubr.f32.mxu0 %v5491_v1  ;;  %598 = vmatprep.mubr.f32.mxu1 %v5491_v1 }
 0x124   :  { %v3279_v37 = vpop.f32.mrb[0].mxu0  ;;  %v3281_v38 = vpop.f32.mrb[0].mxu1 }
 0x125   :  { %v3283_v39 = vpop.f32.mrb[1].mxu0  ;;  %v3285_v40 = vpop.f32.mrb[1].mxu1  ;;  %v362_v41 = vmul.f32 %v3281_v38, %v3281_v38  ;;  %v360_v45 = vmul.f32 %v3279_v37, %v3279_v37 }
 0x126   :  { %v363_v43 = vmul.f32 %v3285_v40, %v3285_v40  ;;  %v361_v50 = vmul.f32 %v3283_v39, %v3283_v39 }
 0x128   :  { %v3289_v42 = vpop.f32.mrb[2].mxu0  ;;  %v3293_v44 = vpop.f32.mrb[2].mxu1 }
 0x129   :  { %v364_v46 = vmul.f32 %v3289_v42, %v3289_v42  ;;  %v3299_v47 = vpop.f32.mrb[3].mxu0  ;;  %v366_v48 = vmul.f32 %v3293_v44, %v3293_v44  ;;  %v3303_v49 = vpop.f32.mrb[3].mxu1 }
 0x12a   :  { %v365_v51 = vmul.f32 %v3299_v47, %v3299_v47  ;;  %v367_v52 = vmul.f32 %v3303_v49, %v3303_v49 }
 0x12b   :  { %v376_v53 = vadd.f32 %v364_v46, %v360_v45  ;;  %v394_v54 = vadd.f32 %v366_v48, %v362_v41 }
 0x12c   :  { %v385_v55 = vadd.f32 %v365_v51, %v361_v50  ;;  %v260_v56 = vpop.f32.mrb[4].mxu0  ;;  %v403_v57 = vadd.f32 %v367_v52, %v363_v43  ;;  %v349_v58 = vpop.f32.mrb[4].mxu1 }
 0x12d   :  { %v368_v59 = vmul.f32 %v260_v56, %v260_v56  ;;  %v3311_v60 = vpop.f32.mrb[5].mxu0  ;;  %v370_v61 = vmul.f32 %v349_v58, %v349_v58  ;;  %v3313_v62 = vpop.f32.mrb[5].mxu1 }
 0x12e   :  { %v369_v63 = vmul.f32 %v3311_v60, %v3311_v60  ;;  %v371_v0 = vmul.f32 %v3313_v62, %v3313_v62 }
 0x12f   :  { %v377_v2 = vadd.f32 %v376_v53, %v368_v59  ;;  %v395_v3 = vadd.f32 %v394_v54, %v370_v61 }
 0x130   :  { %v386_v4 = vadd.f32 %v385_v55, %v369_v63  ;;  %v404_v5 = vadd.f32 %v403_v57, %v371_v0  ;;  %v266_v7 = vpop.f32.mrb[6].mxu0  ;;  %v355_v8 = vpop.f32.mrb[6].mxu1 }
 0x131   :  { %v372_v9 = vmul.f32 %v266_v7, %v266_v7  ;;  %v374_v10 = vmul.f32 %v355_v8, %v355_v8  ;;  %v268_v11 = vpop.f32.mrb[7].mxu0  ;;  %v357_v12 = vpop.f32.mrb[7].mxu1 }
 0x132   :  { %v373_v13 = vmul.f32 %v268_v11, %v268_v11  ;;  %v375_v15 = vmul.f32 %v357_v12, %v357_v12 }
 0x133   :  { %v378_v16 = vadd.f32 %v377_v2, %v372_v9  ;;  %v396_v17 = vadd.f32 %v395_v3, %v374_v10 }
 0x134   :  { %v387_v18 = vadd.f32 %v386_v4, %v373_v13  ;;  %v405_v19 = vadd.f32 %v404_v5, %v375_v15 }
 0x135   :  { %v379_v20 = vrot.slane %v378_v16, 4  ;;  %v397_v21 = vrot.slane %v396_v17, 4 }
 0x136   :  { %v388_v22 = vrot.slane %v387_v18, 4  ;;  %v406_v23 = vrot.slane %v405_v19, 4 }
 0x137   :  { %v380_v25 = vadd.f32 %v379_v20, %v378_v16  ;;  %v398_v26 = vadd.f32 %v397_v21, %v396_v17 }
 0x138   :  { %v389_v27 = vadd.f32 %v388_v22, %v387_v18  ;;  %v407_v28 = vadd.f32 %v406_v23, %v405_v19 }
 0x139   :  { %v381_v29 = vrot.slane %v380_v25, 2  ;;  %v399_v30 = vrot.slane %v398_v26, 2 }
 0x13a   :  { %v390_v31 = vrot.slane %v389_v27, 2  ;;  %v408_v32 = vrot.slane %v407_v28, 2 }
 0x13b   :  { %v382_v33 = vadd.f32 %v381_v29, %v380_v25  ;;  %v400_v34 = vadd.f32 %v399_v30, %v398_v26  ;;  %v646_v25 = vld [vmem:[%s5480_s7 + $0x58] sm:$0xff]  ;;  %v648_v26 = vld [vmem:[%s5480_s7 + $0x68] sm:$0xff] }
 0x13c   :  { %v391_v35 = vadd.f32 %v390_v31, %v389_v27  ;;  %v409_v36 = vadd.f32 %v408_v32, %v407_v28  ;;  %v650_v27 = vld [vmem:[%s5480_s7 + $0x78] sm:$0xff]  ;;  %v443_v28 = vpop.permute.xlu0 %442 }
 0x13d   :  { %v383_v41 = vrot.slane %v382_v33, 1  ;;  %v401_v43 = vrot.slane %v400_v34, 1 }
 0x13e   :  { %v392_v45 = vrot.slane %v391_v35, 1  ;;  %v410_v46 = vrot.slane %v409_v36, 1 }
 0x13f   :  { %v384_v48 = vadd.f32 %v383_v41, %v382_v33  ;;  %v402_v50 = vadd.f32 %v401_v43, %v400_v34 }
 0x140   :  { %v393_v51 = vadd.f32 %v392_v45, %v391_v35  ;;  %v411_v52 = vadd.f32 %v410_v46, %v409_v36  ;;  %v448_v41 = vpop.permute.xlu0 %447 }
 0x141   :  { %v412_v53 = vmax.f32 %v384_v48, 1e-24  ;;  %v414_v54 = vmax.f32 %v402_v50, 1e-24 }
 0x142   :  { %v413_v55 = vmax.f32 %v393_v51, 1e-24  ;;  %v415_v57 = vmax.f32 %v411_v52, 1e-24 }
 0x143   :  { %2963 = vrsqrt.f32 %v412_v53 }
 0x144   :  { %2965 = vrsqrt.f32 %v414_v54 }
 0x145   :  { %2967 = vrsqrt.f32 %v413_v55 }
 0x146   :  { %2969 = vrsqrt.f32 %v415_v57 }
 0x14d   :  { %v2964_v59 = vpop.eup %2963 }
 0x14e   :  { %v2966_v61 = vpop.eup %2965  ;;  %v428_v63 = vmul.f32 %v2964_v59, %v260_v56  ;;  %v432_v0 = vmul.f32 %v2964_v59, %v266_v7  ;;  %v420_v2 = vmul.f32 %v2964_v59, %v3279_v37  ;;  %v424_v3 = vmul.f32 %v2964_v59, %v3289_v42 }
 0x14f   :  { %v2968_v4 = vpop.eup %2967  ;;  %v430_v5 = vmul.f32 %v2966_v61, %v349_v58  ;;  %v434_v9 = vmul.f32 %v2966_v61, %v355_v8  ;;  %v422_v10 = vmul.f32 %v2966_v61, %v3281_v38  ;;  %v426_v13 = vmul.f32 %v2966_v61, %v3293_v44  ;;  %v619_v61 = vld [vmem:[%s5483_s6] sm:$0xff] }
 0x150   :  { %v2970_v15 = vpop.eup %2969  ;;  %v2832_v16 = vpack.c.bf16 %v432_v0, %v428_v63  ;;  %v429_v17 = vmul.f32 %v2968_v4, %v3311_v60  ;;  %v433_v18 = vmul.f32 %v2968_v4, %v268_v11  ;;  %v421_v19 = vmul.f32 %v2968_v4, %v3283_v39  ;;  %v436_v39 = vld [vmem:[%s5481_s2] sm:$0xff]  ;;  %v638_v60 = vld [vmem:[%s5480_s7 + $0x18] sm:$0xff]  ;;  %v620_v63 = vld [vmem:[%s5483_s6 + $0x8] sm:$0xff] }
 0x151   :  { %v2840_v56 = vpack.c.bf16 %v434_v9, %v430_v5  ;;  %v431_v7 = vmul.f32 %v2970_v15, %v3313_v62  ;;  %v435_v37 = vmul.f32 %v2970_v15, %v357_v12  ;;  %v425_v42 = vmul.f32 %v2968_v4, %v3299_v47  ;;  %v635_v47 = vld [vmem:[%s5480_s7] sm:$0xff]  ;;  %v640_v62 = vld [vmem:[%s5480_s7 + $0x28] sm:$0xff]  ;;  %v642_v11 = vld [vmem:[%s5480_s7 + $0x38] sm:$0xff] }
 0x152   :  { %v2830_v20 = vpack.c.bf16 %v433_v18, %v429_v17  ;;  %v423_v58 = vmul.f32 %v2970_v15, %v3285_v40  ;;  %v427_v38 = vmul.f32 %v2970_v15, %v3303_v49  ;;  %v2828_v8 = vpack.c.bf16 %v424_v3, %v420_v2  ;;  %v437_v40 = vld [vmem:[%s5481_s2 + $0x8] sm:$0xff]  ;;  %653 = vperm.xlu1 %2958, %v635_v47   ;;  %v621_v0 = vld [vmem:[%s5483_s6 + $0x10] sm:$0xff]  ;;  %v622_v2 = vld [vmem:[%s5483_s6 + $0x18] sm:$0xff] }
 0x153   :  { %v2838_v44 = vpack.c.bf16 %v435_v37, %v431_v7  ;;  %v2826_v21 = vpack.c.bf16 %v425_v42, %v421_v19  ;;  %v2836_v22 = vpack.c.bf16 %v426_v13, %v422_v10  ;;  %v636_v49 = vld [vmem:[%s5480_s7 + $0x8] sm:$0xff]  ;;  %v623_v3 = vld [vmem:[%s5483_s6 + $0x20] sm:$0xff]  ;;  %v625_v5 = vld [vmem:[%s5483_s6 + $0x30] sm:$0xff] }
 0x154   :  { %v2834_v23 = vpack.c.bf16 %v427_v38, %v423_v58  ;;  %v644_v12 = vld [vmem:[%s5480_s7 + $0x48] sm:$0xff]  ;;  %v626_v9 = vld [vmem:[%s5483_s6 + $0x38] sm:$0xff]  ;;  %v627_v10 = vld [vmem:[%s5483_s6 + $0x40] sm:$0xff] }
 0x155   :  { %2827 = vmatprep.subr.bf16.mxu0 %v2826_v21  ;;  %v624_v4 = vld [vmem:[%s5483_s6 + $0x28] sm:$0xff]  ;;  %v629_v15 = vld [vmem:[%s5483_s6 + $0x50] sm:$0xff]  ;;  %v631_v17 = vld [vmem:[%s5483_s6 + $0x60] sm:$0xff] }
 0x156   :  { %2835 = vmatprep.subr.bf16.mxu1 %v2834_v23  ;;  %2829 = vmatpush1.bf16.msra.mxu0 %v2828_v8  ;;  %v628_v13 = vld [vmem:[%s5483_s6 + $0x48] sm:$0xff]  ;;  %v633_v19 = vld [vmem:[%s5483_s6 + $0x70] sm:$0xff] }
 0x157   :  { %2837 = vmatpush1.bf16.msra.mxu1 %v2836_v22  ;;  %2831 = vmatprep.subr.bf16.mxu0 %v2830_v20  ;;  %v632_v18 = vld [vmem:[%s5483_s6 + $0x68] sm:$0xff] }
 0x158   :  { %2839 = vmatprep.subr.bf16.mxu1 %v2838_v44  ;;  %658 = vperm.xlu1 %2958, %v636_v49  }
 0x15a   :  { %2833 = vmatpush1.bf16.msra.mxu0 %v2832_v16  ;;  %v630_v16 = vld [vmem:[%s5483_s6 + $0x58] sm:$0xff] }
 0x15b   :  { %2841 = vmatpush1.bf16.msra.mxu1 %v2840_v56  ;;  %v634_v56 = vld [vmem:[%s5483_s6 + $0x78] sm:$0xff] }
 0x15c   :  { %668 = vperm.xlu1 %2958, %v638_v60  }
 0x15d   :  { %2686 = vmatmul.mubr.msk.f32.vlgmr.msra.gmra.mrb[8].mxu0 %vm450_vm3, %v436_v39 }
 0x15e   :  { %2688 = vmatmul.mubr.msk.f32.vlgmr.msra.gmra.mrb[8].mxu1 %vm450_vm3, %v436_v39  ;;  %527 = vmatprep.mubr.f32.mxu0 %v5491_v1 }
 0x15f   :  { %604 = vmatprep.mubr.f32.mxu1 %v5491_v1 }
 0x160   :  { %678 = vperm.xlu1 %2958, %v640_v62  }
 0x161   :  { %2687 = vmatmul.mubr.msk.f32.gmra.mrb[10].mxu0 %vm450_vm3, %v437_v40 }
 0x162   :  { %2689 = vmatmul.mubr.msk.f32.gmra.mrb[10].mxu1 %vm450_vm3, %v437_v40  ;;  %843 = vmatprep.mubr.f32.mxu0 %v5491_v1 }
 0x163   :  { %1004 = vmatprep.mubr.f32.mxu1 %v5491_v1 }
 0x164   :  { %688 = vperm.xlu1 %2958, %v642_v11  }
 0x168   :  { %698 = vperm.xlu1 %2958, %v644_v12  }
 0x16c   :  { %708 = vperm.xlu1 %2958, %v646_v25   ;;  %v664_v25 = vpop.permute.xlu0 %663 }
 0x170   :  { %718 = vperm.xlu1 %2958, %v648_v26  }
 0x174   :  { %728 = vperm.xlu1 %2958, %v650_v27  }
 0x1d1   :  { %v654_v7 = vpop.permute.xlu1 %653 }
 0x1d7   :  { %v659_v38 = vpop.permute.xlu1 %658 }
 0x230   :  { %v523_v29 = vpop.f32.mrb[8].mxu0 }
 0x231   :  { %v524_v30 = vadd.f32 %v523_v29, %v443_v28  ;;  %v600_v31 = vpop.f32.mrb[8].mxu1  ;;  %v525_v32 = vpop.f32.mrb[9].mxu0 }
 0x232   :  { %v601_v33 = vadd.f32 %v600_v31, %v443_v28  ;;  %v526_v34 = vadd.f32 %v525_v32, %v443_v28  ;;  %v602_v35 = vpop.f32.mrb[9].mxu1 }
 0x233   :  { %611 = vst [vmem:[%s5482_s9] sm:$0xff] %v524_v30  ;;  %v603_v36 = vadd.f32 %v602_v35, %v443_v28 }
 0x234   :  { %613 = vst [vmem:[%s5482_s9 + $0x10] sm:$0xff] %v601_v33  ;;  %612 = vst [vmem:[%s5482_s9 + $0x8] sm:$0xff] %v526_v34  ;;  %v529_v43 = vpop.f32.mrb[10].mxu0 }
 0x235   :  { %614 = vst [vmem:[%s5482_s9 + $0x18] sm:$0xff] %v603_v36  ;;  %v530_v45 = vadd.f32 %v529_v43, %v448_v41  ;;  %v606_v46 = vpop.f32.mrb[10].mxu1  ;;  %v531_v48 = vpop.f32.mrb[11].mxu0 }
 0x236   :  { %v607_v50 = vadd.f32 %v606_v46, %v448_v41  ;;  %v532_v51 = vadd.f32 %v531_v48, %v448_v41  ;;  %v608_v52 = vpop.f32.mrb[11].mxu1  ;;  %v669_v43 = vpop.permute.xlu1 %668 }
 0x237   :  { %615 = vst [vmem:[%s5482_s9 + $0x20] sm:$0xff] %v530_v45  ;;  %v609_v53 = vadd.f32 %v608_v52, %v448_v41  ;;  %v2844_v55 = vpack.c.bf16 %v530_v45, %v524_v30 }
 0x238   :  { %617 = vst [vmem:[%s5482_s9 + $0x30] sm:$0xff] %v607_v50  ;;  %616 = vst [vmem:[%s5482_s9 + $0x28] sm:$0xff] %v532_v51  ;;  %v2842_v54 = vpack.c.bf16 %v532_v51, %v526_v34  ;;  %v2848_v59 = vpack.c.bf16 %v607_v50, %v601_v33 }
 0x239   :  { %618 = vst [vmem:[%s5482_s9 + $0x38] sm:$0xff] %v609_v53  ;;  %v2846_v57 = vpack.c.bf16 %v609_v53, %v603_v36 }
 0x23a   :  { %2843 = vmatprep.subr.bf16.mxu0 %v2842_v54 }
 0x23b   :  { %2847 = vmatprep.subr.bf16.mxu1 %v2846_v57  ;;  %2845 = vmatpush1.bf16.msra.mxu0 %v2844_v55 }
 0x23c   :  { %2849 = vmatpush1.bf16.msra.mxu1 %v2848_v59 }
 0x23e   :  { %2690 = vmatmul.mubr.msk.f32.vlgmr.msra.gmra.mrb[12].mxu0 %vm5559_vm2, %v619_v61 }
 0x23f   :  { %2706 = vmatmul.mubr.msk.f32.vlgmr.msra.gmra.mrb[12].mxu1 %vm5559_vm2, %v619_v61  ;;  %849 = vmatprep.mubr.f32.mxu0 %v5491_v1 }
 0x240   :  { %1010 = vmatprep.mubr.f32.mxu1 %v5491_v1 }
 0x242   :  { %2691 = vmatmul.mubr.msk.f32.gmra.mrb[14].mxu0 %vm5559_vm2, %v620_v63 }
 0x243   :  { %2707 = vmatmul.mubr.msk.f32.gmra.mrb[14].mxu1 %vm5559_vm2, %v620_v63  ;;  %855 = vmatprep.mubr.f32.mxu0 %v5491_v1  ;;  %v674_v63 = vpop.permute.xlu0 %673 }
 0x244   :  { %1016 = vmatprep.mubr.f32.mxu1 %v5491_v1 }
 0x246   :  { %2692 = vmatmul.mubr.msk.f32.gmra.mrb[16].mxu0 %vm5559_vm2, %v621_v0 }
 0x247   :  { %2708 = vmatmul.mubr.msk.f32.gmra.mrb[16].mxu1 %vm5559_vm2, %v621_v0  ;;  %861 = vmatprep.mubr.f32.mxu0 %v5491_v1 }
 0x248   :  { %1022 = vmatprep.mubr.f32.mxu1 %v5491_v1 }
 0x24a   :  { %2693 = vmatmul.mubr.msk.f32.gmra.mrb[18].mxu0 %vm5559_vm2, %v622_v2 }
 0x24b   :  { %2709 = vmatmul.mubr.msk.f32.gmra.mrb[18].mxu1 %vm5559_vm2, %v622_v2  ;;  %867 = vmatprep.mubr.f32.mxu0 %v5491_v1 }
 0x24c   :  { %1028 = vmatprep.mubr.f32.mxu1 %v5491_v1 }
 0x24e   :  { %2694 = vmatmul.mubr.msk.f32.gmra.mrb[20].mxu0 %vm5559_vm2, %v623_v3 }
 0x24f   :  { %2710 = vmatmul.mubr.msk.f32.gmra.mrb[20].mxu1 %vm5559_vm2, %v623_v3  ;;  %873 = vmatprep.mubr.f32.mxu0 %v5491_v1 }
 0x250   :  { %1034 = vmatprep.mubr.f32.mxu1 %v5491_v1 }
 0x252   :  { %2695 = vmatmul.mubr.msk.f32.gmra.mrb[22].mxu0 %vm5559_vm2, %v624_v4 }
 0x253   :  { %2711 = vmatmul.mubr.msk.f32.gmra.mrb[22].mxu1 %vm5559_vm2, %v624_v4  ;;  %879 = vmatprep.mubr.f32.mxu0 %v5491_v1 }
 0x254   :  { %1040 = vmatprep.mubr.f32.mxu1 %v5491_v1 }
 0x256   :  { %2696 = vmatmul.mubr.msk.f32.gmra.mrb[24].mxu0 %vm5559_vm2, %v625_v5 }
 0x257   :  { %2712 = vmatmul.mubr.msk.f32.gmra.mrb[24].mxu1 %vm5559_vm2, %v625_v5  ;;  %885 = vmatprep.mubr.f32.mxu0 %v5491_v1 }
 0x258   :  { %1046 = vmatprep.mubr.f32.mxu1 %v5491_v1 }
 0x25a   :  { %2697 = vmatmul.mubr.msk.f32.gmra.mrb[26].mxu0 %vm5559_vm2, %v626_v9 }
 0x25b   :  { %2713 = vmatmul.mubr.msk.f32.gmra.mrb[26].mxu1 %vm5559_vm2, %v626_v9  ;;  %891 = vmatprep.mubr.f32.mxu0 %v5491_v1 }
 0x25c   :  { %1052 = vmatprep.mubr.f32.mxu1 %v5491_v1 }
 0x25e   :  { %2698 = vmatmul.mubr.msk.f32.gmra.mrb[28].mxu0 %vm5559_vm2, %v627_v10 }
 0x25f   :  { %2714 = vmatmul.mubr.msk.f32.gmra.mrb[28].mxu1 %vm5559_vm2, %v627_v10  ;;  %897 = vmatprep.mubr.f32.mxu0 %v5491_v1 }
 0x260   :  { %1058 = vmatprep.mubr.f32.mxu1 %v5491_v1 }
 0x262   :  { %2699 = vmatmul.mubr.msk.f32.gmra.mrb[30].mxu0 %vm5559_vm2, %v628_v13 }
 0x263   :  { %2715 = vmatmul.mubr.msk.f32.gmra.mrb[30].mxu1 %vm5559_vm2, %v628_v13  ;;  %903 = vmatprep.mubr.f32.mxu0 %v5491_v1 }
 0x264   :  { %1064 = vmatprep.mubr.f32.mxu1 %v5491_v1 }
 0x266   :  { %2700 = vmatmul.mubr.msk.f32.gmra.mrb[32].mxu0 %vm5559_vm2, %v629_v15 }
 0x267   :  { %2716 = vmatmul.mubr.msk.f32.gmra.mrb[32].mxu1 %vm5559_vm2, %v629_v15  ;;  %909 = vmatprep.mubr.f32.mxu0 %v5491_v1 }
 0x268   :  { %1070 = vmatprep.mubr.f32.mxu1 %v5491_v1 }
 0x26a   :  { %2701 = vmatmul.mubr.msk.f32.gmra.mrb[34].mxu0 %vm5559_vm2, %v630_v16 }
 0x26b   :  { %2717 = vmatmul.mubr.msk.f32.gmra.mrb[34].mxu1 %vm5559_vm2, %v630_v16  ;;  %915 = vmatprep.mubr.f32.mxu0 %v5491_v1 }
 0x26c   :  { %1076 = vmatprep.mubr.f32.mxu1 %v5491_v1 }
 0x26e   :  { %2702 = vmatmul.mubr.msk.f32.gmra.mrb[36].mxu0 %vm5559_vm2, %v631_v17 }
 0x26f   :  { %2718 = vmatmul.mubr.msk.f32.gmra.mrb[36].mxu1 %vm5559_vm2, %v631_v17  ;;  %921 = vmatprep.mubr.f32.mxu0 %v5491_v1 }
 0x270   :  { %1082 = vmatprep.mubr.f32.mxu1 %v5491_v1 }
 0x272   :  { %2703 = vmatmul.mubr.msk.f32.gmra.mrb[38].mxu0 %vm5559_vm2, %v632_v18 }
 0x273   :  { %2719 = vmatmul.mubr.msk.f32.gmra.mrb[38].mxu1 %vm5559_vm2, %v632_v18  ;;  %927 = vmatprep.mubr.f32.mxu0 %v5491_v1 }
 0x274   :  { %1088 = vmatprep.mubr.f32.mxu1 %v5491_v1 }
 0x276   :  { %2704 = vmatmul.mubr.msk.f32.gmra.mrb[40].mxu0 %vm5559_vm2, %v633_v19 }
 0x277   :  { %2720 = vmatmul.mubr.msk.f32.gmra.mrb[40].mxu1 %vm5559_vm2, %v633_v19  ;;  %933 = vmatprep.mubr.f32.mxu0 %v5491_v1  ;;  %v679_v19 = vpop.permute.xlu1 %678 }
 0x278   :  { %1094 = vmatprep.mubr.f32.mxu1 %v5491_v1 }
 0x27a   :  { %2705 = vmatmul.mubr.msk.f32.gmra.mrb[42].mxu0 %vm5559_vm2, %v634_v56 }
 0x27b   :  { %2721 = vmatmul.mubr.msk.f32.gmra.mrb[42].mxu1 %vm5559_vm2, %v634_v56  ;;  %1701 = vmatprep.mubr.f32.mxu0 %v5491_v1 }
 0x27c   :  { %1778 = vmatprep.mubr.f32.mxu1 %v5491_v1 }
 0x311   :  { %v845_v37 = vpop.f32.mrb[12].mxu0 }
 0x312   :  { %v847_v42 = vpop.f32.mrb[13].mxu0  ;;  %v1006_v20 = vpop.f32.mrb[12].mxu1  ;;  %v3504_v21 = vadd.f32 %v845_v37, %v654_v7 }
 0x313   :  { %v1008_v58 = vpop.f32.mrb[13].mxu1  ;;  %v3502_v44 = vadd.f32 %v1006_v20, %v654_v7  ;;  %v3510_v47 = vadd.f32 %v847_v42, %v654_v7 }
 0x314   :  { %v3508_v39 = vadd.f32 %v1008_v58, %v654_v7 }
 0x315   :  { %v851_v8 = vpop.f32.mrb[14].mxu0  ;;  %5591 = vst [vmem:[#allocation5_spill] sm:$0xff] %v3510_v47 }
 0x316   :  { %v3506_v22 = vadd.f32 %v851_v8, %v659_v38  ;;  %v853_v23 = vpop.f32.mrb[15].mxu0  ;;  %5590 = vst [vmem:[#allocation4_spill] sm:$0xff] %v3508_v39  ;;  %v1012_v40 = vpop.f32.mrb[14].mxu1 }
 0x317   :  { %v3512_v49 = vadd.f32 %v853_v23, %v659_v38  ;;  %v3514_v60 = vadd.f32 %v1012_v40, %v659_v38  ;;  %v1014_v62 = vpop.f32.mrb[15].mxu1 }
 0x318   :  { %v1118_v11 = vmin.f32 %v3504_v21, %v3506_v22  ;;  %v3518_v12 = vadd.f32 %v1014_v62, %v659_v38 }
 0x319   :  { %5592 = vst [vmem:[#allocation6_spill] sm:$0xff] %v3512_v49  ;;  %v1139_v26 = vmin.f32 %v3510_v47, %v3512_v49  ;;  %v1160_v27 = vmin.f32 %v3502_v44, %v3514_v60  ;;  %v857_v28 = vpop.f32.mrb[16].mxu0 }
 0x31a   :  { %5593 = vst [vmem:[#allocation7_spill] sm:$0xff] %v3518_v12  ;;  %v1181_v29 = vmin.f32 %v3508_v39, %v3518_v12  ;;  %v3526_v30 = vadd.f32 %v857_v28, %v664_v25  ;;  %v1018_v31 = vpop.f32.mrb[16].mxu1  ;;  %v859_v32 = vpop.f32.mrb[17].mxu0  ;;  %v5620_v12 = vlaneseq }
 0x31b   :  { %v3528_v33 = vadd.f32 %v1018_v31, %v664_v25  ;;  %v3530_v34 = vadd.f32 %v859_v32, %v664_v25  ;;  %v1020_v35 = vpop.f32.mrb[17].mxu1 }
 0x31c   :  { %v1119_v36 = vmin.f32 %v1118_v11, %v3526_v30  ;;  %v3533_v41 = vadd.f32 %v1020_v35, %v664_v25  ;;  %v684_v25 = vpop.permute.xlu0 %683 }
 0x31d   :  { %5594 = vst [vmem:[#allocation8_spill] sm:$0xff] %v3530_v34  ;;  %v1161_v45 = vmin.f32 %v1160_v27, %v3528_v33  ;;  %v1140_v46 = vmin.f32 %v1139_v26, %v3530_v34  ;;  %v863_v48 = vpop.f32.mrb[18].mxu0  ;;  %v2990_v34 = vmov 1966171168  }
 0x31e   :  { %5595 = vst [vmem:[#allocation9_spill] sm:$0xff] %v3533_v41  ;;  %v1182_v50 = vmin.f32 %v1181_v29, %v3533_v41  ;;  %v3538_v51 = vadd.f32 %v863_v48, %v669_v43  ;;  %v1024_v52 = vpop.f32.mrb[18].mxu1  ;;  %v865_v53 = vpop.f32.mrb[19].mxu0  ;;  %v3758_v49 = vunpack.c.l.s4 %v2990_v34 }
 0x31f   :  { %v3540_v54 = vadd.f32 %v1024_v52, %v669_v43  ;;  %v3542_v55 = vadd.f32 %v865_v53, %v669_v43  ;;  %v1026_v57 = vpop.f32.mrb[19].mxu1 }
 0x320   :  { %v1120_v59 = vmin.f32 %v1119_v36, %v3538_v51  ;;  %v3545_v61 = vadd.f32 %v1026_v57, %v669_v43 }
 0x321   :  { %5596 = vst [vmem:[#allocation10_spill] sm:$0xff] %v3542_v55  ;;  %v1162_v0 = vmin.f32 %v1161_v45, %v3540_v54  ;;  %v1141_v2 = vmin.f32 %v1140_v46, %v3542_v55  ;;  %v869_v3 = vpop.f32.mrb[20].mxu0 }
 0x322   :  { %5597 = vst [vmem:[#allocation11_spill] sm:$0xff] %v3545_v61  ;;  %v1183_v4 = vmin.f32 %v1182_v50, %v3545_v61  ;;  %v3550_v5 = vadd.f32 %v869_v3, %v674_v63  ;;  %v1030_v9 = vpop.f32.mrb[20].mxu1  ;;  %v871_v10 = vpop.f32.mrb[21].mxu0 }
 0x323   :  { %v3552_v13 = vadd.f32 %v1030_v9, %v674_v63  ;;  %v3554_v15 = vadd.f32 %v871_v10, %v674_v63  ;;  %v1032_v16 = vpop.f32.mrb[21].mxu1  ;;  %v689_v50 = vpop.permute.xlu1 %688 }
 0x324   :  { %v1121_v17 = vmin.f32 %v1120_v59, %v3550_v5  ;;  %v3557_v18 = vadd.f32 %v1032_v16, %v674_v63 }
 0x325   :  { %5598 = vst [vmem:[#allocation12_spill] sm:$0xff] %v3554_v15  ;;  %v1163_v56 = vmin.f32 %v1162_v0, %v3552_v13  ;;  %v1142_v7 = vmin.f32 %v1141_v2, %v3554_v15  ;;  %v875_v37 = vpop.f32.mrb[22].mxu0 }
 0x326   :  { %5599 = vst [vmem:[#allocation13_spill] sm:$0xff] %v3557_v18  ;;  %v1184_v42 = vmin.f32 %v1183_v4, %v3557_v18  ;;  %v3562_v20 = vadd.f32 %v875_v37, %v679_v19  ;;  %v1036_v58 = vpop.f32.mrb[22].mxu1  ;;  %v877_v38 = vpop.f32.mrb[23].mxu0 }
 0x327   :  { %v3564_v8 = vadd.f32 %v1036_v58, %v679_v19  ;;  %v3566_v23 = vadd.f32 %v877_v38, %v679_v19  ;;  %v1038_v40 = vpop.f32.mrb[23].mxu1 }
 0x328   :  { %v1122_v62 = vmin.f32 %v1121_v17, %v3562_v20  ;;  %v3569_v11 = vadd.f32 %v1038_v40, %v679_v19  ;;  %v694_v17 = vpop.permute.xlu0 %693 }
 0x329   :  { %5600 = vst [vmem:[#allocation14_spill] sm:$0xff] %v3566_v23  ;;  %v1164_v26 = vmin.f32 %v1163_v56, %v3564_v8  ;;  %v1143_v27 = vmin.f32 %v1142_v7, %v3566_v23  ;;  %v881_v28 = vpop.f32.mrb[24].mxu0 }
 0x32a   :  { %5601 = vst [vmem:[#allocation15_spill] sm:$0xff] %v3569_v11  ;;  %v1185_v29 = vmin.f32 %v1184_v42, %v3569_v11  ;;  %v3574_v31 = vadd.f32 %v881_v28, %v684_v25  ;;  %v1042_v32 = vpop.f32.mrb[24].mxu1  ;;  %v883_v35 = vpop.f32.mrb[25].mxu0 }
 0x32b   :  { %v3576_v36 = vadd.f32 %v1042_v32, %v684_v25  ;;  %v3578_v43 = vadd.f32 %v883_v35, %v684_v25  ;;  %v1044_v45 = vpop.f32.mrb[25].mxu1  ;;  %v699_v28 = vpop.permute.xlu1 %698 }
 0x32c   :  { %v1123_v46 = vmin.f32 %v1122_v62, %v3574_v31  ;;  %v3581_v48 = vadd.f32 %v1044_v45, %v684_v25 }
 0x32d   :  { %5602 = vst [vmem:[#allocation16_spill] sm:$0xff] %v3578_v43  ;;  %v1165_v52 = vmin.f32 %v1164_v26, %v3576_v36  ;;  %v1144_v53 = vmin.f32 %v1143_v27, %v3578_v43  ;;  %v887_v57 = vpop.f32.mrb[26].mxu0 }
 0x32e   :  { %5603 = vst [vmem:[#allocation17_spill] sm:$0xff] %v3581_v48  ;;  %v1186_v59 = vmin.f32 %v1185_v29, %v3581_v48  ;;  %v3586_v63 = vadd.f32 %v887_v57, %v689_v50  ;;  %v1048_v0 = vpop.f32.mrb[26].mxu1  ;;  %v889_v2 = vpop.f32.mrb[27].mxu0 }
 0x32f   :  { %v3588_v3 = vadd.f32 %v1048_v0, %v689_v50  ;;  %v3590_v4 = vadd.f32 %v889_v2, %v689_v50  ;;  %v1050_v9 = vpop.f32.mrb[27].mxu1 }
 0x330   :  { %v1124_v10 = vmin.f32 %v1123_v46, %v3586_v63  ;;  %v3593_v16 = vadd.f32 %v1050_v9, %v689_v50  ;;  %v704_v9 = vpop.permute.xlu0 %703 }
 0x331   :  { %5604 = vst [vmem:[#allocation18_spill] sm:$0xff] %v3590_v4  ;;  %v1166_v19 = vmin.f32 %v1165_v52, %v3588_v3  ;;  %v1145_v56 = vmin.f32 %v1144_v53, %v3590_v4  ;;  %v893_v7 = vpop.f32.mrb[28].mxu0 }
 0x332   :  { %5605 = vst [vmem:[#allocation19_spill] sm:$0xff] %v3593_v16  ;;  %v1187_v37 = vmin.f32 %v1186_v59, %v3593_v16  ;;  %v3598_v42 = vadd.f32 %v893_v7, %v694_v17  ;;  %v1054_v58 = vpop.f32.mrb[28].mxu1  ;;  %v895_v38 = vpop.f32.mrb[29].mxu0 }
 0x333   :  { %v3600_v40 = vadd.f32 %v1054_v58, %v694_v17  ;;  %v3602_v62 = vadd.f32 %v895_v38, %v694_v17  ;;  %v1056_v25 = vpop.f32.mrb[29].mxu1 }
 0x334   :  { %v1125_v26 = vmin.f32 %v1124_v10, %v3598_v42  ;;  %v3605_v27 = vadd.f32 %v1056_v25, %v694_v17 }
 0x335   :  { %5606 = vst [vmem:[#allocation20_spill] sm:$0xff] %v3602_v62  ;;  %v1167_v29 = vmin.f32 %v1166_v19, %v3600_v40  ;;  %v1146_v32 = vmin.f32 %v1145_v56, %v3602_v62  ;;  %v899_v35 = vpop.f32.mrb[30].mxu0 }
 0x336   :  { %5607 = vst [vmem:[#allocation21_spill] sm:$0xff] %v3605_v27  ;;  %v1188_v45 = vmin.f32 %v1187_v37, %v3605_v27  ;;  %v3610_v46 = vadd.f32 %v899_v35, %v699_v28  ;;  %v1060_v50 = vpop.f32.mrb[30].mxu1  ;;  %v901_v52 = vpop.f32.mrb[31].mxu0 }
 0x337   :  { %v3612_v53 = vadd.f32 %v1060_v50, %v699_v28  ;;  %v3614_v57 = vadd.f32 %v901_v52, %v699_v28  ;;  %v1062_v59 = vpop.f32.mrb[31].mxu1  ;;  %v709_v50 = vpop.permute.xlu1 %708 }
 0x338   :  { %v1126_v0 = vmin.f32 %v1125_v26, %v3610_v46  ;;  %v3617_v2 = vadd.f32 %v1062_v59, %v699_v28 }
 0x339   :  { %5608 = vst [vmem:[#allocation22_spill] sm:$0xff] %v3614_v57  ;;  %v1168_v10 = vmin.f32 %v1167_v29, %v3612_v53  ;;  %v1147_v17 = vmin.f32 %v1146_v32, %v3614_v57  ;;  %v905_v19 = vpop.f32.mrb[32].mxu0 }
 0x33a   :  { %5609 = vst [vmem:[#allocation23_spill] sm:$0xff] %v3617_v2  ;;  %v1189_v56 = vmin.f32 %v1188_v45, %v3617_v2  ;;  %v3622_v7 = vadd.f32 %v905_v19, %v704_v9  ;;  %v1066_v37 = vpop.f32.mrb[32].mxu1  ;;  %v907_v58 = vpop.f32.mrb[33].mxu0 }
 0x33b   :  { %v3624_v38 = vadd.f32 %v1066_v37, %v704_v9  ;;  %v3626_v25 = vadd.f32 %v907_v58, %v704_v9  ;;  %v1068_v35 = vpop.f32.mrb[33].mxu1 }
 0x33c   :  { %v1127_v26 = vmin.f32 %v1126_v0, %v3622_v7  ;;  %v3629_v28 = vadd.f32 %v1068_v35, %v704_v9  ;;  %v714_v35 = vpop.permute.xlu0 %713 }
 0x33d   :  { %5610 = vst [vmem:[#allocation24_spill] sm:$0xff] %v3626_v25  ;;  %v1169_v29 = vmin.f32 %v1168_v10, %v3624_v38  ;;  %v1148_v32 = vmin.f32 %v1147_v17, %v3626_v25  ;;  %v911_v52 = vpop.f32.mrb[34].mxu0 }
 0x33e   :  { %5611 = vst [vmem:[#allocation25_spill] sm:$0xff] %v3629_v28  ;;  %v1190_v45 = vmin.f32 %v1189_v56, %v3629_v28  ;;  %v3634_v59 = vadd.f32 %v911_v52, %v709_v50  ;;  %v1072_v19 = vpop.f32.mrb[34].mxu1  ;;  %v913_v37 = vpop.f32.mrb[35].mxu0 }
 0x33f   :  { %v3636_v1 = vadd.f32 %v1072_v19, %v709_v50  ;;  %v3638_v58 = vadd.f32 %v913_v37, %v709_v50  ;;  %v1074_v6 = vpop.f32.mrb[35].mxu1 }
 0x340   :  { %v1128_v0 = vmin.f32 %v1127_v26, %v3634_v59  ;;  %v3641_v9 = vadd.f32 %v1074_v6, %v709_v50  ;;  %v719_v50 = vpop.permute.xlu1 %718 }
 0x341   :  { %5612 = vst [vmem:[#allocation26_spill] sm:$0xff] %v3638_v58  ;;  %v1170_v10 = vmin.f32 %v1169_v29, %v3636_v1  ;;  %v1149_v17 = vmin.f32 %v1148_v32, %v3638_v58  ;;  %v917_v14 = vpop.f32.mrb[36].mxu0 }
 0x342   :  { %5613 = vst [vmem:[#allocation27_spill] sm:$0xff] %v3641_v9  ;;  %v1191_v56 = vmin.f32 %v1190_v45, %v3641_v9  ;;  %v3646_v52 = vadd.f32 %v917_v14, %v714_v35  ;;  %v1078_v24 = vpop.f32.mrb[36].mxu1  ;;  %v919_v19 = vpop.f32.mrb[37].mxu0 }
 0x343   :  { %v3648_v28 = vadd.f32 %v1078_v24, %v714_v35  ;;  %v3650_v37 = vadd.f32 %v919_v19, %v714_v35  ;;  %v1080_v2 = vpop.f32.mrb[37].mxu1 }
 0x344   :  { %v1129_v6 = vmin.f32 %v1128_v0, %v3646_v52  ;;  %v3653_v26 = vadd.f32 %v1080_v2, %v714_v35  ;;  %v724_v35 = vpop.permute.xlu0 %723 }
 0x345   :  { %5614 = vst [vmem:[#allocation28_spill] sm:$0xff] %v3650_v37  ;;  %v1171_v29 = vmin.f32 %v1170_v10, %v3648_v28  ;;  %v1150_v32 = vmin.f32 %v1149_v17, %v3650_v37  ;;  %v923_v27 = vpop.f32.mrb[38].mxu0 }
 0x346   :  { %5615 = vst [vmem:[#allocation29_spill] sm:$0xff] %v3653_v26  ;;  %v1192_v14 = vmin.f32 %v1191_v56, %v3653_v26  ;;  %v3658_v45 = vadd.f32 %v923_v27, %v719_v50  ;;  %v1084_v9 = vpop.f32.mrb[38].mxu1  ;;  %v925_v24 = vpop.f32.mrb[39].mxu0 }
 0x347   :  { %v3660_v16 = vadd.f32 %v1084_v9, %v719_v50  ;;  %v3662_v19 = vadd.f32 %v925_v24, %v719_v50  ;;  %v1086_v48 = vpop.f32.mrb[39].mxu1 }
 0x348   :  { %v1130_v2 = vmin.f32 %v1129_v6, %v3658_v45  ;;  %v3665_v0 = vadd.f32 %v1086_v48, %v719_v50  ;;  %v729_v50 = vpop.permute.xlu1 %728 }
 0x349   :  { %5616 = vst [vmem:[#allocation30_spill] sm:$0xff] %v3662_v19  ;;  %v1172_v10 = vmin.f32 %v1171_v29, %v3660_v16  ;;  %v1151_v17 = vmin.f32 %v1150_v32, %v3662_v19  ;;  %v929_v11 = vpop.f32.mrb[40].mxu0 }
 0x34a   :  { %5617 = vst [vmem:[#allocation31_spill] sm:$0xff] %v3665_v0  ;;  %v1193_v27 = vmin.f32 %v1192_v14, %v3665_v0  ;;  %v3670_v56 = vadd.f32 %v929_v11, %v724_v35  ;;  %v1090_v26 = vpop.f32.mrb[40].mxu1  ;;  %v931_v9 = vpop.f32.mrb[41].mxu0 }
 0x34b   :  { %v3672_v18 = vadd.f32 %v1090_v26, %v724_v35  ;;  %v3674_v24 = vadd.f32 %v931_v9, %v724_v35  ;;  %v1092_v61 = vpop.f32.mrb[41].mxu1  ;;  %v3685_v9 = vshrl.u32 %v5620_v12, 7 }
 0x34c   :  { %v1131_v48 = vmin.f32 %v1130_v2, %v3670_v56  ;;  %v3677_v6 = vadd.f32 %v1092_v61, %v724_v35 }
 0x34d   :  { %5618 = vst [vmem:[#allocation32_spill] sm:$0xff] %v3674_v24  ;;  %v1173_v29 = vmin.f32 %v1172_v10, %v3672_v18  ;;  %v1152_v32 = vmin.f32 %v1151_v17, %v3674_v24  ;;  %v935_v41 = vpop.f32.mrb[42].mxu0  ;;  %v1553_v17 = vsub.s32 0, %v3685_v9  ;;  %v1561_v12 = vsub.s32 2, %v3685_v9 }
 0x34e   :  { %5619 = vst [vmem:[#allocation33_spill] sm:$0xff] %v3677_v6  ;;  %v1194_v11 = vmin.f32 %v1193_v27, %v3677_v6  ;;  %v3682_v14 = vadd.f32 %v935_v41, %v729_v50  ;;  %v1096_v0 = vpop.f32.mrb[42].mxu1  ;;  %v937_v26 = vpop.f32.mrb[43].mxu0  ;;  %v1557_v6 = vsub.s32 1, %v3685_v9  ;;  %v3713_v62 = vadd.s32 8, %v3685_v9 }
 0x34f   :  { %v3687_v39 = vadd.f32 %v1096_v0, %v729_v50  ;;  %v3689_v2 = vadd.f32 %v937_v26, %v729_v50  ;;  %v1098_v61 = vpop.f32.mrb[43].mxu1  ;;  %v1565_v26 = vsub.s32 3, %v3685_v9  ;;  %v3716_v4 = vadd.s32 16, %v3685_v9 }
 0x350   :  { %v1132_v35 = vmin.f32 %v1131_v48, %v3682_v14  ;;  %v3692_v10 = vadd.f32 %v1098_v61, %v729_v50  ;;  %v2979_v61 = vld [vmem:[%s5476_s0 + $0x21] ss:$8 sm:$0xf]  ;;  %v3737_v43 = vadd.s32 72, %v3685_v9  ;;  %v3793_v34 = vadd.s32 120, %v3685_v9 }
 0x351   :  { %5621 = vst [vmem:[#allocation34_spill] sm:$0xff] %v3689_v2  ;;  %v1174_v27 = vmin.f32 %v1173_v29, %v3687_v39  ;;  %v1153_v41 = vmin.f32 %v1152_v32, %v3689_v2  ;;  %v3704_v29 = vrot.slane %v2979_v61, %v1553_v17  ;;  %v3706_v58 = vrot.slane %v2979_v61, %v1557_v6 }
 0x352   :  { %5622 = vst [vmem:[#allocation35_spill] sm:$0xff] %v3692_v10  ;;  %v1133_v24 = vrot.slane %v1132_v35, 4  ;;  %v1195_v0 = vmin.f32 %v1194_v11, %v3692_v10  ;;  %v3708_v25 = vrot.slane %v2979_v61, %v1561_v12  ;;  %v3710_v10 = vrot.slane %v2979_v61, %v1565_v26 }
 0x353   :  { %v1175_v19 = vrot.slane %v1174_v27, 4  ;;  %v1154_v37 = vrot.slane %v1153_v41, 4  ;;  %v3719_v17 = vadd.s32 24, %v3685_v9  ;;  %v3725_v6 = vadd.s32 40, %v3685_v9 }
 0x354   :  { %v1134_v48 = vmin.f32 %v1132_v35, %v1133_v24  ;;  %v1196_v50 = vrot.slane %v1195_v0, 4  ;;  %5623 = vst [vmem:[#allocation36_spill] sm:$0xff] %v3710_v10  ;;  %v3731_v26 = vadd.s32 56, %v3685_v9  ;;  %v3734_v61 = vadd.s32 64, %v3685_v9 }
 0x355   :  { %v1176_v32 = vmin.f32 %v1174_v27, %v1175_v19  ;;  %v1155_v2 = vmin.f32 %v1153_v41, %v1154_v37  ;;  %v3722_v37 = vadd.s32 32, %v3685_v9 }
 0x356   :  { %v1135_v57 = vrot.slane %v1134_v48, 2  ;;  %v1197_v11 = vmin.f32 %v1195_v0, %v1196_v50  ;;  %v3728_v0 = vadd.s32 48, %v3685_v9 }
 0x357   :  { %v1177_v24 = vrot.slane %v1176_v32, 2  ;;  %v1156_v35 = vrot.slane %v1155_v2, 2 }
 0x358   :  { %v1136_v19 = vmin.f32 %v1134_v48, %v1135_v57  ;;  %v1198_v12 = vrot.slane %v1197_v11, 2  ;;  %v3740_v57 = vadd.s32 80, %v3685_v9  ;;  %v3743_v48 = vadd.s32 88, %v3685_v9 }
 0x359   :  { %v1178_v27 = vmin.f32 %v1176_v32, %v1177_v24  ;;  %v1157_v41 = vmin.f32 %v1155_v2, %v1156_v35  ;;  %v3746_v2 = vadd.s32 96, %v3685_v9  ;;  %v3749_v32 = vadd.s32 104, %v3685_v9 }
 0x35a   :  { %v1137_v50 = vrot.slane %v1136_v19, 1  ;;  %v3752_v24 = vadd.s32 112, %v3685_v9  ;;  %v3756_v55 = vmin.f32 %v1197_v11, %v1198_v12  ;;  %v3803_v12 = vpack.c.bf16 %v3710_v10, %v3710_v10  ;;  %v5648_v10 = vld [vmem:[#allocation28_spill] sm:$0xff] }
 0x35b   :  { %v1179_v23 = vrot.slane %v1178_v27, 1  ;;  %v1158_v15 = vrot.slane %v1157_v41, 1 }
 0x35c   :  { %v3754_v35 = vmin.f32 %v1136_v19, %v1137_v50  ;;  %v3799_v19 = vpack.c.bf16 %v3706_v58, %v3706_v58  ;;  %5624 = vst [vmem:[#allocation37_spill] sm:$0xff] %v3803_v12 }
 0x35d   :  { %v3795_v11 = vmin.f32 %v1178_v27, %v1179_v23  ;;  %v3815_v23 = vpack.c.bf16 %v3704_v29, %v3704_v29  ;;  %v3819_v27 = vpack.c.bf16 %v3708_v25, %v3708_v25 }
 0x35e   :  { %vm1202_vm4 = vcmp.le.f32.partialorder %v3504_v21, %v3754_v35  ;;  %vm1206_vm5 = vcmp.le.f32.partialorder %v3506_v22, %v3754_v35  ;;  %vm1210_vm6 = vcmp.le.f32.partialorder %v3526_v30, %v3754_v35  ;;  %vm1214_vm7 = vcmp.le.f32.partialorder %v3538_v51, %v3754_v35 }
 0x35f   :  { %vm1218_vm8 = vcmp.le.f32.partialorder %v3550_v5, %v3754_v35  ;;  %vm1222_vm9 = vcmp.le.f32.partialorder %v3562_v20, %v3754_v35  ;;  %vm1226_vm10 = vcmp.le.f32.partialorder %v3574_v31, %v3754_v35  ;;  %vm1230_vm11 = vcmp.le.f32.partialorder %v3586_v63, %v3754_v35  ;;  %5625 = vst [vmem:[#allocation38_spill] sm:$0xff] %v3815_v23 }
 0x360   :  { %vm1238_vm13 = vcmp.le.f32.partialorder %v3610_v46, %v3754_v35  ;;  %vm1242_vm14 = vcmp.le.f32.partialorder %v3622_v7, %v3754_v35  ;;  %vm1246_vm15 = vcmp.le.f32.partialorder %v3634_v59, %v3754_v35  ;;  %vm1250_vm3 = vcmp.le.f32.partialorder %v3646_v52, %v3754_v35  ;;  %5626 = vst [vmem:[#allocation39_spill] sm:$0xff] %v3819_v27 }
 0x361   :  { %v1266_v50 = vsel %vm1202_vm4, %v3685_v9, 128  ;;  %v1270_v47 = vsel %vm1206_vm5, %v3713_v62, 128  ;;  %v1274_v12 = vsel %vm1210_vm6, %v3716_v4, 128  ;;  %v3825_v21 = vmin.f32 %v1157_v41, %v1158_v15 }
 0x362   :  { %v1278_v23 = vsel %vm1214_vm7, %v3719_v17, 128  ;;  %v1282_v27 = vsel %vm1218_vm8, %v3722_v37, 128  ;;  %v1286_v30 = vsel %vm1222_vm9, %v3725_v6, 128  ;;  %v1290_v15 = vsel %vm1226_vm10, %v3728_v0, 128 }
 0x363   :  { %vm1330_vm4 = vcmp.lt.s32.totalorder %v1266_v50, %v1270_v47  ;;  %vm1204_vm5 = vcmp.le.f32.partialorder %v3502_v44, %v3795_v11  ;;  %vm1208_vm6 = vcmp.le.f32.partialorder %v3514_v60, %v3795_v11  ;;  %vm1244_vm9 = vcmp.le.f32.partialorder %v3624_v38, %v3795_v11 }
 0x364   :  { %v1331_v51 = vsel %vm1330_vm4, %v1266_v50, %v1270_v47  ;;  %vm1240_vm4 = vcmp.le.f32.partialorder %v3612_v53, %v3795_v11  ;;  %vm1248_vm10 = vcmp.le.f32.partialorder %v3636_v1, %v3795_v11  ;;  %vm1256_vm2 = vcmp.le.f32.partialorder %v3660_v16, %v3795_v11 }
 0x365   :  { %vm1332_vm12 = vcmp.lt.s32.totalorder %v1331_v51, %v1274_v12  ;;  %vm1260_vm7 = vcmp.le.f32.partialorder %v3672_v18, %v3795_v11  ;;  %v1294_v5 = vsel %vm1230_vm11, %v3731_v26, 128  ;;  %v1302_v41 = vsel %vm1238_vm13, %v3737_v43, 128 }
 0x366   :  { %v1333_v47 = vsel %vm1332_vm12, %v1331_v51, %v1274_v12  ;;  %vm5627_vm12 = vcmp.le.f32.partialorder %v3598_v42, %v3754_v35  ;;  %v1306_v63 = vsel %vm1242_vm14, %v3740_v57, 128  ;;  %v1310_v42 = vsel %vm1246_vm15, %v3743_v48, 128 }
 0x367   :  { %vm1334_vm8 = vcmp.lt.s32.totalorder %v1333_v47, %v1278_v23  ;;  %v1298_v20 = vsel %vm5627_vm12, %v3734_v61, 128  ;;  %v3901_v12 = vsel %vm1250_vm3, %v3746_v2, 128  ;;  %v1268_v46 = vsel %vm1204_vm5, %v3685_v9, 128 }
 0x368   :  { %v1335_v31 = vsel %vm1334_vm8, %v1333_v47, %v1278_v23  ;;  %v1272_v7 = vsel %vm1208_vm6, %v3713_v62, 128  ;;  %vm5628_vm13 = vcmp.le.f32.partialorder %v3658_v45, %v3754_v35  ;;  %vm5629_vm14 = vcmp.le.f32.partialorder %v3670_v56, %v3754_v35  ;;  %v5640_v47 = vld [vmem:[#allocation12_spill] sm:$0xff] }
 0x369   :  { %vm1336_vm11 = vcmp.lt.s32.totalorder %v1335_v31, %v1282_v27  ;;  %v3915_v59 = vsel %vm5628_vm13, %v3749_v32, 128  ;;  %v3921_v52 = vsel %vm5629_vm14, %v3752_v24, 128  ;;  %vm5630_vm15 = vcmp.le.f32.partialorder %v3682_v14, %v3754_v35 }
 0x36a   :  { %v1337_v50 = vsel %vm1336_vm11, %v1335_v31, %v1282_v27  ;;  %v3927_v44 = vsel %vm5630_vm15, %v3793_v34, 128  ;;  %vm5631_vm5 = vcmp.le.f32.partialorder %v3528_v33, %v3795_v11  ;;  %vm5632_vm6 = vcmp.le.f32.partialorder %v3540_v54, %v3795_v11  ;;  %v5636_v27 = vld [vmem:[#allocation5_spill] sm:$0xff]  ;;  %v5642_v31 = vld [vmem:[#allocation16_spill] sm:$0xff] }
 0x36b   :  { %vm1338_vm3 = vcmp.lt.s32.totalorder %v1337_v50, %v1286_v30  ;;  %v1276_v45 = vsel %vm5631_vm5, %v3716_v4, 128  ;;  %v1280_v56 = vsel %vm5632_vm6, %v3719_v17, 128  ;;  %vm5633_vm8 = vcmp.le.f32.partialorder %v3552_v13, %v3795_v11  ;;  %v5637_v13 = vld [vmem:[#allocation6_spill] sm:$0xff] }
 0x36c   :  { %v1339_v60 = vsel %vm1338_vm3, %v1337_v50, %v1286_v30  ;;  %v1284_v23 = vsel %vm5633_vm8, %v3722_v37, 128  ;;  %vm5634_vm11 = vcmp.le.f32.partialorder %v3564_v8, %v3795_v11  ;;  %vm5635_vm13 = vcmp.le.f32.partialorder %v3576_v36, %v3795_v11  ;;  %v5638_v30 = vld [vmem:[#allocation8_spill] sm:$0xff]  ;;  %v5639_v8 = vld [vmem:[#allocation10_spill] sm:$0xff] }
 0x36d   :  { %vm1340_vm12 = vcmp.lt.s32.totalorder %v1339_v60, %v1290_v15  ;;  %v1288_v14 = vsel %vm5634_vm11, %v3725_v6, 128  ;;  %v1292_v33 = vsel %vm5635_vm13, %v3728_v0, 128  ;;  %vm1408_vm14 = vcmp.lt.s32.totalorder %v1268_v46, %v1272_v7  ;;  %v5643_v50 = vld [vmem:[#allocation18_spill] sm:$0xff] }
 0x36e   :  { %v1341_v35 = vsel %vm1340_vm12, %v1339_v60, %v1290_v15  ;;  %v1409_v54 = vsel %vm1408_vm14, %v1268_v46, %v1272_v7  ;;  %v5641_v15 = vld [vmem:[#allocation14_spill] sm:$0xff]  ;;  %v5644_v60 = vld [vmem:[#allocation20_spill] sm:$0xff]  ;;  %v1320_v53 = vsel %vm1256_vm2, %v3749_v32, 128  ;;  %v1324_v38 = vsel %vm1260_vm7, %v3752_v24, 128 }
 0x36f   :  { %vm1342_vm5 = vcmp.lt.s32.totalorder %v1341_v35, %v1294_v5  ;;  %vm1410_vm6 = vcmp.lt.s32.totalorder %v1409_v54, %v1276_v45  ;;  %vm5657_vm7 = vcmp.le.f32.partialorder %v5637_v13, %v3825_v21 }
 0x370   :  { %v1343_v51 = vsel %vm1342_vm5, %v1341_v35, %v1294_v5  ;;  %v1411_v36 = vsel %vm1410_vm6, %v1409_v54, %v1276_v45  ;;  %v5645_v5 = vld [vmem:[#allocation22_spill] sm:$0xff]  ;;  %v5646_v45 = vld [vmem:[#allocation24_spill] sm:$0xff]  ;;  %v1271_v18 = vsel %vm5657_vm7, %v3713_v62, 128 }
 0x371   :  { %vm1344_vm14 = vcmp.lt.s32.totalorder %v1343_v51, %v1298_v20  ;;  %vm1412_vm15 = vcmp.lt.s32.totalorder %v1411_v36, %v1280_v56  ;;  %vm1243_vm13 = vcmp.le.f32.partialorder %v5646_v45, %v3825_v21  ;;  %v5647_v35 = vld [vmem:[#allocation26_spill] sm:$0xff] }
 0x372   :  { %v1345_v46 = vsel %vm1344_vm14, %v1343_v51, %v1298_v20  ;;  %v1413_v7 = vsel %vm1412_vm15, %v1411_v36, %v1280_v56  ;;  %vm1247_vm8 = vcmp.le.f32.partialorder %v5647_v35, %v3825_v21  ;;  %vm1251_vm14 = vcmp.le.f32.partialorder %v5648_v10, %v3825_v21  ;;  %v5649_v20 = vld [vmem:[#allocation30_spill] sm:$0xff]  ;;  %v5650_v56 = vld [vmem:[#allocation32_spill] sm:$0xff] }
 0x373   :  { %vm1346_vm12 = vcmp.lt.s32.totalorder %v1345_v46, %v1302_v41  ;;  %vm1414_vm11 = vcmp.lt.s32.totalorder %v1413_v7, %v1284_v23  ;;  %vm1259_vm6 = vcmp.le.f32.partialorder %v5650_v56, %v3825_v21  ;;  %v5651_v51 = vld [vmem:[#allocation34_spill] sm:$0xff] }
 0x374   :  { %v1347_v54 = vsel %vm1346_vm12, %v1345_v46, %v1302_v41  ;;  %v1415_v22 = vsel %vm1414_vm11, %v1413_v7, %v1284_v23  ;;  %vm1263_vm3 = vcmp.le.f32.partialorder %v5651_v51, %v3825_v21  ;;  %vm5652_vm12 = vcmp.le.f32.partialorder %v3588_v3, %v3795_v11 }
 0x375   :  { %vm1348_vm5 = vcmp.lt.s32.totalorder %v1347_v54, %v1306_v63  ;;  %vm1416_vm1 = vcmp.lt.s32.totalorder %v1415_v22, %v1288_v14  ;;  %v1296_v41 = vsel %vm5652_vm12, %v3731_v26, 128  ;;  %vm5653_vm11 = vcmp.le.f32.partialorder %v3600_v40, %v3795_v11 }
 0x376   :  { %v1349_v36 = vsel %vm1348_vm5, %v1347_v54, %v1306_v63  ;;  %v1300_v23 = vsel %vm5653_vm11, %v3734_v61, 128  ;;  %v1417_v46 = vsel %vm1416_vm1, %v1415_v22, %v1288_v14  ;;  %v1304_v7 = vsel %vm1240_vm4, %v3737_v43, 128 }
 0x377   :  { %vm1350_vm15 = vcmp.lt.s32.totalorder %v1349_v36, %v1310_v42  ;;  %v1308_v63 = vsel %vm1244_vm9, %v3740_v57, 128  ;;  %vm1418_vm5 = vcmp.lt.s32.totalorder %v1417_v46, %v1292_v33  ;;  %v1312_v40 = vsel %vm1248_vm10, %v3743_v48, 128 }
 0x378   :  { %v1351_v3 = vsel %vm1350_vm15, %v1349_v36, %v1310_v42  ;;  %vm5654_vm1 = vcmp.le.f32.partialorder %v3648_v28, %v3795_v11  ;;  %v1419_v14 = vsel %vm1418_vm5, %v1417_v46, %v1292_v33  ;;  %vm5655_vm10 = vcmp.le.f32.partialorder %v3687_v39, %v3795_v11  ;;  %v5666_v46 = vld [vmem:[#allocation7_spill] sm:$0xff] }
 0x379   :  { %v1316_v22 = vsel %vm5654_vm1, %v3746_v2, 128  ;;  %vm1352_vm4 = vcmp.lt.s32.totalorder %v1351_v3, %v3901_v12  ;;  %vm1420_vm9 = vcmp.lt.s32.totalorder %v1419_v14, %v1296_v41  ;;  %v4019_v28 = vsel %vm5655_vm10, %v3793_v34, 128 }
 0x37a   :  { %v1353_v1 = vsel %vm1352_vm4, %v1351_v3, %v3901_v12  ;;  %v1421_v42 = vsel %vm1420_vm9, %v1419_v14, %v1296_v41  ;;  %vm5656_vm15 = vcmp.le.f32.partialorder %v5636_v27, %v3825_v21  ;;  %vm5658_vm11 = vcmp.le.f32.partialorder %v5638_v30, %v3825_v21  ;;  %v5667_v3 = vld [vmem:[#allocation9_spill] sm:$0xff] }
 0x37b   :  { %v1267_v16 = vsel %vm5656_vm15, %v3685_v9, 128  ;;  %vm1354_vm2 = vcmp.lt.s32.totalorder %v1353_v1, %v3915_v59  ;;  %vm1422_vm12 = vcmp.lt.s32.totalorder %v1421_v42, %v1300_v23  ;;  %v1275_v39 = vsel %vm5658_vm11, %v3716_v4, 128 }
 0x37c   :  { %v1355_v11 = vsel %vm1354_vm2, %v1353_v1, %v3915_v59  ;;  %v1423_v12 = vsel %vm1422_vm12, %v1421_v42, %v1300_v23  ;;  %vm5659_vm5 = vcmp.le.f32.partialorder %v5639_v8, %v3825_v21  ;;  %vm5660_vm1 = vcmp.le.f32.partialorder %v5640_v47, %v3825_v21  ;;  %v5670_v42 = vld [vmem:[#allocation15_spill] sm:$0xff] }
 0x37d   :  { %v1279_v33 = vsel %vm5659_vm5, %v3719_v17, 128  ;;  %v1283_v27 = vsel %vm5660_vm1, %v3722_v37, 128  ;;  %vm1356_vm4 = vcmp.lt.s32.totalorder %v1355_v11, %v3921_v52  ;;  %vm1424_vm9 = vcmp.lt.s32.totalorder %v1423_v12, %v1304_v7 }
 0x37e   :  { %vm5661_vm10 = vcmp.le.f32.partialorder %v5641_v15, %v3825_v21  ;;  %vm5662_vm15 = vcmp.le.f32.partialorder %v5642_v31, %v3825_v21  ;;  %v1357_v30 = vsel %vm1356_vm4, %v1355_v11, %v3921_v52  ;;  %v1425_v8 = vsel %vm1424_vm9, %v1423_v12, %v1304_v7  ;;  %v5665_v52 = vld [vmem:[#allocation4_spill] sm:$0xff]  ;;  %v5672_v11 = vld [vmem:[#allocation19_spill] sm:$0xff]  ;;  %v5673_v12 = vld [vmem:[#allocation21_spill] sm:$0xff] }
 0x37f   :  { %v1287_v13 = vsel %vm5661_vm10, %v3725_v6, 128  ;;  %v1291_v59 = vsel %vm5662_vm15, %v3728_v0, 128  ;;  %vm1369_vm2 = vcmp.lt.s32.totalorder %v1267_v16, %v1271_v18  ;;  %v5663_v47 = vrot.slane %v3756_v55, 1 }
 0x380   :  { %vm1358_vm12 = vcmp.lt.s32.totalorder %v1357_v30, %v3927_v44  ;;  %vm1426_vm7 = vcmp.lt.s32.totalorder %v1425_v8, %v1308_v63  ;;  %vm5664_vm11 = vcmp.le.f32.partialorder %v5643_v50, %v3825_v21  ;;  %v1370_v36 = vsel %vm1369_vm2, %v1267_v16, %v1271_v18  ;;  %v5668_v50 = vld [vmem:[#allocation11_spill] sm:$0xff]  ;;  %v5671_v18 = vld [vmem:[#allocation17_spill] sm:$0xff] }
 0x381   :  { %v4056_v54 = vmin.f32 %v3756_v55, %v5663_v47  ;;  %v1295_v15 = vsel %vm5664_vm11, %v3731_v26, 128  ;;  %v1359_v31 = vsel %vm1358_vm12, %v1357_v30, %v3927_v44  ;;  %v1427_v41 = vsel %vm1426_vm7, %v1425_v8, %v1308_v63  ;;  %v5669_v63 = vld [vmem:[#allocation13_spill] sm:$0xff] }
 0x382   :  { %vm1371_vm5 = vcmp.lt.s32.totalorder %v1370_v36, %v1275_v39  ;;  %v1360_v23 = vrot.slane %v1359_v31, 4  ;;  %vm1428_vm4 = vcmp.lt.s32.totalorder %v1427_v41, %v1312_v40  ;;  %v1327_v10 = vsel %vm1263_vm3, %v3793_v34, 128 }
 0x383   :  { %vm1205_vm1 = vcmp.le.f32.partialorder %v5665_v52, %v4056_v54  ;;  %v1372_v55 = vsel %vm1371_vm5, %v1370_v36, %v1275_v39  ;;  %v1429_v7 = vsel %vm1428_vm4, %v1427_v41, %v1312_v40  ;;  %v5676_v36 = vld [vmem:[#allocation27_spill] sm:$0xff] }
 0x384   :  { %vm1373_vm10 = vcmp.lt.s32.totalorder %v1372_v55, %v1279_v33  ;;  %vm1361_vm12 = vcmp.lt.s32.totalorder %v1359_v31, %v1360_v23  ;;  %vm1430_vm7 = vcmp.lt.s32.totalorder %v1429_v7, %v1316_v22  ;;  %v5678_v41 = vld [vmem:[#allocation31_spill] sm:$0xff] }
 0x385   :  { %v1374_v44 = vsel %vm1373_vm10, %v1372_v55, %v1279_v33  ;;  %v1362_v14 = vsel %vm1361_vm12, %v1359_v31, %v1360_v23  ;;  %v1431_v1 = vsel %vm1430_vm7, %v1429_v7, %v1316_v22  ;;  %v5674_v33 = vld [vmem:[#allocation23_spill] sm:$0xff] }
 0x386   :  { %vm1375_vm5 = vcmp.lt.s32.totalorder %v1374_v44, %v1283_v27  ;;  %v1363_v40 = vrot.slane %v1362_v14, 2  ;;  %vm1432_vm4 = vcmp.lt.s32.totalorder %v1431_v1, %v1320_v53  ;;  %vm1241_vm9 = vcmp.le.f32.partialorder %v5674_v33, %v4056_v54  ;;  %v5682_v7 = vld [vmem:[#allocation35_spill] sm:$0xff] }
 0x387   :  { %v1376_v16 = vsel %vm1375_vm5, %v1374_v44, %v1283_v27  ;;  %v1433_v39 = vsel %vm1432_vm4, %v1431_v1, %v1320_v53  ;;  %v5675_v27 = vld [vmem:[#allocation25_spill] sm:$0xff]  ;;  %v5683_v44 = vunpack.c.0.s8 %v3758_v49  ;;  %v1315_v49 = vsel %vm1251_vm14, %v3746_v2, 128 }
 0x388   :  { %vm1377_vm2 = vcmp.lt.s32.totalorder %v1376_v16, %v1287_v13  ;;  %vm1364_vm12 = vcmp.lt.s32.totalorder %v1362_v14, %v1363_v40  ;;  %vm1434_vm7 = vcmp.lt.s32.totalorder %v1433_v39, %v1324_v38  ;;  %vm1245_vm15 = vcmp.le.f32.partialorder %v5675_v27, %v4056_v54 }
 0x389   :  { %v1378_v22 = vsel %vm1377_vm2, %v1376_v16, %v1287_v13  ;;  %v1365_v30 = vsel %vm1364_vm12, %v1362_v14, %v1363_v40  ;;  %v1435_v8 = vsel %vm1434_vm7, %v1433_v39, %v1324_v38  ;;  %v5677_v13 = vld [vmem:[#allocation29_spill] sm:$0xff]  ;;  %vm5679_vm7 = vcmp.le.f32.partialorder %v5644_v60, %v3825_v21 }
 0x38a   :  { %vm1379_vm5 = vcmp.lt.s32.totalorder %v1378_v22, %v1291_v59  ;;  %v1366_v53 = vrot.slane %v1365_v30, 1  ;;  %vm1436_vm4 = vcmp.lt.s32.totalorder %v1435_v8, %v4019_v28  ;;  %v1299_v23 = vsel %vm5679_vm7, %v3734_v61, 128 }
 0x38b   :  { %v1380_v47 = vsel %vm1379_vm5, %v1378_v22, %v1291_v59  ;;  %v1437_v31 = vsel %vm1436_vm4, %v1435_v8, %v4019_v28  ;;  %v5680_v59 = vld [vmem:[#allocation33_spill] sm:$0xff]  ;;  %vm5681_vm4 = vcmp.le.f32.partialorder %v5645_v5, %v3825_v21  ;;  %vm1265_vm2 = vcmp.le.f32.partialorder %v5682_v7, %v4056_v54 }
 0x38c   :  { %vm1381_vm11 = vcmp.lt.s32.totalorder %v1380_v47, %v1295_v15  ;;  %v1438_v38 = vrot.slane %v1437_v31, 4  ;;  %vm1261_vm5 = vcmp.le.f32.partialorder %v5680_v59, %v4056_v54  ;;  %v1303_v28 = vsel %vm5681_vm4, %v3737_v43, 128 }
 0x38d   :  { %v1382_v55 = vsel %vm1381_vm11, %v1380_v47, %v1295_v15  ;;  %v4109_v14 = vsub.s32 %v5683_v44, %v3685_v9  ;;  %vm1367_vm12 = vcmp.lt.s32.totalorder %v1365_v30, %v1366_v53  ;;  %v1307_v60 = vsel %vm1243_vm13, %v3740_v57, 128 }
 0x38e   :  { %vm1383_vm10 = vcmp.lt.s32.totalorder %v1382_v55, %v1299_v23  ;;  %vm1439_vm7 = vcmp.lt.s32.totalorder %v1437_v31, %v1438_v38  ;;  %v1311_v5 = vsel %vm1247_vm8, %v3743_v48, 128  ;;  %vm5684_vm4 = vcmp.le.f32.partialorder %v5649_v20, %v3825_v21 }
 0x38f   :  { %v1384_v15 = vsel %vm1383_vm10, %v1382_v55, %v1299_v23  ;;  %v1440_v1 = vsel %vm1439_vm7, %v1437_v31, %v1438_v38  ;;  %v1319_v45 = vsel %vm5684_vm4, %v3749_v32, 128  ;;  %v1323_v16 = vsel %vm1259_vm6, %v3752_v24, 128 }
 0x390   :  { %vm1385_vm11 = vcmp.lt.s32.totalorder %v1384_v15, %v1303_v28  ;;  %v1441_v40 = vrot.slane %v1440_v1, 2  ;;  %v4131_v35 = vsel %vm1367_vm12, %v1365_v30, %v1366_v53  ;;  %v1269_v20 = vsel %vm1205_vm1, %v3685_v9, 128 }
 0x391   :  { %v1386_v39 = vsel %vm1385_vm11, %v1384_v15, %v1303_v28  ;;  %vm5685_vm6 = vcmp.le.f32.partialorder %v5666_v46, %v4056_v54  ;;  %vm5686_vm14 = vcmp.le.f32.partialorder %v5667_v3, %v4056_v54  ;;  %vm5687_vm10 = vcmp.le.f32.partialorder %v5668_v50, %v4056_v54 }
 0x392   :  { %vm1387_vm8 = vcmp.lt.s32.totalorder %v1386_v39, %v1307_v60  ;;  %vm1442_vm13 = vcmp.lt.s32.totalorder %v1440_v1, %v1441_v40  ;;  %v1273_v56 = vsel %vm5685_vm6, %v3713_v62, 128  ;;  %v1277_v30 = vsel %vm5686_vm14, %v3716_v4, 128 }
 0x393   :  { %v1388_v22 = vsel %vm1387_vm8, %v1386_v39, %v1307_v60  ;;  %v1443_v21 = vsel %vm1442_vm13, %v1440_v1, %v1441_v40  ;;  %v1281_v51 = vsel %vm5687_vm10, %v3719_v17, 128  ;;  %vm5688_vm1 = vcmp.le.f32.partialorder %v5669_v63, %v4056_v54 }
 0x394   :  { %vm1389_vm3 = vcmp.lt.s32.totalorder %v1388_v22, %v1311_v5  ;;  %v1285_v52 = vsel %vm5688_vm1, %v3722_v37, 128  ;;  %v1444_v8 = vrot.slane %v1443_v21, 1  ;;  %vm5689_vm12 = vcmp.le.f32.partialorder %v5670_v42, %v4056_v54 }
 0x395   :  { %v1390_v46 = vsel %vm1389_vm3, %v1388_v22, %v1311_v5  ;;  %v1289_v3 = vsel %vm5689_vm12, %v3725_v6, 128  ;;  %vm5690_vm7 = vcmp.le.f32.partialorder %v5671_v18, %v4056_v54  ;;  %vm5691_vm4 = vcmp.le.f32.partialorder %v5672_v11, %v4056_v54 }
 0x396   :  { %v1293_v53 = vsel %vm5690_vm7, %v3728_v0, 128  ;;  %vm1391_vm11 = vcmp.lt.s32.totalorder %v1390_v46, %v1315_v49  ;;  %v1297_v50 = vsel %vm5691_vm4, %v3731_v26, 128  ;;  %vm5692_vm8 = vcmp.le.f32.partialorder %v5673_v12, %v4056_v54 }
 0x397   :  { %v1301_v63 = vsel %vm5692_vm8, %v3734_v61, 128  ;;  %vm1447_vm13 = vcmp.lt.s32.totalorder %v1269_v20, %v1273_v56  ;;  %vm1445_vm6 = vcmp.lt.s32.totalorder %v1443_v21, %v1444_v8  ;;  %v1392_v42 = vsel %vm1391_vm11, %v1390_v46, %v1315_v49 }
 0x398   :  { %v4177_v18 = vsel %vm1241_vm9, %v3737_v43, 128  ;;  %v1448_v47 = vsel %vm1447_vm13, %v1269_v20, %v1273_v56  ;;  %vm1393_vm14 = vcmp.lt.s32.totalorder %v1392_v42, %v1319_v45  ;;  %v4183_v11 = vsel %vm1245_vm15, %v3740_v57, 128 }
 0x399   :  { %vm5693_vm3 = vcmp.le.f32.partialorder %v5676_v36, %v4056_v54  ;;  %vm1449_vm10 = vcmp.lt.s32.totalorder %v1448_v47, %v1277_v30  ;;  %v4191_v31 = vsel %vm1445_vm6, %v1443_v21, %v1444_v8  ;;  %v1394_v33 = vsel %vm1393_vm14, %v1392_v42, %v1319_v45 }
 0x39a   :  { %v4189_v12 = vsel %vm5693_vm3, %v3743_v48, 128  ;;  %vm5694_vm9 = vcmp.le.f32.partialorder %v5677_v13, %v4056_v54  ;;  %v1450_v23 = vsel %vm1449_vm10, %v1448_v47, %v1277_v30  ;;  %vm1395_vm1 = vcmp.lt.s32.totalorder %v1394_v33, %v1323_v16 }
 0x39b   :  { %v4197_v38 = vsel %vm5694_vm9, %v3746_v2, 128  ;;  %vm5695_vm15 = vcmp.le.f32.partialorder %v5678_v41, %v4056_v54  ;;  %v4209_v36 = vsel %vm1261_vm5, %v3752_v24, 128  ;;  %vm1451_vm12 = vcmp.lt.s32.totalorder %v1450_v23, %v1281_v51 }
 0x39c   :  { %v4203_v27 = vsel %vm5695_vm15, %v3749_v32, 128  ;;  %v1396_v55 = vsel %vm1395_vm1, %v1394_v33, %v1323_v16  ;;  %v4215_v13 = vsel %vm1265_vm2, %v3793_v34, 128  ;;  %v1452_v28 = vsel %vm1451_vm12, %v1450_v23, %v1281_v51 }
 0x39d   :  { %vm1486_vm7 = vcmp.eq.s32.totalorder %v3685_v9, %v4131_v35  ;;  %vm1397_vm11 = vcmp.lt.s32.totalorder %v1396_v55, %v1327_v10  ;;  %vm1453_vm4 = vcmp.lt.s32.totalorder %v1452_v28, %v1285_v52  ;;  %vm1490_vm8 = vcmp.eq.s32.totalorder %v3713_v62, %v4131_v35 }
 0x39e   :  { %vm5568_vm5 = vcmp.eq.s32.totalorder %v3713_v62, %v4191_v31  ;;  %v1398_v41 = vsel %vm1397_vm11, %v1396_v55, %v1327_v10  ;;  %v1454_v59 = vsel %vm1453_vm4, %v1452_v28, %v1285_v52  ;;  %vm1494_vm13 = vcmp.eq.s32.totalorder %v3716_v4, %v4131_v35  ;;  %v5696_v28 = vld [vmem:[#allocation38_spill] sm:$0xff] }
 0x39f   :  { %vm1498_vm2 = vcmp.eq.s32.totalorder %v3719_v17, %v4131_v35  ;;  %v1399_v54 = vrot.slane %v1398_v41, 4  ;;  %vm1455_vm6 = vcmp.lt.s32.totalorder %v1454_v59, %v1289_v3  ;;  %vm5569_vm14 = vcmp.eq.s32.totalorder %v3685_v9, %v4191_v31 }
 0x3a0   :  { %vm5575_vm3 = vcmp.eq.s32.totalorder %v3716_v4, %v4191_v31  ;;  %v1456_v7 = vsel %vm1455_vm6, %v1454_v59, %v1289_v3  ;;  %vm5573_vm10 = vcmp.eq.s32.totalorder %v3719_v17, %v4191_v31  ;;  %v1575_v44 = vsel %vm1490_vm8, %v3704_v29, 0.0 }
 0x3a1   :  { %v4241_v60 = vsel %vm5568_vm5, %v3708_v25, 0.0  ;;  %vm1400_vm9 = vcmp.lt.s32.totalorder %v1398_v41, %v1399_v54  ;;  %vm1457_vm1 = vcmp.lt.s32.totalorder %v1456_v7, %v1293_v53  ;;  %vm5571_vm15 = vcmp.eq.s32.totalorder %v3722_v37, %v4131_v35 }
 0x3a2   :  { %vm5570_vm12 = vcmp.eq.s32.totalorder %v3722_v37, %v4191_v31  ;;  %v1401_v15 = vsel %vm1400_vm9, %v1398_v41, %v1399_v54  ;;  %v1458_v1 = vsel %vm1457_vm1, %v1456_v7, %v1293_v53  ;;  %v1571_v5 = vsel %vm1486_vm7, %v3704_v29, 0.0 }
 0x3a3   :  { %v1573_v49 = vsel %vm5569_vm14, %v3708_v25, 0.0  ;;  %v1402_v40 = vrot.slane %v1401_v15, 2  ;;  %vm1459_vm11 = vcmp.lt.s32.totalorder %v1458_v1, %v1297_v50  ;;  %vm1506_vm4 = vcmp.eq.s32.totalorder %v3725_v6, %v4131_v35 }
 0x3a4   :  { %vm5578_vm6 = vcmp.eq.s32.totalorder %v3725_v6, %v4191_v31  ;;  %v1460_v45 = vsel %vm1459_vm11, %v1458_v1, %v1297_v50  ;;  %v1587_v16 = vsel %vm5571_vm15, %v3704_v29, 0.0  ;;  %v4267_v39 = vsel %vm5570_vm12, %v3708_v25, 0.0 }
 0x3a5   :  { %vm5577_vm9 = vcmp.eq.s32.totalorder %v3728_v0, %v4131_v35  ;;  %vm1403_vm1 = vcmp.lt.s32.totalorder %v1401_v15, %v1402_v40  ;;  %vm1461_vm5 = vcmp.lt.s32.totalorder %v1460_v45, %v1301_v63  ;;  %v1579_v10 = vsel %vm1494_vm13, %v3704_v29, 0.0 }
 0x3a6   :  { %vm5572_vm11 = vcmp.eq.s32.totalorder %v3728_v0, %v4191_v31  ;;  %v1404_v20 = vsel %vm1403_vm1, %v1401_v15, %v1402_v40  ;;  %v1462_v22 = vsel %vm1461_vm5, %v1460_v45, %v1301_v63  ;;  %vm5576_vm14 = vcmp.eq.s32.totalorder %v3734_v61, %v4131_v35 }
 0x3a7   :  { %vm5574_vm12 = vcmp.eq.s32.totalorder %v3734_v61, %v4191_v31  ;;  %v1405_v56 = vrot.slane %v1404_v20, 1  ;;  %vm1463_vm15 = vcmp.lt.s32.totalorder %v1462_v22, %v4177_v18  ;;  %v1581_v30 = vsel %vm5575_vm3, %v3708_v25, 0.0 }
 0x3a8   :  { %v1595_v21 = vsel %vm5577_vm9, %v3704_v29, 0.0  ;;  %v1464_v51 = vsel %vm1463_vm15, %v1462_v22, %v4177_v18  ;;  %v4295_v52 = vsel %vm5572_vm11, %v3708_v25, 0.0  ;;  %v4301_v8 = vsel %vm1498_vm2, %v3704_v29, 0.0  ;;  %vm2854_vm9 = vmpackc.low %vm1490_vm8, %vm1486_vm7 }
 0x3a9   :  { %v4307_v46 = vsel %vm5573_vm10, %v3708_v25, 0.0  ;;  %vm1406_vm5 = vcmp.lt.s32.totalorder %v1404_v20, %v1405_v56  ;;  %vm1465_vm15 = vcmp.lt.s32.totalorder %v1464_v51, %v4183_v11  ;;  %v4314_v3 = vsel %vm5576_vm14, %v3704_v29, 0.0 }
 0x3aa   :  { %v4320_v53 = vsel %vm5574_vm12, %v3708_v25, 0.0  ;;  %v4322_v50 = vsel %vm1406_vm5, %v1404_v20, %v1405_v56  ;;  %v1466_v63 = vsel %vm1465_vm15, %v1464_v51, %v4183_v11  ;;  %v4329_v42 = vsel %vm1506_vm4, %v3704_v29, 0.0 }
 0x3ab   :  { %vm1526_vm1 = vcmp.eq.s32.totalorder %v3740_v57, %v4131_v35  ;;  %vm1467_vm11 = vcmp.lt.s32.totalorder %v1466_v63, %v4189_v12  ;;  %vm1487_vm10 = vcmp.eq.s32.totalorder %v3685_v9, %v4322_v50  ;;  %vm1491_vm5 = vcmp.eq.s32.totalorder %v3713_v62, %v4322_v50 }
 0x3ac   :  { %vm1495_vm15 = vcmp.eq.s32.totalorder %v3716_v4, %v4322_v50  ;;  %v1468_v18 = vsel %vm1467_vm11, %v1466_v63, %v4189_v12  ;;  %v1572_v47 = vsel %vm1487_vm10, %v3706_v58, 0.0  ;;  %v1576_v11 = vsel %vm1491_vm5, %v3706_v58, 0.0  ;;  %vm2851_vm12 = vmpackc.low %vm1491_vm5, %vm1487_vm10 }
 0x3ad   :  { %vm1499_vm3 = vcmp.eq.s32.totalorder %v3719_v17, %v4322_v50  ;;  %vm1469_vm14 = vcmp.lt.s32.totalorder %v1468_v18, %v4197_v38  ;;  %2852 = vmatprep.subr.msk.bf16.mxu0 %vm2851_vm12, %v3799_v19  ;;  %v1908_v12 = vadd.f32 %v1576_v11, %v1575_v44  ;;  %v1593_v33 = vsel %vm5578_vm6, %v3708_v25, 0.0 }
 0x3ae   :  { %v1611_v23 = vsel %vm1526_vm1, %v3704_v29, 0.0  ;;  %v1470_v55 = vsel %vm1469_vm14, %v1468_v18, %v4197_v38  ;;  %2855 = vmatpush1.bf16.msk.msra.mxu0 %vm2854_vm9, %v5696_v28  ;;  %v1580_v41 = vsel %vm1495_vm15, %v3706_v58, 0.0  ;;  %vm2857_vm7 = vmpackc.low %vm1499_vm3, %vm1495_vm15  ;;  %vm1503_vm8 = vcmp.eq.s32.totalorder %v3722_v37, %v4322_v50 }
 0x3af   :  { %v1903_v59 = vadd.f32 %v1572_v47, %v1571_v5  ;;  %vm1514_vm14 = vcmp.eq.s32.totalorder %v3731_v26, %v4131_v35  ;;  %vm1471_vm10 = vcmp.lt.s32.totalorder %v1470_v55, %v4203_v27  ;;  %2858 = vmatprep.subr.msk.bf16.mxu0 %vm2857_vm7, %v3799_v19  ;;  %v4380_v38 = vadd.f32 %v1908_v12, %v4241_v60  ;;  %vm2860_vm15 = vmpackc.low %vm1498_vm2, %vm1494_vm13 }
 0x3b0   :  { %vm1507_vm12 = vcmp.eq.s32.totalorder %v3725_v6, %v4322_v50  ;;  %v1588_v54 = vsel %vm1503_vm8, %v3706_v58, 0.0  ;;  %v1472_v7 = vsel %vm1471_vm10, %v1470_v55, %v4203_v27  ;;  %vm1511_vm9 = vcmp.eq.s32.totalorder %v3728_v0, %v4322_v50 }
 0x3b1   :  { %v4389_v44 = vadd.f32 %v1903_v59, %v1573_v49  ;;  %v1923_v15 = vadd.f32 %v1588_v54, %v1587_v16  ;;  %vm5580_vm11 = vcmp.eq.s32.totalorder %v3731_v26, %v4191_v31  ;;  %vm1473_vm5 = vcmp.lt.s32.totalorder %v1472_v7, %v4209_v36  ;;  %vm2863_vm13 = vmpackc.low %vm1507_vm12, %vm1503_vm8 }
 0x3b2   :  { %v1584_v60 = vsel %vm1499_vm3, %v3706_v58, 0.0  ;;  %v1596_v27 = vsel %vm1511_vm9, %v3706_v58, 0.0  ;;  %v1913_v1 = vadd.f32 %v1580_v41, %v1579_v10  ;;  %vm1522_vm7 = vcmp.eq.s32.totalorder %v3737_v43, %v4131_v35  ;;  %2861 = vmatpush1.bf16.msk.msra.mxu0 %vm2860_vm15, %v5696_v28 }
 0x3b3   :  { %v1474_v5 = vsel %vm1473_vm5, %v1472_v7, %v4209_v36  ;;  %v1592_v49 = vsel %vm1507_vm12, %v3706_v58, 0.0  ;;  %v4425_v40 = vadd.f32 %v1923_v15, %v4267_v39  ;;  %v1933_v45 = vadd.f32 %v1596_v27, %v1595_v21  ;;  %2864 = vmatprep.subr.msk.bf16.mxu0 %vm2863_vm13, %v3799_v19 }
 0x3b4   :  { %vm5581_vm2 = vcmp.eq.s32.totalorder %v3743_v48, %v4131_v35  ;;  %vm1475_vm3 = vcmp.lt.s32.totalorder %v1474_v5, %v4215_v13  ;;  %vm1515_vm10 = vcmp.eq.s32.totalorder %v3731_v26, %v4322_v50  ;;  %v4433_v36 = vadd.f32 %v1913_v1, %v1581_v30 }
 0x3b5   :  { %vm1519_vm5 = vcmp.eq.s32.totalorder %v3734_v61, %v4322_v50  ;;  %v1476_v16 = vsel %vm1475_vm3, %v1474_v5, %v4215_v13  ;;  %v4439_v39 = vadd.f32 %v1933_v45, %v4295_v52  ;;  %vm1523_vm8 = vcmp.eq.s32.totalorder %v3737_v43, %v4322_v50  ;;  %v4858_v45 = vld [vmem:[%s5484_s4] sm:$0xff] }
 0x3b6   :  { %v1604_v10 = vsel %vm1519_vm5, %v3706_v58, 0.0  ;;  %v1477_v20 = vrot.slane %v1476_v16, 4  ;;  %vm5697_vm12 = vcmp.eq.s32.totalorder %v3722_v37, %v4131_v35  ;;  %v1918_v13 = vadd.f32 %v1584_v60, %v4301_v8 }
 0x3b7   :  { %vm2866_vm15 = vmpackc.low %vm1506_vm4, %vm5697_vm12  ;;  %v1943_v22 = vadd.f32 %v1604_v10, %v4314_v3  ;;  %vm1527_vm3 = vcmp.eq.s32.totalorder %v3740_v57, %v4322_v50  ;;  %v1600_v56 = vsel %vm1515_vm10, %v3706_v58, 0.0  ;;  %v1928_v21 = vadd.f32 %v1592_v49, %v4329_v42 }
 0x3b8   :  { %2867 = vmatpush1.bf16.msk.msra.mxu0 %vm2866_vm15, %v5696_v28  ;;  %vm2869_vm4 = vmpackc.low %vm1515_vm10, %vm1511_vm9  ;;  %v1612_v30 = vsel %vm1527_vm3, %v3706_v58, 0.0  ;;  %vm5579_vm12 = vcmp.eq.s32.totalorder %v3740_v57, %v4191_v31  ;;  %vm1478_vm15 = vcmp.lt.s32.totalorder %v1476_v16, %v1477_v20  ;;  %v1608_v51 = vsel %vm1523_vm8, %v3706_v58, 0.0 }
 0x3b9   :  { %2870 = vmatprep.subr.msk.bf16.mxu0 %vm2869_vm4, %v3799_v19  ;;  %v4483_v52 = vadd.f32 %v1918_v13, %v4307_v46  ;;  %v4486_v8 = vadd.f32 %v1943_v22, %v4320_v53  ;;  %v1479_v3 = vsel %vm1478_vm15, %v1476_v16, %v1477_v20  ;;  %v4488_v63 = vadd.f32 %v1928_v21, %v1593_v33  ;;  %vm2875_vm15 = vmpackc.low %vm1523_vm8, %vm1519_vm5 }
 0x3ba   :  { %v1953_v42 = vadd.f32 %v1612_v30, %v1611_v23  ;;  %vm1535_vm9 = vcmp.eq.s32.totalorder %v3746_v2, %v4322_v50  ;;  %v1480_v18 = vrot.slane %v1479_v3, 2  ;;  %vm5698_vm10 = vcmp.eq.s32.totalorder %v3728_v0, %v4131_v35 }
 0x3bb   :  { %vm2872_vm4 = vmpackc.low %vm1514_vm14, %vm5698_vm10  ;;  %vm1531_vm6 = vcmp.eq.s32.totalorder %v3743_v48, %v4322_v50  ;;  %v1613_v46 = vsel %vm5579_vm12, %v3708_v25, 0.0  ;;  %v1599_v53 = vsel %vm1514_vm14, %v3704_v29, 0.0  ;;  %vm1539_vm10 = vcmp.eq.s32.totalorder %v3749_v32, %v4322_v50 }
 0x3bc   :  { %2873 = vmatpush1.bf16.msk.msra.mxu0 %vm2872_vm4, %v5696_v28  ;;  %v4515_v47 = vadd.f32 %v1953_v42, %v1613_v46  ;;  %v1620_v11 = vsel %vm1535_vm9, %v3706_v58, 0.0  ;;  %v1938_v12 = vadd.f32 %v1600_v56, %v1599_v53  ;;  %vm1481_vm14 = vcmp.lt.s32.totalorder %v1479_v3, %v1480_v18 }
 0x3bd   :  { %vm5699_vm4 = vcmp.eq.s32.totalorder %v3685_v9, %v4191_v31  ;;  %vm5700_vm12 = vcmp.eq.s32.totalorder %v3713_v62, %v4191_v31  ;;  %2876 = vmatprep.subr.msk.bf16.mxu0 %vm2875_vm15, %v3799_v19  ;;  %v1601_v23 = vsel %vm5580_vm11, %v3708_v25, 0.0  ;;  %vm1534_vm5 = vcmp.eq.s32.totalorder %v3746_v2, %v4131_v35  ;;  %vm4566_vm15 = vmpackc.low %vm5581_vm2, %vm1526_vm1 }
 0x3be   :  { %vm4529_vm13 = vmpackc.low %vm5700_vm12, %vm5699_vm4  ;;  %vm5582_vm8 = vcmp.eq.s32.totalorder %v3746_v2, %v4191_v31  ;;  %v1482_v55 = vsel %vm1481_vm14, %v1479_v3, %v1480_v18  ;;  %vm5703_vm12 = vcmp.eq.s32.totalorder %v3734_v61, %v4131_v35  ;;  %v4552_v41 = vsel %vm1531_vm6, %v3706_v58, 0.0  ;;  %v5720_v18 = vld [vmem:[#allocation39_spill] sm:$0xff] }
 0x3bf   :  { %vm2878_vm4 = vmpackc.low %vm1522_vm7, %vm5703_vm12  ;;  %v4554_v59 = vadd.f32 %v1938_v12, %v1601_v23  ;;  %v1619_v54 = vsel %vm1534_vm5, %v3704_v29, 0.0  ;;  %v1483_v7 = vrot.slane %v1482_v55, 1  ;;  %vm5583_vm14 = vcmp.eq.s32.totalorder %v3749_v32, %v4131_v35 }
 0x3c0   :  { %v1963_v60 = vadd.f32 %v1620_v11, %v1619_v54  ;;  %vm1543_vm12 = vcmp.eq.s32.totalorder %v3752_v24, %v4322_v50  ;;  %2879 = vmatpush1.bf16.msk.msra.mxu0 %vm2878_vm4, %v5696_v28  ;;  %vm2881_vm11 = vmpackc.low %vm1531_vm6, %vm1527_vm3  ;;  %v4585_v27 = vsel %vm1539_vm10, %v3706_v58, 0.0  ;;  %v1621_v1 = vsel %vm5582_vm8, %v3708_v25, 0.0 }
 0x3c1   :  { %vm5584_vm1 = vcmp.eq.s32.totalorder %v3793_v34, %v4322_v50  ;;  %v1607_v5 = vsel %vm1522_vm7, %v3704_v29, 0.0  ;;  %vm1484_vm6 = vcmp.lt.s32.totalorder %v1482_v55, %v1483_v7  ;;  %vm5706_vm3 = vcmp.eq.s32.totalorder %v3716_v4, %v4191_v31  ;;  %2882 = vmatprep.subr.msk.bf16.mxu0 %vm2881_vm11, %v3799_v19  ;;  %vm4614_vm7 = vmpackc.low %vm1539_vm10, %vm1535_vm9 }
 0x3c2   :  { %vm5707_vm4 = vcmp.eq.s32.totalorder %v3719_v17, %v4191_v31  ;;  %v4618_v16 = vadd.f32 %v1963_v60, %v1621_v1  ;;  %v4624_v10 = vsel %vm1543_vm12, %v3706_v58, 0.0  ;;  %v4626_v20 = vadd.f32 %v1608_v51, %v1607_v5  ;;  %vm4636_vm11 = vmpackc.low %vm5583_vm14, %vm1534_vm5  ;;  %v5718_v51 = vld [vmem:[#allocation37_spill] sm:$0xff] }
 0x3c3   :  { %vm4603_vm2 = vmpackc.low %vm5707_vm4, %vm5706_vm3  ;;  %v4628_v13 = vsel %vm1484_vm6, %v1482_v55, %v1483_v7  ;;  %vm5714_vm9 = vcmp.eq.s32.totalorder %v3737_v43, %v4191_v31 }
 0x3c4   :  { %v4644_v56 = vsel %vm5714_vm9, %v3708_v25, 0.0  ;;  %vm1489_vm3 = vcmp.eq.s32.totalorder %v3685_v9, %v4628_v13  ;;  %vm1493_vm5 = vcmp.eq.s32.totalorder %v3713_v62, %v4628_v13  ;;  %vm1497_vm4 = vcmp.eq.s32.totalorder %v3716_v4, %v4628_v13  ;;  %vm4664_vm9 = vmpackc.low %vm5584_vm1, %vm1543_vm12  ;;  %v5717_v62 = vld [vmem:[#allocation36_spill] sm:$0xff]  ;;  %2885 = vmatpush1.bf16.msk.msra.mxu0 %vm4566_vm15, %v5696_v28 }
 0x3c5   :  { %vm2899_vm6 = vmpackc.low %vm1493_vm5, %vm1489_vm3  ;;  %vm1505_vm10 = vcmp.eq.s32.totalorder %v3722_v37, %v4628_v13  ;;  %vm1509_vm8 = vcmp.eq.s32.totalorder %v3725_v6, %v4628_v13  ;;  %v1578_v9 = vsel %vm1493_vm5, %v5717_v62, 0.0  ;;  %v1574_v21 = vsel %vm1489_vm3, %v5717_v62, 0.0  ;;  %2888 = vmatprep.subr.msk.bf16.mxu0 %vm4614_vm7, %v3799_v19 }
 0x3c6   :  { %2900 = vmatprep.subr.msk.bf16.mxu1 %vm2899_vm6, %v5718_v51  ;;  %vm5719_vm14 = vcmp.eq.s32.totalorder %v3719_v17, %v4628_v13  ;;  %v1910_v3 = vadd.f32 %v4380_v38, %v1578_v9  ;;  %v1905_v42 = vadd.f32 %v4389_v44, %v1574_v21  ;;  %vm1513_vm3 = vcmp.eq.s32.totalorder %v3728_v0, %v4628_v13  ;;  %vm4700_vm6 = vmpackc.low %vm1509_vm8, %vm1505_vm10 }
 0x3c7   :  { %vm2905_vm1 = vmpackc.low %vm5719_vm14, %vm1497_vm4  ;;  %vm1517_vm15 = vcmp.eq.s32.totalorder %v3731_v26, %v4628_v13  ;;  %2903 = vmatpush1.bf16.msk.msra.mxu1 %vm4529_vm13, %v5720_v18  ;;  %v1590_v38 = vsel %vm1505_vm10, %v5717_v62, 0.0  ;;  %v1582_v44 = vsel %vm1497_vm4, %v5717_v62, 0.0  ;;  %vm1521_vm14 = vcmp.eq.s32.totalorder %v3734_v61, %v4628_v13 }
 0x3c8   :  { %vm1525_vm13 = vcmp.eq.s32.totalorder %v3737_v43, %v4628_v13  ;;  %2906 = vmatprep.subr.msk.bf16.mxu1 %vm2905_vm1, %v5718_v51  ;;  %1911 = vadd.xlane.f32.xlu1 %v1910_v3  ;;  %vm4720_vm10 = vmpackc.low %vm1517_vm15, %vm1513_vm3  ;;  %v1925_v4 = vadd.f32 %v4425_v40, %v1590_v38  ;;  %v1915_v11 = vadd.f32 %v4433_v36, %v1582_v44  ;;  %v1598_v12 = vsel %vm1513_vm3, %v5717_v62, 0.0 }
 0x3c9   :  { %vm5725_vm7 = vcmp.eq.s32.totalorder %v3719_v17, %v4628_v13  ;;  %1906 = vadd.xlane.f32.xlu0 %v1905_v42  ;;  %vm4737_vm1 = vmpackc.low %vm1525_vm13, %vm1521_vm14  ;;  %v1935_v40 = vadd.f32 %v4439_v39, %v1598_v12  ;;  %vm1529_vm5 = vcmp.eq.s32.totalorder %v3740_v57, %v4628_v13  ;;  %vm1533_vm4 = vcmp.eq.s32.totalorder %v3743_v48, %v4628_v13 }
 0x3ca   :  { %v1586_v33 = vsel %vm5725_vm7, %v5717_v62, 0.0  ;;  %vm4750_vm3 = vmpackc.low %vm1533_vm4, %vm1529_vm5  ;;  %v1606_v39 = vsel %vm1521_vm14, %v5717_v62, 0.0  ;;  %vm1537_vm7 = vcmp.eq.s32.totalorder %v3746_v2, %v4628_v13  ;;  %vm5585_vm12 = vcmp.eq.s32.totalorder %v3749_v32, %v4628_v13  ;;  %2891 = vmatpush1.bf16.msk.msra.mxu0 %vm4636_vm11, %v5696_v28 }
 0x3cb   :  { %v1920_v36 = vadd.f32 %v4483_v52, %v1586_v33  ;;  %v1594_v52 = vsel %vm1509_vm8, %v5717_v62, 0.0  ;;  %2909 = vmatpush1.bf16.msk.msra.mxu1 %vm4603_vm2, %v5720_v18  ;;  %v1945_v55 = vadd.f32 %v4486_v8, %v1606_v39  ;;  %vm4780_vm8 = vmpackc.low %vm5585_vm12, %vm1537_vm7  ;;  %v1614_v15 = vsel %vm1529_vm5, %v5717_v62, 0.0  ;;  %2894 = vmatprep.subr.msk.bf16.mxu0 %vm4664_vm9, %v3799_v19 }
 0x3cc   :  { %v1930_v54 = vadd.f32 %v4488_v63, %v1594_v52  ;;  %v1602_v60 = vsel %vm1517_vm15, %v5717_v62, 0.0  ;;  %2912 = vmatprep.subr.msk.bf16.mxu1 %vm4700_vm6, %v5718_v51  ;;  %vm5732_vm2 = vcmp.eq.s32.totalorder %v3722_v37, %v4191_v31  ;;  %vm5733_vm11 = vcmp.eq.s32.totalorder %v3725_v6, %v4191_v31  ;;  %1926 = vadd.xlane.f32.xlu1 %v1925_v4 }
 0x3cd   :  { %vm4801_vm14 = vmpackc.low %vm5733_vm11, %vm5732_vm2  ;;  %v4806_v63 = vadd.f32 %v4515_v47, %v1614_v15  ;;  %v1940_v19 = vadd.f32 %v4554_v59, %v1602_v60  ;;  %vm1545_vm9 = vcmp.eq.s32.totalorder %v3752_v24, %v4628_v13  ;;  %v1622_v37 = vsel %vm1537_vm7, %v5717_v62, 0.0  ;;  %1916 = vadd.xlane.f32.xlu0 %v1915_v11 }
 0x3ce   :  { %vm1540_vm15 = vcmp.eq.s32.totalorder %v3749_v32, %v4191_v31  ;;  %vm1549_vm6 = vcmp.eq.s32.totalorder %v3793_v34, %v4628_v13  ;;  %v4820_v6 = vadd.f32 %v4618_v16, %v1622_v37  ;;  %v1949_v47 = vadd.f32 %v4626_v20, %v4644_v56 }
 0x3cf   :  { %vm5736_vm5 = vcmp.eq.s32.totalorder %v3752_v24, %v4131_v35  ;;  %vm5737_vm2 = vcmp.eq.s32.totalorder %v3793_v34, %v4131_v35  ;;  %vm4836_vm11 = vmpackc.low %vm1549_vm6, %vm1545_vm9  ;;  %vm5740_vm12 = vcmp.eq.s32.totalorder %v3793_v34, %v4322_v50  ;;  %v1610_v5 = vsel %vm1525_vm13, %v5717_v62, 0.0  ;;  %2915 = vmatpush1.bf16.msk.msra.mxu1 %vm4801_vm14, %v5720_v18 }
 0x3d0   :  { %vm2896_vm7 = vmpackc.low %vm5737_vm2, %vm5736_vm5  ;;  %v1632_v1 = vsel %vm5740_vm12, %v3706_v58, 0.0  ;;  %vm1548_vm5 = vcmp.eq.s32.totalorder %v3793_v34, %v4191_v31  ;;  %vm5741_vm2 = vcmp.eq.s32.totalorder %v3752_v24, %v4131_v35  ;;  %v1950_v16 = vadd.f32 %v1949_v47, %v1610_v5  ;;  %2918 = vmatprep.subr.msk.bf16.mxu1 %vm4720_vm10, %v5718_v51  ;;  %1936 = vadd.xlane.f32.xlu1 %v1935_v40  ;;  %v2980_v47 = vld [vmem:[%s5482_s9] sm:$0xff] }
 0x3d1   :  { %2897 = vmatpush1.bf16.msk.msra.mxu0 %vm2896_vm7, %v5696_v28  ;;  %v1627_v49 = vsel %vm5741_vm2, %v3704_v29, 0.0  ;;  %vm5742_vm12 = vcmp.eq.s32.totalorder %v3752_v24, %v4191_v31  ;;  %vm5743_vm13 = vcmp.eq.s32.totalorder %v3743_v48, %v4131_v35  ;;  %v1630_v56 = vsel %vm1545_vm9, %v5717_v62, 0.0  ;;  %1921 = vadd.xlane.f32.xlu0 %v1920_v36 }
 0x3d2   :  { %v1629_v28 = vsel %vm5742_vm12, %v3708_v25, 0.0  ;;  %v1973_v20 = vadd.f32 %v4624_v10, %v1627_v49  ;;  %v1615_v22 = vsel %vm5743_vm13, %v3704_v29, 0.0  ;;  %vm5744_vm14 = vcmp.eq.s32.totalorder %v3743_v48, %v4191_v31 }
 0x3d3   :  { %v1617_v10 = vsel %vm5744_vm14, %v3708_v25, 0.0  ;;  %v1958_v30 = vadd.f32 %v4552_v41, %v1615_v22  ;;  %vm5745_vm7 = vcmp.eq.s32.totalorder %v3749_v32, %v4131_v35  ;;  %v1618_v3 = vsel %vm1533_vm4, %v5717_v62, 0.0 }
 0x3d4   :  { %v1623_v9 = vsel %vm5745_vm7, %v3704_v29, 0.0  ;;  %v1974_v21 = vadd.f32 %v1973_v20, %v1629_v28  ;;  %1702 = vmatmul.mubr.f32.vlgmr.msra.gmra.mrb[44].mxu0 %v4858_v45  ;;  %vm5746_vm10 = vcmp.eq.s32.totalorder %v3793_v34, %v4131_v35  ;;  %vm5747_vm9 = vcmp.eq.s32.totalorder %v3728_v0, %v4191_v31  ;;  %1946 = vadd.xlane.f32.xlu1 %v1945_v55 }
 0x3d5   :  { %v1968_v42 = vadd.f32 %v4585_v27, %v1623_v9  ;;  %v1631_v41 = vsel %vm5746_vm10, %v3704_v29, 0.0  ;;  %vm5748_vm2 = vcmp.eq.s32.totalorder %v3731_v26, %v4191_v31  ;;  %v1959_v46 = vadd.f32 %v1958_v30, %v1617_v10  ;;  %v1636_v27 = vld [vmem:[%s5484_s4 + $0x8] sm:$0xff]  ;;  %1931 = vadd.xlane.f32.xlu0 %v1930_v54 }
 0x3d6   :  { %vm2920_vm12 = vmpackc.low %vm5748_vm2, %vm5747_vm9  ;;  %v1625_v38 = vsel %vm1540_vm15, %v3708_v25, 0.0  ;;  %v5749_v44 = vmov 0.0   ;;  %v1633_v0 = vsel %vm1548_vm5, %v3708_v25, 0.0  ;;  %v1978_v53 = vadd.f32 %v1632_v1, %v1631_v41  ;;  %v2981_v1 = vld [vmem:[%s5482_s9 + $0x8] sm:$0xff] }
 0x3d7   :  { %1707 = vmatprep.mubr.f32.mxu0 %v5749_v44  ;;  %2921 = vmatpush1.bf16.msk.msra.mxu1 %vm2920_vm12, %v5720_v18  ;;  %v1975_v26 = vadd.f32 %v1974_v21, %v1630_v56  ;;  %v1969_v4 = vadd.f32 %v1968_v42, %v1625_v38  ;;  %v1799_v11 = vcombine.low %v4131_v35, %v4322_v50  ;;  %v1634_v35 = vsel %vm1549_vm6, %v5717_v62, 0.0  ;;  %v2983_v10 = vld [vmem:[%s5482_s9 + $0x28] sm:$0xff] }
 0x3d8   :  { %v1800_v12 = vcombine.low %v4191_v31, %v4628_v13  ;;  %2924 = vmatprep.subr.msk.bf16.mxu1 %vm4737_vm1, %v5718_v51  ;;  %v1960_v33 = vadd.f32 %v1959_v46, %v1618_v3  ;;  %vm5750_vm4 = vcmp.eq.s32.totalorder %v3749_v32, %v4628_v13  ;;  %v1979_v36 = vadd.f32 %v1978_v53, %v1633_v0 }
 0x3d9   :  { %v1626_v40 = vsel %vm5750_vm4, %v5717_v62, 0.0  ;;  %1708 = vmatmul.mubr.f32.gmra.mrb[46].mxu0 %v1636_v27  ;;  %v1807_v50 = vrot.slane %v1799_v11, %v4109_v14  ;;  %vm5751_vm1 = vcmp.eq.s32.totalorder %v3734_v61, %v4191_v31  ;;  %vm5752_vm13 = vcmp.eq.s32.totalorder %v3737_v43, %v4191_v31  ;;  %1956 = vadd.xlane.f32.xlu1 %v4806_v63  ;;  %v5755_v43 = vld [vmem:[#allocation3_spill] sm:$0xff] }
 0x3da   :  { %v1970_v39 = vadd.f32 %v1969_v4, %v1626_v40  ;;  %v1814_v23 = vrot.slane %v1800_v12, %v4109_v14  ;;  %vm2926_vm14 = vmpackc.low %vm5752_vm13, %vm5751_vm1  ;;  %v1980_v52 = vadd.f32 %v1979_v36, %v1634_v35  ;;  %2180 = vmatprep.mubr.f32.mxu0 %v5749_v44  ;;  %1941 = vadd.xlane.f32.xlu0 %v1940_v19  ;;  %vm5756_vm9 = vcmp.gt.f32.partialorder %v5755_v43, 0.0 }
 0x3db   :  { %2927 = vmatpush1.bf16.msk.msra.mxu1 %vm2926_vm14, %v5720_v18  ;;  %vm5753_vm6 = vcmp.eq.s32.totalorder %v3740_v57, %v4191_v31  ;;  %vm5754_vm7 = vcmp.eq.s32.totalorder %v3743_v48, %v4191_v31 }
 0x3dc   :  { %v1815_v55 = vcombine.low %v1807_v50, %v1814_v23  ;;  %2930 = vmatprep.subr.msk.bf16.mxu1 %vm4750_vm3, %v5718_v51  ;;  %vm2932_vm10 = vmpackc.low %vm5754_vm7, %vm5753_vm6  ;;  %vm5758_vm3 = vcmp.eq.s32.totalorder %v3746_v2, %v4191_v31 }
 0x3dd   :  { %1966 = vadd.xlane.f32.xlu1 %v4820_v6  ;;  %vm2938_vm2 = vmpackc.low %vm1540_vm15, %vm5758_vm3  ;;  %vm1983_vm15 = vcmask 7168  }
 0x3de   :  { %v1822_v13 = vrot.slane %v1815_v55, %v4109_v14  ;;  %1951 = vadd.xlane.f32.xlu0 %v1950_v16  ;;  %v2982_v16 = vld [vmem:[%s5482_s9 + $0x20] sm:$0xff] }
 0x3df   :  { %2933 = vmatpush1.bf16.msk.msra.mxu1 %vm2932_vm10, %v5720_v18 }
 0x3e0   :  { %v1823_v61 = vsel %vm5756_vm9, %v1822_v13, 4294967295  ;;  %2936 = vmatprep.subr.msk.bf16.mxu1 %vm4780_vm8, %v5718_v51  ;;  %vm5759_vm8 = vcmp.eq.s32.totalorder %v3752_v24, %v4191_v31 }
 0x3e1   :  { %1824 = vst.msk [vmem:[%s5485_s12] sm:$0xf] %vm3103_vm0, %v1823_v61  ;;  %1976 = vadd.xlane.f32.xlu1 %v1975_v26  ;;  %vm2944_vm12 = vmpackc.low %vm1548_vm5, %vm5759_vm8 }
 0x3e2   :  { %1961 = vadd.xlane.f32.xlu0 %v1960_v33 }
 0x3e3   :  { %2939 = vmatpush1.bf16.msk.msra.mxu1 %vm2938_vm2, %v5720_v18 }
 0x3e4   :  { %2942 = vmatprep.subr.msk.bf16.mxu1 %vm4836_vm11, %v5718_v51  ;;  %vm5760_vm11 = vcmask 130048  }
 0x3e5   :  { %vm5761_vm5 = vmmov %vm5760_vm11 }
 0x3e6   :  { %1971 = vadd.xlane.f32.xlu0 %v1970_v39  ;;  %vm5762_vm4 = vmmov %vm5761_vm5 }
 0x3e7   :  { %2945 = vmatpush1.bf16.msk.msra.mxu1 %vm2944_vm12, %v5720_v18  ;;  %vm5763_vm1 = vmmov %vm5762_vm4 }
 0x3e8   :  { %vm5764_vm13 = vmmov %vm5763_vm1 }
 0x3ea   :  { %1779 = vmatmul.mubr.f32.vlgmr.msra.gmra.mrb[44].mxu1 %v4858_v45  ;;  %1981 = vadd.xlane.f32.xlu0 %v1980_v52 }
 0x3eb   :  { %1784 = vmatprep.mubr.f32.mxu1 %v5749_v44 }
 0x3ee   :  { %1785 = vmatmul.mubr.f32.gmra.mrb[46].mxu1 %v1636_v27 }
 0x3ef   :  { %2341 = vmatprep.mubr.f32.mxu1 %v5749_v44 }
 0x455   :  { %v1912_v57 = vpop.xlane.xlu1 %1911 }
 0x456   :  { %1985 = vst.msk [vmem:[%s5486_s14 + $0x8] sm:$0xff] %vm1983_vm15, %v1912_v57  ;;  %v1907_v48 = vpop.xlane.xlu0 %1906 }
 0x457   :  { %1984 = vst.msk [vmem:[%s5486_s14] sm:$0xff] %vm1983_vm15, %v1907_v48 }
 0x459   :  { %v1927_v2 = vpop.xlane.xlu1 %1926 }
 0x45a   :  { %1988 = vst.msk [vmem:[%s5486_s14 + $0x20] sm:$0xff] %vm1983_vm15, %v1927_v2  ;;  %v1917_v32 = vpop.xlane.xlu0 %1916 }
 0x45b   :  { %1986 = vst.msk [vmem:[%s5486_s14 + $0x10] sm:$0xff] %vm1983_vm15, %v1917_v32 }
 0x45d   :  { %v1937_v24 = vpop.xlane.xlu1 %1936 }
 0x45e   :  { %1990 = vst.msk [vmem:[%s5486_s14 + $0x30] sm:$0xff] %vm1983_vm15, %v1937_v24  ;;  %v1922_v34 = vpop.xlane.xlu0 %1921 }
 0x45f   :  { %1987 = vst.msk [vmem:[%s5486_s14 + $0x18] sm:$0xff] %vm1983_vm15, %v1922_v34 }
 0x461   :  { %v1947_v31 = vpop.xlane.xlu1 %1946 }
 0x462   :  { %1992 = vst.msk [vmem:[%s5486_s14 + $0x40] sm:$0xff] %vm1983_vm15, %v1947_v31  ;;  %v1932_v51 = vpop.xlane.xlu0 %1931 }
 0x463   :  { %1989 = vst.msk [vmem:[%s5486_s14 + $0x28] sm:$0xff] %vm1983_vm15, %v1932_v51 }
 0x466   :  { %v1957_v18 = vpop.xlane.xlu1 %1956 }
 0x467   :  { %1994 = vst.msk [vmem:[%s5486_s14 + $0x50] sm:$0xff] %vm1983_vm15, %v1957_v18  ;;  %v1942_v54 = vpop.xlane.xlu0 %1941 }
 0x468   :  { %1991 = vst.msk [vmem:[%s5486_s14 + $0x38] sm:$0xff] %vm1983_vm15, %v1942_v54 }
 0x46a   :  { %v1967_v7 = vpop.xlane.xlu1 %1966 }
 0x46b   :  { %1996 = vst.msk [vmem:[%s5486_s14 + $0x60] sm:$0xff] %vm1983_vm15, %v1967_v7  ;;  %v1952_v15 = vpop.xlane.xlu0 %1951 }
 0x46c   :  { %1993 = vst.msk [vmem:[%s5486_s14 + $0x48] sm:$0xff] %vm1983_vm15, %v1952_v15 }
 0x46e   :  { %v1977_v60 = vpop.xlane.xlu1 %1976 }
 0x46f   :  { %1998 = vst.msk [vmem:[%s5486_s14 + $0x70] sm:$0xff] %vm1983_vm15, %v1977_v60  ;;  %v1962_v8 = vpop.xlane.xlu0 %1961  ;;  %v2984_v60 = vld [vmem:[%s5482_s9 + $0x10] sm:$0xff] }
 0x470   :  { %1995 = vst.msk [vmem:[%s5486_s14 + $0x58] sm:$0xff] %vm1983_vm15, %v1962_v8 }
 0x473   :  { %v1972_v63 = vpop.xlane.xlu0 %1971 }
 0x474   :  { %1997 = vst.msk [vmem:[%s5486_s14 + $0x68] sm:$0xff] %vm1983_vm15, %v1972_v63 }
 0x477   :  { %v1982_v19 = vpop.xlane.xlu0 %1981 }
 0x478   :  { %1999 = vst.msk [vmem:[%s5486_s14 + $0x78] sm:$0xff] %vm1983_vm15, %v1982_v19 }
 0x4a7   :  { %v5049_v37 = vpop.f32.mrb[44].mxu0 }
 0x4a8   :  { %1791 = vst [vmem:[%s5487_s10] sm:$0xff] %v5049_v37  ;;  %v5055_v6 = vpop.f32.mrb[45].mxu0  ;;  %v1825_v59 = vsub.f32 %v5049_v37, %v2980_v47  ;;  %v2000_v45 = vmul.f32 %v5049_v37, %v5049_v37  ;;  %v2985_v47 = vld [vmem:[%s5482_s9 + $0x18] sm:$0xff] }
 0x4a9   :  { %1792 = vst [vmem:[%s5487_s10 + $0x8] sm:$0xff] %v5055_v6  ;;  %v1826_v5 = vsub.f32 %v5055_v6, %v2981_v1  ;;  %v2001_v56 = vmul.f32 %v5055_v6, %v5055_v6 }
 0x4aa   :  { %v1833_v21 = vmul.f32 %v1825_v59, %v1825_v59 }
 0x4ab   :  { %v1834_v41 = vmul.f32 %v1826_v5, %v1826_v5 }
 0x4ac   :  { %v5069_v49 = vpop.f32.mrb[46].mxu0 }
 0x4ad   :  { %1795 = vst [vmem:[%s5487_s10 + $0x20] sm:$0xff] %v5069_v49  ;;  %v1829_v28 = vsub.f32 %v5069_v49, %v2982_v16  ;;  %v2004_v20 = vmul.f32 %v5069_v49, %v5069_v49  ;;  %v5083_v22 = vpop.f32.mrb[47].mxu0 }
 0x4ae   :  { %1796 = vst [vmem:[%s5487_s10 + $0x28] sm:$0xff] %v5083_v22  ;;  %v1830_v30 = vsub.f32 %v5083_v22, %v2983_v10  ;;  %v2005_v9 = vmul.f32 %v5083_v22, %v5083_v22 }
 0x4af   :  { %v1837_v3 = vmul.f32 %v1829_v28, %v1829_v28  ;;  %v2008_v42 = vadd.f32 %v2004_v20, %v2000_v45  ;;  %v2987_v20 = vld [vmem:[%s5482_s9 + $0x38] sm:$0xff] }
 0x4b0   :  { %v1838_v46 = vmul.f32 %v1830_v30, %v1830_v30  ;;  %v2015_v38 = vadd.f32 %v2005_v9, %v2001_v56 }
 0x4b1   :  { %v1841_v27 = vadd.f32 %v1837_v3, %v1833_v21  ;;  %v2009_v0 = vrot.slane %v2008_v42, 4 }
 0x4b2   :  { %v1848_v53 = vadd.f32 %v1838_v46, %v1834_v41  ;;  %v2016_v26 = vrot.slane %v2015_v38, 4 }
 0x4b3   :  { %v1842_v4 = vrot.slane %v1841_v27, 4  ;;  %v2010_v11 = vadd.f32 %v2009_v0, %v2008_v42 }
 0x4b4   :  { %v1849_v12 = vrot.slane %v1848_v53, 4  ;;  %v2017_v33 = vadd.f32 %v2016_v26, %v2015_v38 }
 0x4b5   :  { %v1843_v40 = vadd.f32 %v1842_v4, %v1841_v27  ;;  %v2011_v36 = vrot.slane %v2010_v11, 2 }
 0x4b6   :  { %v1850_v39 = vadd.f32 %v1849_v12, %v1848_v53  ;;  %v2018_v35 = vrot.slane %v2017_v33, 2 }
 0x4b7   :  { %v1844_v50 = vrot.slane %v1843_v40, 2  ;;  %v2012_v23 = vadd.f32 %v2011_v36, %v2010_v11 }
 0x4b8   :  { %v1851_v52 = vrot.slane %v1850_v39, 2  ;;  %v2019_v55 = vadd.f32 %v2018_v35, %v2017_v33 }
 0x4b9   :  { %v1845_v13 = vadd.f32 %v1844_v50, %v1843_v40  ;;  %v2013_v43 = vrot.slane %v2012_v23, 1 }
 0x4ba   :  { %v1852_v61 = vadd.f32 %v1851_v52, %v1850_v39  ;;  %v2020_v57 = vrot.slane %v2019_v55, 1 }
 0x4bb   :  { %v1846_v48 = vrot.slane %v1845_v13, 1  ;;  %v2014_v2 = vadd.f32 %v2013_v43, %v2012_v23 }
 0x4bc   :  { %v1853_v32 = vrot.slane %v1852_v61, 1  ;;  %v2021_v24 = vadd.f32 %v2020_v57, %v2019_v55 }
 0x4bd   :  { %v5097_v34 = vpop.f32.mrb[44].mxu1  ;;  %v1847_v31 = vadd.f32 %v1846_v48, %v1845_v13  ;;  %v2036_v51 = vmax.f32 %v2014_v2, 1e-24 }
 0x4be   :  { %1793 = vst [vmem:[%s5487_s10 + $0x10] sm:$0xff] %v5097_v34  ;;  %v5103_v18 = vpop.f32.mrb[45].mxu1  ;;  %v1854_v54 = vadd.f32 %v1853_v32, %v1852_v61  ;;  %v2037_v7 = vmax.f32 %v2021_v24, 1e-24  ;;  %v1827_v8 = vsub.f32 %v5097_v34, %v2984_v60  ;;  %v2002_v63 = vmul.f32 %v5097_v34, %v5097_v34 }
 0x4bf   :  { %1794 = vst [vmem:[%s5487_s10 + $0x18] sm:$0xff] %v5103_v18  ;;  %v5110_v15 = vmul.f32 %v1847_v31, %v3704_v29  ;;  %2971 = vrsqrt.f32 %v2036_v51  ;;  %v1828_v29 = vsub.f32 %v5103_v18, %v2985_v47  ;;  %v2003_v59 = vmul.f32 %v5103_v18, %v5103_v18 }
 0x4c0   :  { %v5119_v19 = vmul.f32 %v1854_v54, %v3706_v58  ;;  %2973 = vrsqrt.f32 %v2037_v7  ;;  %v2986_v58 = vld [vmem:[%s5482_s9 + $0x30] sm:$0xff]  ;;  %v1835_v30 = vmul.f32 %v1827_v8, %v1827_v8 }
 0x4c1   :  { %v5127_v1 = vpop.f32.mrb[46].mxu1  ;;  %v1836_v3 = vmul.f32 %v1828_v29, %v1828_v29 }
 0x4c2   :  { %1797 = vst [vmem:[%s5487_s10 + $0x30] sm:$0xff] %v5127_v1  ;;  %v1831_v5 = vsub.f32 %v5127_v1, %v2986_v58  ;;  %v2006_v45 = vmul.f32 %v5127_v1, %v5127_v1  ;;  %v1877_v16 = vcombine.low %v5110_v15, %v5119_v19  ;;  %v5141_v28 = vpop.f32.mrb[47].mxu1  ;;  %v2053_v19 = vld [vmem:[%s5488_s5 + $0x8] sm:$0xff] }
 0x4c3   :  { %1798 = vst [vmem:[%s5487_s10 + $0x38] sm:$0xff] %v5141_v28  ;;  %v1832_v56 = vsub.f32 %v5141_v28, %v2987_v20  ;;  %v2007_v10 = vmul.f32 %v5141_v28, %v5141_v28 }
 0x4c4   :  { %v1839_v9 = vmul.f32 %v1831_v5, %v1831_v5  ;;  %v2022_v21 = vadd.f32 %v2006_v45, %v2002_v63  ;;  %v1885_v29 = vrot.slane %v1877_v16, %v4109_v14 }
 0x4c5   :  { %v1840_v42 = vmul.f32 %v1832_v56, %v1832_v56  ;;  %v2029_v41 = vadd.f32 %v2007_v10, %v2003_v59 }
 0x4c6   :  { %v1855_v46 = vadd.f32 %v1839_v9, %v1835_v30  ;;  %v2023_v38 = vrot.slane %v2022_v21, 4 }
 0x4c7   :  { %v1862_v27 = vadd.f32 %v1840_v42, %v1836_v3  ;;  %v2030_v0 = vrot.slane %v2029_v41, 4  ;;  %v2061_v3 = vld [vmem:[%s5488_s5 + $0x48] sm:$0xff]  ;;  %v2062_v42 = vld [vmem:[%s5488_s5 + $0x50] sm:$0xff] }
 0x4c8   :  { %v1856_v53 = vrot.slane %v1855_v46, 4  ;;  %v2024_v26 = vadd.f32 %v2023_v38, %v2022_v21  ;;  %v2060_v21 = vld [vmem:[%s5488_s5 + $0x40] sm:$0xff]  ;;  %v2065_v38 = vld [vmem:[%s5488_s5 + $0x68] sm:$0xff] }
 0x4c9   :  { %v2972_v4 = vpop.eup %2971  ;;  %v1863_v11 = vrot.slane %v1862_v27, 4  ;;  %v2031_v12 = vadd.f32 %v2030_v0, %v2029_v41  ;;  %v2063_v41 = vld [vmem:[%s5488_s5 + $0x58] sm:$0xff] }
 0x4ca   :  { %v2974_v33 = vpop.eup %2973  ;;  %v2048_v40 = vmul.f32 %v2972_v4, %v5069_v49  ;;  %v1857_v36 = vadd.f32 %v1856_v53, %v1855_v46  ;;  %v2025_v39 = vrot.slane %v2024_v26, 2  ;;  %v2044_v35 = vmul.f32 %v2972_v4, %v5049_v37  ;;  %v2052_v37 = vld [vmem:[%s5488_s5] sm:$0xff]  ;;  %v2067_v0 = vld [vmem:[%s5488_s5 + $0x78] sm:$0xff] }
 0x4cb   :  { %v2049_v50 = vmul.f32 %v2974_v33, %v5083_v22  ;;  %v1864_v23 = vadd.f32 %v1863_v11, %v1862_v27  ;;  %v2032_v52 = vrot.slane %v2031_v12, 2  ;;  %v2045_v55 = vmul.f32 %v2974_v33, %v5055_v6  ;;  %v2064_v46 = vld [vmem:[%s5488_s5 + $0x60] sm:$0xff]  ;;  %v2066_v27 = vld [vmem:[%s5488_s5 + $0x70] sm:$0xff] }
 0x4cc   :  { %v1858_v13 = vrot.slane %v1857_v36, 2  ;;  %v2026_v43 = vadd.f32 %v2025_v39, %v2024_v26  ;;  %v2948_v61 = vpack.c.bf16 %v2048_v40, %v2044_v35 }
 0x4cd   :  { %v1865_v57 = vrot.slane %v1864_v23, 2  ;;  %v2033_v48 = vadd.f32 %v2032_v52, %v2031_v12  ;;  %v2946_v2 = vpack.c.bf16 %v2049_v50, %v2045_v55 }
 0x4ce   :  { %v1859_v32 = vadd.f32 %v1858_v13, %v1857_v36  ;;  %v2027_v24 = vrot.slane %v2026_v43, 1 }
 0x4cf   :  { %v1866_v31 = vadd.f32 %v1865_v57, %v1864_v23  ;;  %v2034_v49 = vrot.slane %v2033_v48, 1  ;;  %2947 = vmatprep.subr.bf16.mxu0 %v2946_v2 }
 0x4d0   :  { %v1860_v51 = vrot.slane %v1859_v32, 1  ;;  %v2028_v54 = vadd.f32 %v2027_v24, %v2026_v43  ;;  %2949 = vmatpush1.bf16.msra.mxu0 %v2948_v61 }
 0x4d1   :  { %v1867_v22 = vrot.slane %v1866_v31, 1  ;;  %v2035_v6 = vadd.f32 %v2034_v49, %v2033_v48 }
 0x4d2   :  { %v1861_v7 = vadd.f32 %v1860_v51, %v1859_v32  ;;  %v2038_v15 = vmax.f32 %v2028_v54, 1e-24 }
 0x4d3   :  { %v1868_v60 = vadd.f32 %v1867_v22, %v1866_v31  ;;  %v2039_v8 = vmax.f32 %v2035_v6, 1e-24  ;;  %2786 = vmatmul.mubr.msk.f32.vlgmr.msra.gmra.mrb[48].mxu0 %vm5760_vm11, %v2052_v37 }
 0x4d4   :  { %v1871_v63 = vmul.f32 %v1861_v7, %v3708_v25  ;;  %2975 = vrsqrt.f32 %v2038_v15  ;;  %2186 = vmatprep.mubr.f32.mxu0 %v5749_v44  ;;  %v2054_v25 = vld [vmem:[%s5488_s5 + $0x10] sm:$0xff] }
 0x4d5   :  { %v1872_v47 = vmul.f32 %v1868_v60, %v5717_v62  ;;  %2977 = vrsqrt.f32 %v2039_v8  ;;  %v2055_v62 = vld [vmem:[%s5488_s5 + $0x18] sm:$0xff] }
 0x4d7   :  { %v1878_v59 = vcombine.low %v1871_v63, %v1872_v47  ;;  %2787 = vmatmul.mubr.msk.f32.gmra.mrb[50].mxu0 %vm5761_vm5, %v2053_v19 }
 0x4d8   :  { %2192 = vmatprep.mubr.f32.mxu0 %v5749_v44 }
 0x4d9   :  { %v1892_v58 = vrot.slane %v1878_v59, %v4109_v14 }
 0x4db   :  { %v1893_v5 = vcombine.low %v1885_v29, %v1892_v58  ;;  %2788 = vmatmul.mubr.msk.f32.gmra.mrb[52].mxu0 %vm5762_vm4, %v2054_v25 }
 0x4dc   :  { %2198 = vmatprep.mubr.f32.mxu0 %v5749_v44 }
 0x4dd   :  { %v1900_v45 = vrot.slane %v1893_v5, %v4109_v14  ;;  %v2056_v14 = vld [vmem:[%s5488_s5 + $0x20] sm:$0xff] }
 0x4de   :  { %v2976_v16 = vpop.eup %2975 }
 0x4df   :  { %v2978_v20 = vpop.eup %2977  ;;  %v2050_v56 = vmul.f32 %v2976_v16, %v5127_v1  ;;  %1902 = vst.msk [vmem:[%s5489_s13] sm:$0xf] %vm3103_vm0, %v1900_v45  ;;  %2789 = vmatmul.mubr.msk.f32.gmra.mrb[54].mxu0 %vm5763_vm1, %v2055_v62  ;;  %v2046_v10 = vmul.f32 %v2976_v16, %v5097_v34  ;;  %v2057_v34 = vld [vmem:[%s5488_s5 + $0x28] sm:$0xff]  ;;  %vm5765_vm0 = vmmov %vm5763_vm1 }
 0x4e0   :  { %v2051_v30 = vmul.f32 %v2978_v20, %v5141_v28  ;;  %2204 = vmatprep.mubr.f32.mxu0 %v5749_v44  ;;  %v2047_v1 = vmul.f32 %v2978_v20, %v5103_v18  ;;  %v2058_v18 = vld [vmem:[%s5488_s5 + $0x30] sm:$0xff]  ;;  %vm5766_vm14 = vmmov %vm5765_vm0  ;;  %v2059_v28 = vld [vmem:[%s5488_s5 + $0x38] sm:$0xff] }
 0x4e1   :  { %v2952_v9 = vpack.c.bf16 %v2050_v56, %v2046_v10  ;;  %vm5767_vm6 = vmmov %vm5765_vm0 }
 0x4e2   :  { %v2950_v17 = vpack.c.bf16 %v2051_v30, %v2047_v1  ;;  %vm5768_vm7 = vmmov %vm5765_vm0 }
 0x4e3   :  { %2790 = vmatmul.mubr.msk.f32.gmra.mrb[56].mxu0 %vm5764_vm13, %v2056_v14  ;;  %vm5769_vm10 = vmmov %vm5765_vm0 }
 0x4e4   :  { %2210 = vmatprep.mubr.f32.mxu0 %v5749_v44  ;;  %2951 = vmatprep.subr.bf16.mxu1 %v2950_v17  ;;  %vm5770_vm9 = vmmov %vm5765_vm0 }
 0x4e5   :  { %2953 = vmatpush1.bf16.msra.mxu1 %v2952_v9  ;;  %vm5771_vm3 = vmmov %vm5765_vm0 }
 0x4e6   :  { %vm5772_vm2 = vmmov %vm5765_vm0 }
 0x4e7   :  { %2791 = vmatmul.mubr.msk.f32.gmra.mrb[58].mxu0 %vm5765_vm0, %v2057_v34  ;;  %vm5773_vm8 = vmmov %vm5765_vm0 }
 0x4e8   :  { %2216 = vmatprep.mubr.f32.mxu0 %v5749_v44  ;;  %2802 = vmatmul.mubr.msk.f32.vlgmr.msra.gmra.mrb[48].mxu1 %vm5766_vm14, %v2052_v37  ;;  %vm5774_vm12 = vmmov %vm5765_vm0 }
 0x4e9   :  { %2347 = vmatprep.mubr.f32.mxu1 %v5749_v44  ;;  %vm5775_vm15 = vmmov %vm5765_vm0 }
 0x4ea   :  { %vm5776_vm11 = vmmov %vm5765_vm0 }
 0x4eb   :  { %2792 = vmatmul.mubr.msk.f32.gmra.mrb[60].mxu0 %vm5767_vm6, %v2058_v18  ;;  %vm5777_vm5 = vmmov %vm5765_vm0 }
 0x4ec   :  { %2222 = vmatprep.mubr.f32.mxu0 %v5749_v44  ;;  %2803 = vmatmul.mubr.msk.f32.gmra.mrb[50].mxu1 %vm5768_vm7, %v2053_v19  ;;  %vm5778_vm4 = vmmov %vm5765_vm0 }
 0x4ed   :  { %2353 = vmatprep.mubr.f32.mxu1 %v5749_v44  ;;  %vm5779_vm1 = vmmov %vm5765_vm0 }
 0x4ee   :  { %vm5780_vm13 = vmmov %vm5765_vm0 }
 0x4ef   :  { %2793 = vmatmul.mubr.msk.f32.gmra.mrb[62].mxu0 %vm5769_vm10, %v2059_v28  ;;  %vm5781_vm14 = vmmov %vm5765_vm0 }
 0x4f0   :  { %2228 = vmatprep.mubr.f32.mxu0 %v5749_v44  ;;  %2804 = vmatmul.mubr.msk.f32.gmra.mrb[52].mxu1 %vm5770_vm9, %v2054_v25  ;;  %vm5782_vm6 = vmmov %vm5765_vm0 }
 0x4f1   :  { %2359 = vmatprep.mubr.f32.mxu1 %v5749_v44  ;;  %vm5783_vm7 = vmmov %vm5765_vm0 }
 0x4f2   :  { %vm5784_vm10 = vmmov %vm5765_vm0 }
 0x4f3   :  { %2794 = vmatmul.mubr.msk.f32.gmra.mrb[64].mxu0 %vm5771_vm3, %v2060_v21  ;;  %vm5785_vm9 = vmmov %vm5765_vm0 }
 0x4f4   :  { %2234 = vmatprep.mubr.f32.mxu0 %v5749_v44  ;;  %2805 = vmatmul.mubr.msk.f32.gmra.mrb[54].mxu1 %vm5772_vm2, %v2055_v62  ;;  %vm5786_vm3 = vmmov %vm5765_vm0 }
 0x4f5   :  { %2365 = vmatprep.mubr.f32.mxu1 %v5749_v44  ;;  %vm5787_vm2 = vmmov %vm5765_vm0 }
 0x4f7   :  { %2795 = vmatmul.mubr.msk.f32.gmra.mrb[66].mxu0 %vm5773_vm8, %v2061_v3  ;;  %vm5788_vm8 = vmmov %vm5765_vm0 }
 0x4f8   :  { %2240 = vmatprep.mubr.f32.mxu0 %v5749_v44  ;;  %2806 = vmatmul.mubr.msk.f32.gmra.mrb[56].mxu1 %vm5774_vm12, %v2056_v14  ;;  %vm5789_vm12 = vmmov %vm5765_vm0 }
 0x4f9   :  { %2371 = vmatprep.mubr.f32.mxu1 %v5749_v44 }
 0x4fb   :  { %2796 = vmatmul.mubr.msk.f32.gmra.mrb[68].mxu0 %vm5775_vm15, %v2062_v42  ;;  %vm5790_vm15 = vmmov %vm5765_vm0 }
 0x4fc   :  { %2246 = vmatprep.mubr.f32.mxu0 %v5749_v44  ;;  %2807 = vmatmul.mubr.msk.f32.gmra.mrb[58].mxu1 %vm5776_vm11, %v2057_v34 }
 0x4fd   :  { %2377 = vmatprep.mubr.f32.mxu1 %v5749_v44 }
 0x4ff   :  { %2797 = vmatmul.mubr.msk.f32.gmra.mrb[70].mxu0 %vm5777_vm5, %v2063_v41 }
 0x500   :  { %2252 = vmatprep.mubr.f32.mxu0 %v5749_v44  ;;  %2808 = vmatmul.mubr.msk.f32.gmra.mrb[60].mxu1 %vm5778_vm4, %v2058_v18 }
 0x501   :  { %2383 = vmatprep.mubr.f32.mxu1 %v5749_v44 }
 0x503   :  { %2798 = vmatmul.mubr.msk.f32.gmra.mrb[72].mxu0 %vm5779_vm1, %v2064_v46 }
 0x504   :  { %2258 = vmatprep.mubr.f32.mxu0 %v5749_v44  ;;  %2809 = vmatmul.mubr.msk.f32.gmra.mrb[62].mxu1 %vm5780_vm13, %v2059_v28 }
 0x505   :  { %2389 = vmatprep.mubr.f32.mxu1 %v5749_v44 }
 0x507   :  { %2799 = vmatmul.mubr.msk.f32.gmra.mrb[74].mxu0 %vm5765_vm0, %v2065_v38 }
 0x508   :  { %2264 = vmatprep.mubr.f32.mxu0 %v5749_v44  ;;  %2810 = vmatmul.mubr.msk.f32.gmra.mrb[64].mxu1 %vm5781_vm14, %v2060_v21 }
 0x509   :  { %2395 = vmatprep.mubr.f32.mxu1 %v5749_v44 }
 0x50b   :  { %2800 = vmatmul.mubr.msk.f32.gmra.mrb[76].mxu0 %vm5782_vm6, %v2066_v27 }
 0x50c   :  { %2270 = vmatprep.mubr.f32.mxu0 %v5749_v44  ;;  %2811 = vmatmul.mubr.msk.f32.gmra.mrb[66].mxu1 %vm5783_vm7, %v2061_v3 }
 0x50d   :  { %2401 = vmatprep.mubr.f32.mxu1 %v5749_v44 }
 0x50f   :  { %2801 = vmatmul.mubr.msk.f32.gmra.mrb[78].mxu0 %vm5784_vm10, %v2067_v0 }
 0x510   :  { %2812 = vmatmul.mubr.msk.f32.gmra.mrb[68].mxu1 %vm5785_vm9, %v2062_v42 }
 0x511   :  { %2407 = vmatprep.mubr.f32.mxu1 %v5749_v44 }
 0x514   :  { %2813 = vmatmul.mubr.msk.f32.gmra.mrb[70].mxu1 %vm5786_vm3, %v2063_v41 }
 0x515   :  { %2413 = vmatprep.mubr.f32.mxu1 %v5749_v44 }
 0x518   :  { %2814 = vmatmul.mubr.msk.f32.gmra.mrb[72].mxu1 %vm5787_vm2, %v2064_v46 }
 0x519   :  { %2419 = vmatprep.mubr.f32.mxu1 %v5749_v44 }
 0x51c   :  { %2815 = vmatmul.mubr.msk.f32.gmra.mrb[74].mxu1 %vm5788_vm8, %v2065_v38 }
 0x51d   :  { %2425 = vmatprep.mubr.f32.mxu1 %v5749_v44 }
 0x520   :  { %2816 = vmatmul.mubr.msk.f32.gmra.mrb[76].mxu1 %vm5789_vm12, %v2066_v27 }
 0x521   :  { %2431 = vmatprep.mubr.f32.mxu1 %v5749_v44 }
 0x524   :  { %2817 = vmatmul.mubr.msk.f32.gmra.mrb[78].mxu1 %vm5790_vm15, %v2067_v0 }
 0x5a6   :  { %v2182_v53 = vpop.f32.mrb[48].mxu0 }
 0x5a7   :  { %v2184_v26 = vpop.f32.mrb[49].mxu0  ;;  %2438 = vxpose.xlu1.b32.start [1/16] %v2182_v53, 128 }
 0x5a8   :  { %2470 = vxpose.xlu0.b32.start [1/16] %v2184_v26, 128 }
 0x5aa   :  { %v2188_v4 = vpop.f32.mrb[50].mxu0 }
 0x5ab   :  { %v2190_v11 = vpop.f32.mrb[51].mxu0  ;;  %2439 = vxpose.xlu1.b32.cont [2/16] %v2188_v4, 128 }
 0x5ac   :  { %2471 = vxpose.xlu0.b32.cont [2/16] %v2190_v11, 128 }
 0x5ae   :  { %v2194_v12 = vpop.f32.mrb[52].mxu0 }
 0x5af   :  { %v2196_v33 = vpop.f32.mrb[53].mxu0  ;;  %2440 = vxpose.xlu1.b32.cont [3/16] %v2194_v12, 128 }
 0x5b0   :  { %2472 = vxpose.xlu0.b32.cont [3/16] %v2196_v33, 128 }
 0x5b2   :  { %v2200_v40 = vpop.f32.mrb[54].mxu0 }
 0x5b3   :  { %v2202_v36 = vpop.f32.mrb[55].mxu0  ;;  %2441 = vxpose.xlu1.b32.cont [4/16] %v2200_v40, 128 }
 0x5b4   :  { %2473 = vxpose.xlu0.b32.cont [4/16] %v2202_v36, 128 }
 0x5b6   :  { %v2206_v39 = vpop.f32.mrb[56].mxu0 }
 0x5b7   :  { %v2208_v44 = vpop.f32.mrb[57].mxu0  ;;  %2442 = vxpose.xlu1.b32.cont [5/16] %v2206_v39, 128 }
 0x5b8   :  { %2474 = vxpose.xlu0.b32.cont [5/16] %v2208_v44, 128 }
 0x5ba   :  { %v2212_v35 = vpop.f32.mrb[58].mxu0 }
 0x5bb   :  { %v2214_v50 = vpop.f32.mrb[59].mxu0  ;;  %2443 = vxpose.xlu1.b32.cont [6/16] %v2212_v35, 128  ;;  %v5281_v23 = vpop.f32.mrb[48].mxu1 }
 0x5bc   :  { %2475 = vxpose.xlu0.b32.cont [6/16] %v2214_v50, 128  ;;  %v2345_v52 = vpop.f32.mrb[49].mxu1 }
 0x5be   :  { %v2218_v55 = vpop.f32.mrb[60].mxu0 }
 0x5bf   :  { %v2220_v13 = vpop.f32.mrb[61].mxu0  ;;  %2444 = vxpose.xlu1.b32.cont [7/16] %v2218_v55, 128  ;;  %v2349_v43 = vpop.f32.mrb[50].mxu1 }
 0x5c0   :  { %2476 = vxpose.xlu0.b32.cont [7/16] %v2220_v13, 128  ;;  %v2351_v61 = vpop.f32.mrb[51].mxu1 }
 0x5c2   :  { %v2224_v57 = vpop.f32.mrb[62].mxu0 }
 0x5c3   :  { %v2226_v48 = vpop.f32.mrb[63].mxu0  ;;  %2445 = vxpose.xlu1.b32.cont [8/16] %v2224_v57, 128  ;;  %v2355_v2 = vpop.f32.mrb[52].mxu1 }
 0x5c4   :  { %2477 = vxpose.xlu0.b32.cont [8/16] %v2226_v48, 128  ;;  %v2357_v32 = vpop.f32.mrb[53].mxu1 }
 0x5c6   :  { %v2230_v24 = vpop.f32.mrb[64].mxu0 }
 0x5c7   :  { %v2232_v31 = vpop.f32.mrb[65].mxu0  ;;  %2446 = vxpose.xlu1.b32.cont [9/16] %v2230_v24, 128  ;;  %v2361_v49 = vpop.f32.mrb[54].mxu1 }
 0x5c8   :  { %2478 = vxpose.xlu0.b32.cont [9/16] %v2232_v31, 128  ;;  %v2363_v51 = vpop.f32.mrb[55].mxu1 }
 0x5ca   :  { %v2236_v54 = vpop.f32.mrb[66].mxu0 }
 0x5cb   :  { %v2238_v37 = vpop.f32.mrb[67].mxu0  ;;  %2447 = vxpose.xlu1.b32.cont [10/16] %v2236_v54, 128  ;;  %v2367_v22 = vpop.f32.mrb[56].mxu1 }
 0x5cc   :  { %2479 = vxpose.xlu0.b32.cont [10/16] %v2238_v37, 128  ;;  %v2369_v6 = vpop.f32.mrb[57].mxu1 }
 0x5ce   :  { %v2242_v7 = vpop.f32.mrb[68].mxu0 }
 0x5cf   :  { %v2244_v15 = vpop.f32.mrb[69].mxu0  ;;  %2448 = vxpose.xlu1.b32.cont [11/16] %v2242_v7, 128  ;;  %v2373_v60 = vpop.f32.mrb[58].mxu1 }
 0x5d0   :  { %2480 = vxpose.xlu0.b32.cont [11/16] %v2244_v15, 128  ;;  %v2375_v8 = vpop.f32.mrb[59].mxu1 }
 0x5d2   :  { %v2248_v63 = vpop.f32.mrb[70].mxu0 }
 0x5d3   :  { %v2250_v19 = vpop.f32.mrb[71].mxu0  ;;  %2449 = vxpose.xlu1.b32.cont [12/16] %v2248_v63, 128  ;;  %v2379_v47 = vpop.f32.mrb[60].mxu1 }
 0x5d4   :  { %2481 = vxpose.xlu0.b32.cont [12/16] %v2250_v19, 128  ;;  %v2381_v29 = vpop.f32.mrb[61].mxu1 }
 0x5d6   :  { %v2254_v59 = vpop.f32.mrb[72].mxu0 }
 0x5d7   :  { %v2256_v25 = vpop.f32.mrb[73].mxu0  ;;  %2450 = vxpose.xlu1.b32.cont [13/16] %v2254_v59, 128  ;;  %v2385_v58 = vpop.f32.mrb[62].mxu1 }
 0x5d8   :  { %2482 = vxpose.xlu0.b32.cont [13/16] %v2256_v25, 128  ;;  %v2387_v5 = vpop.f32.mrb[63].mxu1 }
 0x5da   :  { %v2260_v62 = vpop.f32.mrb[74].mxu0 }
 0x5db   :  { %v2262_v45 = vpop.f32.mrb[75].mxu0  ;;  %2451 = vxpose.xlu1.b32.cont [14/16] %v2260_v62, 128  ;;  %v2391_v16 = vpop.f32.mrb[64].mxu1 }
 0x5dc   :  { %2483 = vxpose.xlu0.b32.cont [14/16] %v2262_v45, 128  ;;  %v2393_v20 = vpop.f32.mrb[65].mxu1 }
 0x5de   :  { %v2266_v56 = vpop.f32.mrb[76].mxu0 }
 0x5df   :  { %v2268_v10 = vpop.f32.mrb[77].mxu0  ;;  %2452 = vxpose.xlu1.b32.cont [15/16] %v2266_v56, 128  ;;  %v2397_v30 = vpop.f32.mrb[66].mxu1 }
 0x5e0   :  { %2484 = vxpose.xlu0.b32.cont [15/16] %v2268_v10, 128  ;;  %v2399_v14 = vpop.f32.mrb[67].mxu1 }
 0x5e2   :  { %v2272_v1 = vpop.f32.mrb[78].mxu0 }
 0x5e3   :  { %v2274_v9 = vpop.f32.mrb[79].mxu0  ;;  %2453 = vxpose.xlu1.b32.end [16/16] %v2272_v1, 128  ;;  %v2403_v17 = vpop.f32.mrb[68].mxu1 }
 0x5e4   :  { %2485 = vxpose.xlu0.b32.end [16/16] %v2274_v9, 128  ;;  %v2405_v34 = vpop.f32.mrb[69].mxu1 }
 0x5e7   :  { %2534 = vxpose.xlu1.b32.start [1/16] %v2345_v52, 128  ;;  %v2409_v18 = vpop.f32.mrb[70].mxu1 }
 0x5e8   :  { %2502 = vxpose.xlu0.b32.start [1/16] %v5281_v23, 128  ;;  %v2411_v28 = vpop.f32.mrb[71].mxu1 }
 0x5eb   :  { %2535 = vxpose.xlu1.b32.cont [2/16] %v2351_v61, 128  ;;  %v2415_v21 = vpop.f32.mrb[72].mxu1 }
 0x5ec   :  { %2503 = vxpose.xlu0.b32.cont [2/16] %v2349_v43, 128  ;;  %v2417_v3 = vpop.f32.mrb[73].mxu1 }
 0x5ef   :  { %2536 = vxpose.xlu1.b32.cont [3/16] %v2357_v32, 128  ;;  %v2421_v42 = vpop.f32.mrb[74].mxu1 }
 0x5f0   :  { %2504 = vxpose.xlu0.b32.cont [3/16] %v2355_v2, 128  ;;  %v2423_v41 = vpop.f32.mrb[75].mxu1 }
 0x5f3   :  { %2537 = vxpose.xlu1.b32.cont [4/16] %v2363_v51, 128  ;;  %v2427_v46 = vpop.f32.mrb[76].mxu1 }
 0x5f4   :  { %2505 = vxpose.xlu0.b32.cont [4/16] %v2361_v49, 128  ;;  %v2429_v38 = vpop.f32.mrb[77].mxu1 }
 0x5f7   :  { %2538 = vxpose.xlu1.b32.cont [5/16] %v2369_v6, 128  ;;  %v2433_v27 = vpop.f32.mrb[78].mxu1 }
 0x5f8   :  { %2506 = vxpose.xlu0.b32.cont [5/16] %v2367_v22, 128  ;;  %v2435_v0 = vpop.f32.mrb[79].mxu1 }
 0x5fb   :  { %2539 = vxpose.xlu1.b32.cont [6/16] %v2375_v8, 128 }
 0x5fc   :  { %2507 = vxpose.xlu0.b32.cont [6/16] %v2373_v60, 128 }
 0x5ff   :  { %2540 = vxpose.xlu1.b32.cont [7/16] %v2381_v29, 128 }
 0x600   :  { %2508 = vxpose.xlu0.b32.cont [7/16] %v2379_v47, 128 }
 0x603   :  { %2541 = vxpose.xlu1.b32.cont [8/16] %v2387_v5, 128 }
 0x604   :  { %2509 = vxpose.xlu0.b32.cont [8/16] %v2385_v58, 128 }
 0x607   :  { %2542 = vxpose.xlu1.b32.cont [9/16] %v2393_v20, 128 }
 0x608   :  { %2510 = vxpose.xlu0.b32.cont [9/16] %v2391_v16, 128 }
 0x60b   :  { %2543 = vxpose.xlu1.b32.cont [10/16] %v2399_v14, 128 }
 0x60c   :  { %2511 = vxpose.xlu0.b32.cont [10/16] %v2397_v30, 128 }
 0x60f   :  { %2544 = vxpose.xlu1.b32.cont [11/16] %v2405_v34, 128 }
 0x610   :  { %2512 = vxpose.xlu0.b32.cont [11/16] %v2403_v17, 128 }
 0x613   :  { %2545 = vxpose.xlu1.b32.cont [12/16] %v2411_v28, 128 }
 0x614   :  { %2513 = vxpose.xlu0.b32.cont [12/16] %v2409_v18, 128 }
 0x617   :  { %2546 = vxpose.xlu1.b32.cont [13/16] %v2417_v3, 128 }
 0x618   :  { %2514 = vxpose.xlu0.b32.cont [13/16] %v2415_v21, 128 }
 0x61b   :  { %2547 = vxpose.xlu1.b32.cont [14/16] %v2423_v41, 128 }
 0x61c   :  { %2515 = vxpose.xlu0.b32.cont [14/16] %v2421_v42, 128 }
 0x61f   :  { %2548 = vxpose.xlu1.b32.cont [15/16] %v2429_v38, 128 }
 0x620   :  { %2516 = vxpose.xlu0.b32.cont [15/16] %v2427_v46, 128 }
 0x623   :  { %2549 = vxpose.xlu1.b32.end [16/16] %v2435_v0, 128 }
 0x624   :  { %2517 = vxpose.xlu0.b32.end [16/16] %v2433_v27, 128 }
 0x627   :  { %v2454_v53 = vpop.trf.xlu1 }
 0x628   :  { %2566 = vst [vmem:[%s5490_s11] sm:$0xff] %v2454_v53  ;;  %v2486_v26 = vpop.trf.xlu0 }
 0x629   :  { %2582 = vst [vmem:[%s5490_s11 + $0x80] sm:$0xff] %v2486_v26 }
 0x62b   :  { %v2455_v4 = vpop.trf.xlu1 }
 0x62c   :  { %2567 = vst [vmem:[%s5490_s11 + $0x8] sm:$0xff] %v2455_v4  ;;  %v2487_v11 = vpop.trf.xlu0 }
 0x62d   :  { %2583 = vst [vmem:[%s5490_s11 + $0x88] sm:$0xff] %v2487_v11 }
 0x62f   :  { %v2456_v12 = vpop.trf.xlu1 }
 0x630   :  { %2568 = vst [vmem:[%s5490_s11 + $0x10] sm:$0xff] %v2456_v12  ;;  %v2488_v33 = vpop.trf.xlu0 }
 0x631   :  { %2584 = vst [vmem:[%s5490_s11 + $0x90] sm:$0xff] %v2488_v33 }
 0x633   :  { %v2457_v40 = vpop.trf.xlu1 }
 0x634   :  { %2569 = vst [vmem:[%s5490_s11 + $0x18] sm:$0xff] %v2457_v40  ;;  %v2489_v36 = vpop.trf.xlu0 }
 0x635   :  { %2585 = vst [vmem:[%s5490_s11 + $0x98] sm:$0xff] %v2489_v36 }
 0x637   :  { %v2458_v39 = vpop.trf.xlu1 }
 0x638   :  { %2570 = vst [vmem:[%s5490_s11 + $0x20] sm:$0xff] %v2458_v39  ;;  %v2490_v44 = vpop.trf.xlu0 }
 0x639   :  { %2586 = vst [vmem:[%s5490_s11 + $0xa0] sm:$0xff] %v2490_v44 }
 0x63b   :  { %v2459_v35 = vpop.trf.xlu1 }
 0x63c   :  { %2571 = vst [vmem:[%s5490_s11 + $0x28] sm:$0xff] %v2459_v35  ;;  %v2491_v50 = vpop.trf.xlu0 }
 0x63d   :  { %2587 = vst [vmem:[%s5490_s11 + $0xa8] sm:$0xff] %v2491_v50 }
 0x63f   :  { %v2460_v23 = vpop.trf.xlu1 }
 0x640   :  { %2572 = vst [vmem:[%s5490_s11 + $0x30] sm:$0xff] %v2460_v23  ;;  %v2492_v52 = vpop.trf.xlu0 }
 0x641   :  { %2588 = vst [vmem:[%s5490_s11 + $0xb0] sm:$0xff] %v2492_v52 }
 0x643   :  { %v2461_v55 = vpop.trf.xlu1 }
 0x644   :  { %2573 = vst [vmem:[%s5490_s11 + $0x38] sm:$0xff] %v2461_v55  ;;  %v2493_v13 = vpop.trf.xlu0 }
 0x645   :  { %2589 = vst [vmem:[%s5490_s11 + $0xb8] sm:$0xff] %v2493_v13 }
 0x647   :  { %v2462_v43 = vpop.trf.xlu1 }
 0x648   :  { %2574 = vst [vmem:[%s5490_s11 + $0x40] sm:$0xff] %v2462_v43  ;;  %v2494_v61 = vpop.trf.xlu0 }
 0x649   :  { %2590 = vst [vmem:[%s5490_s11 + $0xc0] sm:$0xff] %v2494_v61 }
 0x64b   :  { %v2463_v57 = vpop.trf.xlu1 }
 0x64c   :  { %2575 = vst [vmem:[%s5490_s11 + $0x48] sm:$0xff] %v2463_v57  ;;  %v2495_v48 = vpop.trf.xlu0 }
 0x64d   :  { %2591 = vst [vmem:[%s5490_s11 + $0xc8] sm:$0xff] %v2495_v48 }
 0x64f   :  { %v2464_v2 = vpop.trf.xlu1 }
 0x650   :  { %2576 = vst [vmem:[%s5490_s11 + $0x50] sm:$0xff] %v2464_v2  ;;  %v2496_v32 = vpop.trf.xlu0 }
 0x651   :  { %2592 = vst [vmem:[%s5490_s11 + $0xd0] sm:$0xff] %v2496_v32 }
 0x653   :  { %v2465_v24 = vpop.trf.xlu1 }
 0x654   :  { %2577 = vst [vmem:[%s5490_s11 + $0x58] sm:$0xff] %v2465_v24  ;;  %v2497_v31 = vpop.trf.xlu0 }
 0x655   :  { %2593 = vst [vmem:[%s5490_s11 + $0xd8] sm:$0xff] %v2497_v31 }
 0x657   :  { %v2466_v49 = vpop.trf.xlu1 }
 0x658   :  { %2578 = vst [vmem:[%s5490_s11 + $0x60] sm:$0xff] %v2466_v49  ;;  %v2498_v51 = vpop.trf.xlu0 }
 0x659   :  { %2594 = vst [vmem:[%s5490_s11 + $0xe0] sm:$0xff] %v2498_v51 }
 0x65b   :  { %v2467_v54 = vpop.trf.xlu1 }
 0x65c   :  { %2579 = vst [vmem:[%s5490_s11 + $0x68] sm:$0xff] %v2467_v54  ;;  %v2499_v37 = vpop.trf.xlu0 }
 0x65d   :  { %2595 = vst [vmem:[%s5490_s11 + $0xe8] sm:$0xff] %v2499_v37 }
 0x65f   :  { %v2468_v22 = vpop.trf.xlu1 }
 0x660   :  { %2580 = vst [vmem:[%s5490_s11 + $0x70] sm:$0xff] %v2468_v22  ;;  %v2500_v6 = vpop.trf.xlu0 }
 0x661   :  { %2596 = vst [vmem:[%s5490_s11 + $0xf0] sm:$0xff] %v2500_v6 }
 0x663   :  { %v2469_v7 = vpop.trf.xlu1 }
 0x664   :  { %2581 = vst [vmem:[%s5490_s11 + $0x78] sm:$0xff] %v2469_v7  ;;  %v2501_v15 = vpop.trf.xlu0 }
 0x665   :  { %2597 = vst [vmem:[%s5490_s11 + $0xf8] sm:$0xff] %v2501_v15 }
 0x667   :  { %v2550_v60 = vpop.trf.xlu1 }
 0x668   :  { %2614 = vst [vmem:[%s5490_s11 + $0x180] sm:$0xff] %v2550_v60  ;;  %v2518_v8 = vpop.trf.xlu0 }
 0x669   :  { %2598 = vst [vmem:[%s5490_s11 + $0x100] sm:$0xff] %v2518_v8 }
 0x66b   :  { %v2551_v63 = vpop.trf.xlu1 }
 0x66c   :  { %2615 = vst [vmem:[%s5490_s11 + $0x188] sm:$0xff] %v2551_v63  ;;  %v2519_v19 = vpop.trf.xlu0 }
 0x66d   :  { %2599 = vst [vmem:[%s5490_s11 + $0x108] sm:$0xff] %v2519_v19 }
 0x66f   :  { %v2552_v47 = vpop.trf.xlu1 }
 0x670   :  { %2616 = vst [vmem:[%s5490_s11 + $0x190] sm:$0xff] %v2552_v47  ;;  %v2520_v29 = vpop.trf.xlu0 }
 0x671   :  { %2600 = vst [vmem:[%s5490_s11 + $0x110] sm:$0xff] %v2520_v29 }
 0x673   :  { %v2553_v59 = vpop.trf.xlu1 }
 0x674   :  { %2617 = vst [vmem:[%s5490_s11 + $0x198] sm:$0xff] %v2553_v59  ;;  %v2521_v25 = vpop.trf.xlu0 }
 0x675   :  { %2601 = vst [vmem:[%s5490_s11 + $0x118] sm:$0xff] %v2521_v25 }
 0x677   :  { %v2554_v58 = vpop.trf.xlu1 }
 0x678   :  { %2618 = vst [vmem:[%s5490_s11 + $0x1a0] sm:$0xff] %v2554_v58  ;;  %v2522_v5 = vpop.trf.xlu0 }
 0x679   :  { %2602 = vst [vmem:[%s5490_s11 + $0x120] sm:$0xff] %v2522_v5 }
 0x67b   :  { %v2555_v62 = vpop.trf.xlu1 }
 0x67c   :  { %2619 = vst [vmem:[%s5490_s11 + $0x1a8] sm:$0xff] %v2555_v62  ;;  %v2523_v45 = vpop.trf.xlu0 }
 0x67d   :  { %2603 = vst [vmem:[%s5490_s11 + $0x128] sm:$0xff] %v2523_v45 }
 0x67f   :  { %v2556_v16 = vpop.trf.xlu1 }
 0x680   :  { %2620 = vst [vmem:[%s5490_s11 + $0x1b0] sm:$0xff] %v2556_v16  ;;  %v2524_v20 = vpop.trf.xlu0 }
 0x681   :  { %2604 = vst [vmem:[%s5490_s11 + $0x130] sm:$0xff] %v2524_v20 }
 0x683   :  { %v2557_v56 = vpop.trf.xlu1 }
 0x684   :  { %2621 = vst [vmem:[%s5490_s11 + $0x1b8] sm:$0xff] %v2557_v56  ;;  %v2525_v10 = vpop.trf.xlu0 }
 0x685   :  { %2605 = vst [vmem:[%s5490_s11 + $0x138] sm:$0xff] %v2525_v10 }
 0x687   :  { %v2558_v30 = vpop.trf.xlu1 }
 0x688   :  { %2622 = vst [vmem:[%s5490_s11 + $0x1c0] sm:$0xff] %v2558_v30  ;;  %v2526_v14 = vpop.trf.xlu0 }
 0x689   :  { %2606 = vst [vmem:[%s5490_s11 + $0x140] sm:$0xff] %v2526_v14 }
 0x68b   :  { %v2559_v1 = vpop.trf.xlu1 }
 0x68c   :  { %2623 = vst [vmem:[%s5490_s11 + $0x1c8] sm:$0xff] %v2559_v1  ;;  %v2527_v9 = vpop.trf.xlu0 }
 0x68d   :  { %2607 = vst [vmem:[%s5490_s11 + $0x148] sm:$0xff] %v2527_v9 }
 0x68f   :  { %v2560_v17 = vpop.trf.xlu1 }
 0x690   :  { %2624 = vst [vmem:[%s5490_s11 + $0x1d0] sm:$0xff] %v2560_v17  ;;  %v2528_v34 = vpop.trf.xlu0 }
 0x691   :  { %2608 = vst [vmem:[%s5490_s11 + $0x150] sm:$0xff] %v2528_v34 }
 0x693   :  { %v2561_v18 = vpop.trf.xlu1 }
 0x694   :  { %2625 = vst [vmem:[%s5490_s11 + $0x1d8] sm:$0xff] %v2561_v18  ;;  %v2529_v28 = vpop.trf.xlu0 }
 0x695   :  { %2609 = vst [vmem:[%s5490_s11 + $0x158] sm:$0xff] %v2529_v28 }
 0x697   :  { %v2562_v21 = vpop.trf.xlu1 }
 0x698   :  { %2626 = vst [vmem:[%s5490_s11 + $0x1e0] sm:$0xff] %v2562_v21  ;;  %v2530_v3 = vpop.trf.xlu0 }
 0x699   :  { %2610 = vst [vmem:[%s5490_s11 + $0x160] sm:$0xff] %v2530_v3 }
 0x69b   :  { %v2563_v42 = vpop.trf.xlu1 }
 0x69c   :  { %2627 = vst [vmem:[%s5490_s11 + $0x1e8] sm:$0xff] %v2563_v42  ;;  %v2531_v41 = vpop.trf.xlu0 }
 0x69d   :  { %2611 = vst [vmem:[%s5490_s11 + $0x168] sm:$0xff] %v2531_v41 }
 0x69f   :  { %v2564_v46 = vpop.trf.xlu1 }
 0x6a0   :  { %2628 = vst [vmem:[%s5490_s11 + $0x1f0] sm:$0xff] %v2564_v46  ;;  %v2532_v38 = vpop.trf.xlu0 }
 0x6a1   :  { %2612 = vst [vmem:[%s5490_s11 + $0x170] sm:$0xff] %v2532_v38 }
 0x6a3   :  { %v2565_v27 = vpop.trf.xlu1 }
 0x6a4   :  { %2629 = vst [vmem:[%s5490_s11 + $0x1f8] sm:$0xff] %v2565_v27  ;;  %v2533_v0 = vpop.trf.xlu0 }
 0x6a5   :  { %2613 = vst [vmem:[%s5490_s11 + $0x178] sm:$0xff] %v2533_v0 }

</bundles_post_ra>
